<compile_context>
chip_gen: v5e
topology: v5e:2x2
jax: 0.10.0
libtpu: 0.0.40
codegen_flags: <defaults>
</compile_context>

<pallas_src>
import math

import jax
import jax.numpy as jnp
from jax.experimental import pallas as pl
from jax.experimental.pallas import tpu as pltpu

_LANE = 128


# ----------------------------------------------------------------------------
# Kernel factory (closure over slab layout + static shapes)
# ----------------------------------------------------------------------------
def _make_kernel(packed, *, BB, S, P):
    w_layout = packed["w_layout"]
    f_layout = packed["f_layout"]
    dims = packed["dims"]
    H, E, I, NL = dims["H"], dims["E"], dims["I"], dims["NL"]
    f32, bf16 = jnp.float32, jnp.bfloat16
    B = BB

    def kernel(x_ref, w_ref, f_ref, out_ref):
        def W(name):                          # bf16 weight slice (static, free view)
            off, r, c = w_layout[name]
            return w_ref[off:off + r, :c]

        def F(name):                          # f32 bias / f32 weight slice
            off, r, c = f_layout[name]
            return f_ref[off:off + r, :c]

        # ---- input embedding: K=I is tiny -> VPU outer product, no MXU ----
        x2d = x_ref[...]                                        # (S*B, I) f32
        w_emb = F("w_emb")                                      # (I, E)
        emb = jnp.broadcast_to(F("b_emb"), (S * B, E))
        for i in range(I):
            emb = emb + x2d[:, i:i + 1] * w_emb[i:i + 1, :]
        emb_all = jnp.maximum(emb, 0.0)                         # relu(embedding), all t

        # ---- encoder layer-0 input gates hoisted over time (1 big matmul) ----
        # enc0_gib = b_ih + [b_hh[:2H], 0]  (r/z hidden biases folded in)
        gi0_all = (jnp.dot(emb_all.astype(bf16), W("enc0_wih"),
                           preferred_element_type=f32)
                   + jnp.broadcast_to(F("enc0_gib"), (S * B, 3 * H)))

        enc0_whh = W("enc0_whh")                                # (H, 3H) bf16
        enc0_bhn = jnp.broadcast_to(F("enc0_bhn"), (B, H))      # pre-broadcast

        def layer_params(prefix, l):
            wcat = W(f"{prefix}_wcat{l}")                               # (in+H, 3H)
            bcat = jnp.broadcast_to(F(f"{prefix}_bcat{l}"), (B, 3 * H))  # hoisted
            whn = W(f"{prefix}_whn{l}")                                  # (H, H)
            bhn = jnp.broadcast_to(F(f"{prefix}_bhn{l}"), (B, H))        # hoisted
            return wcat, bcat, whn, bhn

        enc_p = [layer_params("enc", l) for l in range(1, NL)]
        dec_p = [layer_params("dec", l) for l in range(NL)]

        def cell_pre(gi, h):
            """GRU cell; input gates (incl. r/z hidden biases) precomputed."""
            gh = jnp.dot(h.astype(bf16), enc0_whh, preferred_element_type=f32)
            r = jax.nn.sigmoid(gi[:, :H] + gh[:, :H])
            z = jax.nn.sigmoid(gi[:, H:2 * H] + gh[:, H:2 * H])
            n = jnp.tanh(gi[:, 2 * H:] + r * (gh[:, 2 * H:] + enc0_bhn))
            return (1.0 - z) * n + z * h

        def cell_fused(xin, h, wcat, bcat, whn, bhn):
            """GRU cell with fused [x,h] gate matmul; biases pre-broadcast."""
            xh = jnp.concatenate([xin, h], axis=-1).astype(bf16)
            g = jnp.dot(xh, wcat, preferred_element_type=f32) + bcat      # (B, 3H)
            hn = jnp.dot(h.astype(bf16), whn, preferred_element_type=f32) + bhn
            r = jax.nn.sigmoid(g[:, :H])
            z = jax.nn.sigmoid(g[:, H:2 * H])
            n = jnp.tanh(g[:, 2 * H:] + r * hn)
            return (1.0 - z) * n + z * h

        # ---- encoder: 3-layer GRU over S timesteps (fully unrolled) ----
        h = [jnp.zeros((B, H), f32) for _ in range(NL)]
        for t in range(S):
            h[0] = cell_pre(gi0_all[t * B:(t + 1) * B, :], h[0])
            inp = h[0]
            for l in range(1, NL):
                wc, bc, wn, bn = enc_p[l - 1]
                h[l] = cell_fused(inp, h[l], wc, bc, wn, bn)
                inp = h[l]

        # ---- decoder: P autoregressive 3-layer GRU steps (fully unrolled) ----
        dh = list(h)                                   # decoder_hidden = enc hidden
        dec_in = emb_all[(S - 1) * B:S * B, :]         # relu'd embedded x[:, -1]
        dec_states = []
        for _ in range(P):
            inp = dec_in
            for l in range(NL):
                wc, bc, wn, bn = dec_p[l]
                dh[l] = cell_fused(inp, dh[l], wc, bc, wn, bn)
                inp = dh[l]
            dec_in = jnp.maximum(inp, 0.0)             # relu(GRU output) feeds back
            dec_states.append(dec_in)

        # ---- lane-dense outputs: heads + output embedding, 2 unmasked stores ----
        h_all = jnp.concatenate(h, axis=0).astype(bf16)                  # (3B, H)
        heads = (jnp.dot(h_all, W("w_heads"), preferred_element_type=f32)
                 + jnp.broadcast_to(F("b_heads"), (3 * B, _LANE)))       # (3B, 128)
        dec_stack = jnp.concatenate(dec_states, axis=0).astype(bf16)     # (P*B, H)
        xout = (jnp.dot(dec_stack, W("w_out"), preferred_element_type=f32)
                + jnp.broadcast_to(F("b_out"), (P * B, _LANE)))          # (P*B, 128)
        out_ref[0:3 * B, :] = heads
        out_ref[3 * B:, :] = xout

    return kernel


# ----------------------------------------------------------------------------
# Wrapper
# ----------------------------------------------------------------------------
def social_model_dist_forward(x, packed, pred_length, batch_block=None):
    """JAX/Pallas equivalent of SocialModel_Dist.forward (return_embedding=False)."""
    B, S, I = x.shape
    P = pred_length
    if batch_block is None:
        # fill the MXU M-dim when batch allows; tiny batches use one 8-row block
        batch_block = min(256, ((B + 7) // 8) * 8)
    BB = max(8, ((batch_block + 7) // 8) * 8)
    B_pad = ((B + BB - 1) // BB) * BB
    NB = B_pad // BB
    if B_pad != B:
        x = jnp.pad(x, ((0, B_pad - B), (0, 0), (0, 0)))

    # (block, time, batch-in-block) layout: the kernel sees one dense 2-D
    # (S*BB, I) slab per grid step (enables the hoisted layer-0 gate matmul).
    x2d = (x.astype(jnp.float32)
           .reshape(NB, BB, S, I).transpose(0, 2, 1, 3).reshape(NB * S * BB, I))

    kernel = _make_kernel(packed, BB=BB, S=S, P=P)
    w_slab, f_slab = packed["w_slab"], packed["f_slab"]
    ROWS = (3 + P) * BB                      # [heads(h0|h1|h2) | xout step 0..P-1]

    out = pl.pallas_call(
        kernel,
        grid=(NB,),
        out_shape=jax.ShapeDtypeStruct((NB * ROWS, _LANE), jnp.float32),
        in_specs=[
            pl.BlockSpec((S * BB, I), lambda b: (b, 0)),
            pl.BlockSpec(tuple(w_slab.shape), lambda b: (0, 0)),   # fetched once
            pl.BlockSpec(tuple(f_slab.shape), lambda b: (0, 0)),   # fetched once
        ],
        out_specs=pl.BlockSpec((ROWS, _LANE), lambda b: (b, 0)),
        compiler_params=pltpu.CompilerParams(
            dimension_semantics=("parallel",)),   # batch blocks shard over 2 TCs
    )(x2d, w_slab, f_slab)

    # ---- split / permute the lane-dense slab in the wrapper (cheap XLA) ----
    out = out.reshape(NB, 3 + P, BB, _LANE)
    heads = out[:, :3].transpose(0, 2, 1, 3).reshape(B_pad, 3, _LANE)[:B]
    # w_heads column blocks: [gender | income | edu]; row blocks: hidden 0/1/2
    y = jnp.stack([heads[:, 0, 0:2],          # gender(hidden[0])
                   heads[:, 1, 2:4],          # income(hidden[1])
                   heads[:, 2, 4:6]], axis=1)  # edu(hidden[2])
    output_i = (heads[:, 0, 2:4],             # income(hidden[0])
                heads[:, 0, 4:6],             # edu(hidden[0])
                heads[:, 1, 0:2],             # gender(hidden[1])
                heads[:, 1, 4:6],             # edu(hidden[1])
                heads[:, 2, 0:2],             # gender(hidden[2])
                heads[:, 2, 2:4])             # income(hidden[2])
    x_outputs = (out[:, 3:, :, :I].transpose(0, 2, 1, 3)
                 .reshape(B_pad, P, I)[:B])                          # (B, P, I)
    return y, x_outputs, output_i


# ----------------------------------------------------------------------------
# Parameter init (PyTorch layout) + wrapper-side slab packing for the kernel
# ----------------------------------------------------------------------------
def init_torch_params(key, input_size, embedding_size, rnn_size, num_layers=3):
    """Deterministic PyTorch-style U(-1/sqrt(fan), +1/sqrt(fan)) init, torch layout."""
    I, E, H = input_size, embedding_size, rnn_size
    keys = iter(jax.random.split(key, 128))

    def u(shape, fan_in):
        b = 1.0 / math.sqrt(fan_in)
        return jax.random.uniform(next(keys), shape, jnp.float32, -b, b)

    p = {}
    p["input_embedding.weight"] = u((E, I), I)
    p["input_embedding.bias"] = u((E,), I)
    p["output_embedding.weight"] = u((I, E), E)
    p["output_embedding.bias"] = u((I,), E)
    for name in ("gender", "income", "edu"):
        p[f"{name}.weight"] = u((2, H), H)
        p[f"{name}.bias"] = u((2,), H)
    for rnn in ("RNN", "DeRNN"):
        for l in range(num_layers):
            in_l = E if l == 0 else H
            p[f"{rnn}.weight_ih_l{l}"] = u((3 * H, in_l), H)
            p[f"{rnn}.weight_hh_l{l}"] = u((3 * H, H), H)
            p[f"{rnn}.bias_ih_l{l}"] = u((3 * H,), H)
            p[f"{rnn}.bias_hh_l{l}"] = u((3 * H,), H)
    return p


def prepare_kernel_params(tp, num_layers=3):
    """Transpose / fuse / pack torch-layout params into 2 slabs for the kernel."""
    f32, bf16 = jnp.float32, jnp.bfloat16
    E, I = tp["input_embedding.weight"].shape
    H = tp["RNN.weight_hh_l0"].shape[1]
    # The module feeds the GRU output (width H) back as the next GRU input
    # (width E) and into output_embedding (width E) -> requires E == H.
    assert E == H, "SocialModel_Dist forward requires embedding_size == rnn_size"

    w_entries, f_entries = [], []          # bf16 weights / f32 biases+small weights

    def add_w(name, arr): w_entries.append((name, jnp.asarray(arr, f32)))
    def add_f(name, arr): f_entries.append((name, jnp.asarray(arr, f32)))

    # input embedding (VPU outer-product path -> stays f32)
    add_f("w_emb", tp["input_embedding.weight"].T)                     # (I, E)
    add_f("b_emb", tp["input_embedding.bias"][None, :])                # (1, E)

    # encoder layer 0: input gates are hoisted over time -> keep unfused weights;
    # fold the r/z hidden biases into the hoisted input-gate bias.
    add_w("enc0_wih", tp["RNN.weight_ih_l0"].T)                        # (E, 3H)
    add_w("enc0_whh", tp["RNN.weight_hh_l0"].T)                        # (H, 3H)
    b_ih0, b_hh0 = tp["RNN.bias_ih_l0"], tp["RNN.bias_hh_l0"]
    gib = b_ih0 + jnp.concatenate([b_hh0[:2 * H], jnp.zeros((H,), f32)])
    add_f("enc0_gib", gib[None, :])                                    # (1, 3H)
    add_f("enc0_bhn", b_hh0[2 * H:][None, :])                          # (1, H)

    def fuse(rnn, l):
        w_ih = tp[f"{rnn}.weight_ih_l{l}"].T                           # (in, 3H)
        w_hh = tp[f"{rnn}.weight_hh_l{l}"].T                           # (H, 3H)
        b_ih, b_hh = tp[f"{rnn}.bias_ih_l{l}"], tp[f"{rnn}.bias_hh_l{l}"]
        w_cat = jnp.concatenate(
            [w_ih,
             jnp.concatenate([w_hh[:, :2 * H], jnp.zeros((H, H), f32)], axis=1)],
            axis=0)                                                    # (in+H, 3H)
        b_cat = jnp.concatenate([b_ih[:2 * H] + b_hh[:2 * H], b_ih[2 * H:]])[None, :]
        return w_cat, b_cat, w_hh[:, 2 * H:], b_hh[2 * H:][None, :]

    for rnn, name, layers in (("RNN", "enc", range(1, num_layers)),
                              ("DeRNN", "dec", range(num_layers))):
        for l in layers:
            wc, bc, wn, bn = fuse(rnn, l)
            add_w(f"{name}_wcat{l}", wc)
            add_f(f"{name}_bcat{l}", bc)
            add_w(f"{name}_whn{l}", wn)
            add_f(f"{name}_bhn{l}", bn)

    # heads + output embedding, lane-padded to 128 for lane-dense stores
    w_heads = jnp.concatenate([tp["gender.weight"].T, tp["income.weight"].T,
                               tp["edu.weight"].T], axis=1)            # (H, 6)
    b_heads = jnp.concatenate([tp["gender.bias"], tp["income.bias"],
                               tp["edu.bias"]])[None, :]               # (1, 6)
    add_w("w_heads", jnp.pad(w_heads, ((0, 0), (0, _LANE - 6))))
    add_f("b_heads", jnp.pad(b_heads, ((0, 0), (0, _LANE - 6))))
    add_w("w_out", jnp.pad(tp["output_embedding.weight"].T,
                           ((0, 0), (0, _LANE - I))))                  # (E, 128)
    add_f("b_out", jnp.pad(tp["output_embedding.bias"][None, :],
                           ((0, 0), (0, _LANE - I))))

    def pack(entries, dtype):
        layout, blocks, off = {}, [], 0
        for name, arr in entries:
            r, c = arr.shape
            rp = ((r + 7) // 8) * 8                  # sublane-align every entry
            layout[name] = (off, r, c)
            blocks.append(jnp.pad(arr, ((0, rp - r), (0, _LANE - c))))
            off += rp
        return jnp.concatenate(blocks, axis=0).astype(dtype), layout

    w_slab, w_layout = pack(w_entries, bf16)
    f_slab, f_layout = pack(f_entries, f32)
    return dict(w_slab=w_slab, f_slab=f_slab,
                w_layout=w_layout, f_layout=f_layout,
                dims=dict(I=I, E=E, H=H, NL=num_layers))


# ----------------------------------------------------------------------------
if __name__ == "__main__":
    # small shapes consistent with the module (trajectory model: input_size=2)
    batch, seq_length, input_size = 2, 8, 2
    embedding_size = rnn_size = 32
    pred_length = 4

    key = jax.random.PRNGKey(0)
    k_param, k_x = jax.random.split(key)
    tparams = init_torch_params(k_param, input_size, embedding_size, rnn_size)
    packed = prepare_kernel_params(tparams)
    x = jax.random.normal(k_x, (batch, seq_length, input_size), jnp.float32)

    y, x_outputs, output_i = social_model_dist_forward(x, packed, pred_length)
    jax.block_until_ready((y, x_outputs, output_i))

    assert y.shape == (batch, 3, 2), y.shape
    assert x_outputs.shape == (batch, pred_length, input_size), x_outputs.shape
    assert len(output_i) == 6 and all(o.shape == (batch, 2) for o in output_i)
    finite = (bool(jnp.all(jnp.isfinite(y)))
              and bool(jnp.all(jnp.isfinite(x_outputs)))
              and all(bool(jnp.all(jnp.isfinite(o))) for o in output_i))
    assert finite
    print("KERNEL_OK")
</pallas_src>

<mosaic_0001>
module attributes {stable_mosaic.version = 11 : i64} {
  func.func @kernel(%arg0: i32, %arg1: memref<64x2xf32, #tpu.memory_space<vmem>>, %arg2: memref<608x128xbf16, #tpu.memory_space<vmem>>, %arg3: memref<128x128xf32, #tpu.memory_space<vmem>>, %arg4: memref<56x128xf32, #tpu.memory_space<vmem>>) attributes {dimension_semantics = [#tpu.dimension_semantics<parallel>], iteration_bounds = array<i64: 1>, scalar_prefetch = 0 : i64, scratch_operands = 0 : i64, tpu.core_type = #tpu.core_type<tc>, window_params = [{transform_indices = @transform_0, window_bounds = array<i64: 64, 2>}, {pipeline_mode = #tpu.pipeline_mode<synchronous>, transform_indices = @transform_1, window_bounds = array<i64: 608, 128>}, {pipeline_mode = #tpu.pipeline_mode<synchronous>, transform_indices = @transform_2, window_bounds = array<i64: 128, 128>}, {transform_indices = @transform_3, window_bounds = array<i64: 56, 128>}]} {
    %c0 = arith.constant 0 : index
    %c0_0 = arith.constant 0 : index
    %0 = vector.load %arg1[%c0, %c0_0] : memref<64x2xf32, #tpu.memory_space<vmem>>, vector<64x2xf32>
    %c0_1 = arith.constant 0 : index
    %c0_2 = arith.constant 0 : index
    %1 = vector.load %arg3[%c0_1, %c0_2] : memref<128x128xf32, #tpu.memory_space<vmem>>, vector<2x32xf32>
    %c8 = arith.constant 8 : index
    %c0_3 = arith.constant 0 : index
    %2 = vector.load %arg3[%c8, %c0_3] : memref<128x128xf32, #tpu.memory_space<vmem>>, vector<1x32xf32>
    %3 = vector.shape_cast %2 : vector<1x32xf32> to vector<1x32xf32>
    %4 = vector.broadcast %3 : vector<1x32xf32> to vector<64x32xf32>
    %5 = vector.extract_strided_slice %0 {offsets = [0, 0], sizes = [64, 1], strides = [1, 1]} : vector<64x2xf32> to vector<64x1xf32>
    %6 = vector.extract_strided_slice %1 {offsets = [0, 0], sizes = [1, 32], strides = [1, 1]} : vector<2x32xf32> to vector<1x32xf32>
    %7 = vector.broadcast %5 : vector<64x1xf32> to vector<64x32xf32>
    %8 = vector.broadcast %6 : vector<1x32xf32> to vector<64x32xf32>
    %9 = arith.mulf %7, %8 : vector<64x32xf32>
    %10 = arith.addf %4, %9 : vector<64x32xf32>
    %11 = vector.extract_strided_slice %0 {offsets = [0, 1], sizes = [64, 1], strides = [1, 1]} : vector<64x2xf32> to vector<64x1xf32>
    %12 = vector.extract_strided_slice %1 {offsets = [1, 0], sizes = [1, 32], strides = [1, 1]} : vector<2x32xf32> to vector<1x32xf32>
    %13 = vector.broadcast %11 : vector<64x1xf32> to vector<64x32xf32>
    %14 = vector.broadcast %12 : vector<1x32xf32> to vector<64x32xf32>
    %15 = arith.mulf %13, %14 : vector<64x32xf32>
    %16 = arith.addf %10, %15 : vector<64x32xf32>
    %cst = arith.constant 0.000000e+00 : f32
    %17 = vector.broadcast %cst : f32 to vector<64x32xf32>
    %18 = arith.maximumf %16, %17 : vector<64x32xf32>
    %19 = arith.truncf %18 : vector<64x32xf32> to vector<64x32xbf16>
    %c0_4 = arith.constant 0 : index
    %c0_5 = arith.constant 0 : index
    %20 = vector.load %arg2[%c0_4, %c0_5] : memref<608x128xbf16, #tpu.memory_space<vmem>>, vector<32x96xbf16>
    %cst_6 = arith.constant dense<0.000000e+00> : vector<64x96xf32>
    %21 = tpu.matmul %19, %20, %cst_6 {dimension_numbers = #tpu.dot_dimension_numbers<[1], [0], [0], [1], [0, 0, 1, 1], [], []>} : vector<64x32xbf16>, vector<32x96xbf16>, vector<64x96xf32> -> vector<64x96xf32>
    %c16 = arith.constant 16 : index
    %c0_7 = arith.constant 0 : index
    %22 = vector.load %arg3[%c16, %c0_7] : memref<128x128xf32, #tpu.memory_space<vmem>>, vector<1x96xf32>
    %23 = vector.shape_cast %22 : vector<1x96xf32> to vector<1x96xf32>
    %24 = vector.broadcast %23 : vector<1x96xf32> to vector<64x96xf32>
    %25 = arith.addf %21, %24 : vector<64x96xf32>
    %c32 = arith.constant 32 : index
    %c0_8 = arith.constant 0 : index
    %26 = vector.load %arg2[%c32, %c0_8] : memref<608x128xbf16, #tpu.memory_space<vmem>>, vector<32x96xbf16>
    %c24 = arith.constant 24 : index
    %c0_9 = arith.constant 0 : index
    %27 = vector.load %arg3[%c24, %c0_9] : memref<128x128xf32, #tpu.memory_space<vmem>>, vector<1x32xf32>
    %28 = vector.shape_cast %27 : vector<1x32xf32> to vector<1x32xf32>
    %29 = vector.broadcast %28 : vector<1x32xf32> to vector<8x32xf32>
    %c64 = arith.constant 64 : index
    %c0_10 = arith.constant 0 : index
    %30 = vector.load %arg2[%c64, %c0_10] : memref<608x128xbf16, #tpu.memory_space<vmem>>, vector<64x96xbf16>
    %c32_11 = arith.constant 32 : index
    %c0_12 = arith.constant 0 : index
    %31 = vector.load %arg3[%c32_11, %c0_12] : memref<128x128xf32, #tpu.memory_space<vmem>>, vector<1x96xf32>
    %32 = vector.shape_cast %31 : vector<1x96xf32> to vector<1x96xf32>
    %33 = vector.broadcast %32 : vector<1x96xf32> to vector<8x96xf32>
    %c128 = arith.constant 128 : index
    %c0_13 = arith.constant 0 : index
    %34 = vector.load %arg2[%c128, %c0_13] : memref<608x128xbf16, #tpu.memory_space<vmem>>, vector<32x32xbf16>
    %c40 = arith.constant 40 : index
    %c0_14 = arith.constant 0 : index
    %35 = vector.load %arg3[%c40, %c0_14] : memref<128x128xf32, #tpu.memory_space<vmem>>, vector<1x32xf32>
    %36 = vector.shape_cast %35 : vector<1x32xf32> to vector<1x32xf32>
    %37 = vector.broadcast %36 : vector<1x32xf32> to vector<8x32xf32>
    %c160 = arith.constant 160 : index
    %c0_15 = arith.constant 0 : index
    %38 = vector.load %arg2[%c160, %c0_15] : memref<608x128xbf16, #tpu.memory_space<vmem>>, vector<64x96xbf16>
    %c48 = arith.constant 48 : index
    %c0_16 = arith.constant 0 : index
    %39 = vector.load %arg3[%c48, %c0_16] : memref<128x128xf32, #tpu.memory_space<vmem>>, vector<1x96xf32>
    %40 = vector.shape_cast %39 : vector<1x96xf32> to vector<1x96xf32>
    %41 = vector.broadcast %40 : vector<1x96xf32> to vector<8x96xf32>
    %c224 = arith.constant 224 : index
    %c0_17 = arith.constant 0 : index
    %42 = vector.load %arg2[%c224, %c0_17] : memref<608x128xbf16, #tpu.memory_space<vmem>>, vector<32x32xbf16>
    %c56 = arith.constant 56 : index
    %c0_18 = arith.constant 0 : index
    %43 = vector.load %arg3[%c56, %c0_18] : memref<128x128xf32, #tpu.memory_space<vmem>>, vector<1x32xf32>
    %44 = vector.shape_cast %43 : vector<1x32xf32> to vector<1x32xf32>
    %45 = vector.broadcast %44 : vector<1x32xf32> to vector<8x32xf32>
    %c256 = arith.constant 256 : index
    %c0_19 = arith.constant 0 : index
    %46 = vector.load %arg2[%c256, %c0_19] : memref<608x128xbf16, #tpu.memory_space<vmem>>, vector<64x96xbf16>
    %c64_20 = arith.constant 64 : index
    %c0_21 = arith.constant 0 : index
    %47 = vector.load %arg3[%c64_20, %c0_21] : memref<128x128xf32, #tpu.memory_space<vmem>>, vector<1x96xf32>
    %48 = vector.shape_cast %47 : vector<1x96xf32> to vector<1x96xf32>
    %49 = vector.broadcast %48 : vector<1x96xf32> to vector<8x96xf32>
    %c320 = arith.constant 320 : index
    %c0_22 = arith.constant 0 : index
    %50 = vector.load %arg2[%c320, %c0_22] : memref<608x128xbf16, #tpu.memory_space<vmem>>, vector<32x32xbf16>
    %c72 = arith.constant 72 : index
    %c0_23 = arith.constant 0 : index
    %51 = vector.load %arg3[%c72, %c0_23] : memref<128x128xf32, #tpu.memory_space<vmem>>, vector<1x32xf32>
    %52 = vector.shape_cast %51 : vector<1x32xf32> to vector<1x32xf32>
    %53 = vector.broadcast %52 : vector<1x32xf32> to vector<8x32xf32>
    %c352 = arith.constant 352 : index
    %c0_24 = arith.constant 0 : index
    %54 = vector.load %arg2[%c352, %c0_24] : memref<608x128xbf16, #tpu.memory_space<vmem>>, vector<64x96xbf16>
    %c80 = arith.constant 80 : index
    %c0_25 = arith.constant 0 : index
    %55 = vector.load %arg3[%c80, %c0_25] : memref<128x128xf32, #tpu.memory_space<vmem>>, vector<1x96xf32>
    %56 = vector.shape_cast %55 : vector<1x96xf32> to vector<1x96xf32>
    %57 = vector.broadcast %56 : vector<1x96xf32> to vector<8x96xf32>
    %c416 = arith.constant 416 : index
    %c0_26 = arith.constant 0 : index
    %58 = vector.load %arg2[%c416, %c0_26] : memref<608x128xbf16, #tpu.memory_space<vmem>>, vector<32x32xbf16>
    %c88 = arith.constant 88 : index
    %c0_27 = arith.constant 0 : index
    %59 = vector.load %arg3[%c88, %c0_27] : memref<128x128xf32, #tpu.memory_space<vmem>>, vector<1x32xf32>
    %60 = vector.shape_cast %59 : vector<1x32xf32> to vector<1x32xf32>
    %61 = vector.broadcast %60 : vector<1x32xf32> to vector<8x32xf32>
    %c448 = arith.constant 448 : index
    %c0_28 = arith.constant 0 : index
    %62 = vector.load %arg2[%c448, %c0_28] : memref<608x128xbf16, #tpu.memory_space<vmem>>, vector<64x96xbf16>
    %c96 = arith.constant 96 : index
    %c0_29 = arith.constant 0 : index
    %63 = vector.load %arg3[%c96, %c0_29] : memref<128x128xf32, #tpu.memory_space<vmem>>, vector<1x96xf32>
    %64 = vector.shape_cast %63 : vector<1x96xf32> to vector<1x96xf32>
    %65 = vector.broadcast %64 : vector<1x96xf32> to vector<8x96xf32>
    %c512 = arith.constant 512 : index
    %c0_30 = arith.constant 0 : index
    %66 = vector.load %arg2[%c512, %c0_30] : memref<608x128xbf16, #tpu.memory_space<vmem>>, vector<32x32xbf16>
    %c104 = arith.constant 104 : index
    %c0_31 = arith.constant 0 : index
    %67 = vector.load %arg3[%c104, %c0_31] : memref<128x128xf32, #tpu.memory_space<vmem>>, vector<1x32xf32>
    %68 = vector.shape_cast %67 : vector<1x32xf32> to vector<1x32xf32>
    %69 = vector.broadcast %68 : vector<1x32xf32> to vector<8x32xf32>
    %cst_32 = arith.constant 0.000000e+00 : f32
    %70 = vector.broadcast %cst_32 : f32 to vector<8x32xf32>
    %cst_33 = arith.constant 0.000000e+00 : f32
    %71 = vector.broadcast %cst_33 : f32 to vector<8x32xf32>
    %cst_34 = arith.constant 0.000000e+00 : f32
    %72 = vector.broadcast %cst_34 : f32 to vector<8x32xf32>
    %73 = vector.extract_strided_slice %25 {offsets = [0, 0], sizes = [8, 96], strides = [1, 1]} : vector<64x96xf32> to vector<8x96xf32>
    %74 = arith.truncf %70 : vector<8x32xf32> to vector<8x32xbf16>
    %cst_35 = arith.constant dense<0.000000e+00> : vector<8x96xf32>
    %75 = tpu.matmul %74, %26, %cst_35 {dimension_numbers = #tpu.dot_dimension_numbers<[1], [0], [0], [1], [0, 0, 1, 1], [], []>} : vector<8x32xbf16>, vector<32x96xbf16>, vector<8x96xf32> -> vector<8x96xf32>
    %76 = vector.extract_strided_slice %73 {offsets = [0, 0], sizes = [8, 32], strides = [1, 1]} : vector<8x96xf32> to vector<8x32xf32>
    %77 = vector.extract_strided_slice %75 {offsets = [0, 0], sizes = [8, 32], strides = [1, 1]} : vector<8x96xf32> to vector<8x32xf32>
    %78 = arith.addf %76, %77 : vector<8x32xf32>
    %79 = arith.negf %78 : vector<8x32xf32>
    %80 = math.exp %79 : vector<8x32xf32>
    %cst_36 = arith.constant 1.000000e+00 : f32
    %81 = vector.broadcast %cst_36 : f32 to vector<8x32xf32>
    %82 = arith.addf %81, %80 : vector<8x32xf32>
    %83 = arith.divf %81, %82 : vector<8x32xf32>
    %84 = vector.extract_strided_slice %73 {offsets = [0, 32], sizes = [8, 32], strides = [1, 1]} : vector<8x96xf32> to vector<8x32xf32>
    %85 = vector.extract_strided_slice %75 {offsets = [0, 32], sizes = [8, 32], strides = [1, 1]} : vector<8x96xf32> to vector<8x32xf32>
    %86 = arith.addf %84, %85 : vector<8x32xf32>
    %87 = arith.negf %86 : vector<8x32xf32>
    %88 = math.exp %87 : vector<8x32xf32>
    %cst_37 = arith.constant 1.000000e+00 : f32
    %89 = vector.broadcast %cst_37 : f32 to vector<8x32xf32>
    %90 = arith.addf %89, %88 : vector<8x32xf32>
    %91 = arith.divf %89, %90 : vector<8x32xf32>
    %92 = vector.extract_strided_slice %73 {offsets = [0, 64], sizes = [8, 32], strides = [1, 1]} : vector<8x96xf32> to vector<8x32xf32>
    %93 = vector.extract_strided_slice %75 {offsets = [0, 64], sizes = [8, 32], strides = [1, 1]} : vector<8x96xf32> to vector<8x32xf32>
    %94 = arith.addf %93, %29 : vector<8x32xf32>
    %95 = arith.mulf %83, %94 : vector<8x32xf32>
    %96 = arith.addf %92, %95 : vector<8x32xf32>
    %97 = math.tanh %96 : vector<8x32xf32>
    %cst_38 = arith.constant 1.000000e+00 : f32
    %98 = vector.broadcast %cst_38 : f32 to vector<8x32xf32>
    %99 = arith.subf %98, %91 : vector<8x32xf32>
    %100 = arith.mulf %99, %97 : vector<8x32xf32>
    %101 = arith.mulf %91, %70 : vector<8x32xf32>
    %102 = arith.addf %100, %101 : vector<8x32xf32>
    %103 = tpu.concatenate %102, %71 in 1 : vector<8x32xf32>, vector<8x32xf32> -> vector<8x64xf32>
    %104 = arith.truncf %103 : vector<8x64xf32> to vector<8x64xbf16>
    %cst_39 = arith.constant dense<0.000000e+00> : vector<8x96xf32>
    %105 = tpu.matmul %104, %30, %cst_39 {dimension_numbers = #tpu.dot_dimension_numbers<[1], [0], [0], [1], [0, 0, 1, 1], [], []>} : vector<8x64xbf16>, vector<64x96xbf16>, vector<8x96xf32> -> vector<8x96xf32>
    %106 = arith.addf %105, %33 : vector<8x96xf32>
    %107 = arith.truncf %71 : vector<8x32xf32> to vector<8x32xbf16>
    %cst_40 = arith.constant dense<0.000000e+00> : vector<8x32xf32>
    %108 = tpu.matmul %107, %34, %cst_40 {dimension_numbers = #tpu.dot_dimension_numbers<[1], [0], [0], [1], [0, 0, 1, 1], [], []>} : vector<8x32xbf16>, vector<32x32xbf16>, vector<8x32xf32> -> vector<8x32xf32>
    %109 = arith.addf %108, %37 : vector<8x32xf32>
    %110 = vector.extract_strided_slice %106 {offsets = [0, 0], sizes = [8, 32], strides = [1, 1]} : vector<8x96xf32> to vector<8x32xf32>
    %111 = arith.negf %110 : vector<8x32xf32>
    %112 = math.exp %111 : vector<8x32xf32>
    %cst_41 = arith.constant 1.000000e+00 : f32
    %113 = vector.broadcast %cst_41 : f32 to vector<8x32xf32>
    %114 = arith.addf %113, %112 : vector<8x32xf32>
    %115 = arith.divf %113, %114 : vector<8x32xf32>
    %116 = vector.extract_strided_slice %106 {offsets = [0, 32], sizes = [8, 32], strides = [1, 1]} : vector<8x96xf32> to vector<8x32xf32>
    %117 = arith.negf %116 : vector<8x32xf32>
    %118 = math.exp %117 : vector<8x32xf32>
    %cst_42 = arith.constant 1.000000e+00 : f32
    %119 = vector.broadcast %cst_42 : f32 to vector<8x32xf32>
    %120 = arith.addf %119, %118 : vector<8x32xf32>
    %121 = arith.divf %119, %120 : vector<8x32xf32>
    %122 = vector.extract_strided_slice %106 {offsets = [0, 64], sizes = [8, 32], strides = [1, 1]} : vector<8x96xf32> to vector<8x32xf32>
    %123 = arith.mulf %115, %109 : vector<8x32xf32>
    %124 = arith.addf %122, %123 : vector<8x32xf32>
    %125 = math.tanh %124 : vector<8x32xf32>
    %cst_43 = arith.constant 1.000000e+00 : f32
    %126 = vector.broadcast %cst_43 : f32 to vector<8x32xf32>
    %127 = arith.subf %126, %121 : vector<8x32xf32>
    %128 = arith.mulf %127, %125 : vector<8x32xf32>
    %129 = arith.mulf %121, %71 : vector<8x32xf32>
    %130 = arith.addf %128, %129 : vector<8x32xf32>
    %131 = tpu.concatenate %130, %72 in 1 : vector<8x32xf32>, vector<8x32xf32> -> vector<8x64xf32>
    %132 = arith.truncf %131 : vector<8x64xf32> to vector<8x64xbf16>
    %cst_44 = arith.constant dense<0.000000e+00> : vector<8x96xf32>
    %133 = tpu.matmul %132, %38, %cst_44 {dimension_numbers = #tpu.dot_dimension_numbers<[1], [0], [0], [1], [0, 0, 1, 1], [], []>} : vector<8x64xbf16>, vector<64x96xbf16>, vector<8x96xf32> -> vector<8x96xf32>
    %134 = arith.addf %133, %41 : vector<8x96xf32>
    %135 = arith.truncf %72 : vector<8x32xf32> to vector<8x32xbf16>
    %cst_45 = arith.constant dense<0.000000e+00> : vector<8x32xf32>
    %136 = tpu.matmul %135, %42, %cst_45 {dimension_numbers = #tpu.dot_dimension_numbers<[1], [0], [0], [1], [0, 0, 1, 1], [], []>} : vector<8x32xbf16>, vector<32x32xbf16>, vector<8x32xf32> -> vector<8x32xf32>
    %137 = arith.addf %136, %45 : vector<8x32xf32>
    %138 = vector.extract_strided_slice %134 {offsets = [0, 0], sizes = [8, 32], strides = [1, 1]} : vector<8x96xf32> to vector<8x32xf32>
    %139 = arith.negf %138 : vector<8x32xf32>
    %140 = math.exp %139 : vector<8x32xf32>
    %cst_46 = arith.constant 1.000000e+00 : f32
    %141 = vector.broadcast %cst_46 : f32 to vector<8x32xf32>
    %142 = arith.addf %141, %140 : vector<8x32xf32>
    %143 = arith.divf %141, %142 : vector<8x32xf32>
    %144 = vector.extract_strided_slice %134 {offsets = [0, 32], sizes = [8, 32], strides = [1, 1]} : vector<8x96xf32> to vector<8x32xf32>
    %145 = arith.negf %144 : vector<8x32xf32>
    %146 = math.exp %145 : vector<8x32xf32>
    %cst_47 = arith.constant 1.000000e+00 : f32
    %147 = vector.broadcast %cst_47 : f32 to vector<8x32xf32>
    %148 = arith.addf %147, %146 : vector<8x32xf32>
    %149 = arith.divf %147, %148 : vector<8x32xf32>
    %150 = vector.extract_strided_slice %134 {offsets = [0, 64], sizes = [8, 32], strides = [1, 1]} : vector<8x96xf32> to vector<8x32xf32>
    %151 = arith.mulf %143, %137 : vector<8x32xf32>
    %152 = arith.addf %150, %151 : vector<8x32xf32>
    %153 = math.tanh %152 : vector<8x32xf32>
    %cst_48 = arith.constant 1.000000e+00 : f32
    %154 = vector.broadcast %cst_48 : f32 to vector<8x32xf32>
    %155 = arith.subf %154, %149 : vector<8x32xf32>
    %156 = arith.mulf %155, %153 : vector<8x32xf32>
    %157 = arith.mulf %149, %72 : vector<8x32xf32>
    %158 = arith.addf %156, %157 : vector<8x32xf32>
    %159 = vector.extract_strided_slice %25 {offsets = [8, 0], sizes = [8, 96], strides = [1, 1]} : vector<64x96xf32> to vector<8x96xf32>
    %160 = arith.truncf %102 : vector<8x32xf32> to vector<8x32xbf16>
    %cst_49 = arith.constant dense<0.000000e+00> : vector<8x96xf32>
    %161 = tpu.matmul %160, %26, %cst_49 {dimension_numbers = #tpu.dot_dimension_numbers<[1], [0], [0], [1], [0, 0, 1, 1], [], []>} : vector<8x32xbf16>, vector<32x96xbf16>, vector<8x96xf32> -> vector<8x96xf32>
    %162 = vector.extract_strided_slice %159 {offsets = [0, 0], sizes = [8, 32], strides = [1, 1]} : vector<8x96xf32> to vector<8x32xf32>
    %163 = vector.extract_strided_slice %161 {offsets = [0, 0], sizes = [8, 32], strides = [1, 1]} : vector<8x96xf32> to vector<8x32xf32>
    %164 = arith.addf %162, %163 : vector<8x32xf32>
    %165 = arith.negf %164 : vector<8x32xf32>
    %166 = math.exp %165 : vector<8x32xf32>
    %cst_50 = arith.constant 1.000000e+00 : f32
    %167 = vector.broadcast %cst_50 : f32 to vector<8x32xf32>
    %168 = arith.addf %167, %166 : vector<8x32xf32>
    %169 = arith.divf %167, %168 : vector<8x32xf32>
    %170 = vector.extract_strided_slice %159 {offsets = [0, 32], sizes = [8, 32], strides = [1, 1]} : vector<8x96xf32> to vector<8x32xf32>
    %171 = vector.extract_strided_slice %161 {offsets = [0, 32], sizes = [8, 32], strides = [1, 1]} : vector<8x96xf32> to vector<8x32xf32>
    %172 = arith.addf %170, %171 : vector<8x32xf32>
    %173 = arith.negf %172 : vector<8x32xf32>
    %174 = math.exp %173 : vector<8x32xf32>
    %cst_51 = arith.constant 1.000000e+00 : f32
    %175 = vector.broadcast %cst_51 : f32 to vector<8x32xf32>
    %176 = arith.addf %175, %174 : vector<8x32xf32>
    %177 = arith.divf %175, %176 : vector<8x32xf32>
    %178 = vector.extract_strided_slice %159 {offsets = [0, 64], sizes = [8, 32], strides = [1, 1]} : vector<8x96xf32> to vector<8x32xf32>
    %179 = vector.extract_strided_slice %161 {offsets = [0, 64], sizes = [8, 32], strides = [1, 1]} : vector<8x96xf32> to vector<8x32xf32>
    %180 = arith.addf %179, %29 : vector<8x32xf32>
    %181 = arith.mulf %169, %180 : vector<8x32xf32>
    %182 = arith.addf %178, %181 : vector<8x32xf32>
    %183 = math.tanh %182 : vector<8x32xf32>
    %cst_52 = arith.constant 1.000000e+00 : f32
    %184 = vector.broadcast %cst_52 : f32 to vector<8x32xf32>
    %185 = arith.subf %184, %177 : vector<8x32xf32>
    %186 = arith.mulf %185, %183 : vector<8x32xf32>
    %187 = arith.mulf %177, %102 : vector<8x32xf32>
    %188 = arith.addf %186, %187 : vector<8x32xf32>
    %189 = tpu.concatenate %188, %130 in 1 : vector<8x32xf32>, vector<8x32xf32> -> vector<8x64xf32>
    %190 = arith.truncf %189 : vector<8x64xf32> to vector<8x64xbf16>
    %cst_53 = arith.constant dense<0.000000e+00> : vector<8x96xf32>
    %191 = tpu.matmul %190, %30, %cst_53 {dimension_numbers = #tpu.dot_dimension_numbers<[1], [0], [0], [1], [0, 0, 1, 1], [], []>} : vector<8x64xbf16>, vector<64x96xbf16>, vector<8x96xf32> -> vector<8x96xf32>
    %192 = arith.addf %191, %33 : vector<8x96xf32>
    %193 = arith.truncf %130 : vector<8x32xf32> to vector<8x32xbf16>
    %cst_54 = arith.constant dense<0.000000e+00> : vector<8x32xf32>
    %194 = tpu.matmul %193, %34, %cst_54 {dimension_numbers = #tpu.dot_dimension_numbers<[1], [0], [0], [1], [0, 0, 1, 1], [], []>} : vector<8x32xbf16>, vector<32x32xbf16>, vector<8x32xf32> -> vector<8x32xf32>
    %195 = arith.addf %194, %37 : vector<8x32xf32>
    %196 = vector.extract_strided_slice %192 {offsets = [0, 0], sizes = [8, 32], strides = [1, 1]} : vector<8x96xf32> to vector<8x32xf32>
    %197 = arith.negf %196 : vector<8x32xf32>
    %198 = math.exp %197 : vector<8x32xf32>
    %cst_55 = arith.constant 1.000000e+00 : f32
    %199 = vector.broadcast %cst_55 : f32 to vector<8x32xf32>
    %200 = arith.addf %199, %198 : vector<8x32xf32>
    %201 = arith.divf %199, %200 : vector<8x32xf32>
    %202 = vector.extract_strided_slice %192 {offsets = [0, 32], sizes = [8, 32], strides = [1, 1]} : vector<8x96xf32> to vector<8x32xf32>
    %203 = arith.negf %202 : vector<8x32xf32>
    %204 = math.exp %203 : vector<8x32xf32>
    %cst_56 = arith.constant 1.000000e+00 : f32
    %205 = vector.broadcast %cst_56 : f32 to vector<8x32xf32>
    %206 = arith.addf %205, %204 : vector<8x32xf32>
    %207 = arith.divf %205, %206 : vector<8x32xf32>
    %208 = vector.extract_strided_slice %192 {offsets = [0, 64], sizes = [8, 32], strides = [1, 1]} : vector<8x96xf32> to vector<8x32xf32>
    %209 = arith.mulf %201, %195 : vector<8x32xf32>
    %210 = arith.addf %208, %209 : vector<8x32xf32>
    %211 = math.tanh %210 : vector<8x32xf32>
    %cst_57 = arith.constant 1.000000e+00 : f32
    %212 = vector.broadcast %cst_57 : f32 to vector<8x32xf32>
    %213 = arith.subf %212, %207 : vector<8x32xf32>
    %214 = arith.mulf %213, %211 : vector<8x32xf32>
    %215 = arith.mulf %207, %130 : vector<8x32xf32>
    %216 = arith.addf %214, %215 : vector<8x32xf32>
    %217 = tpu.concatenate %216, %158 in 1 : vector<8x32xf32>, vector<8x32xf32> -> vector<8x64xf32>
    %218 = arith.truncf %217 : vector<8x64xf32> to vector<8x64xbf16>
    %cst_58 = arith.constant dense<0.000000e+00> : vector<8x96xf32>
    %219 = tpu.matmul %218, %38, %cst_58 {dimension_numbers = #tpu.dot_dimension_numbers<[1], [0], [0], [1], [0, 0, 1, 1], [], []>} : vector<8x64xbf16>, vector<64x96xbf16>, vector<8x96xf32> -> vector<8x96xf32>
    %220 = arith.addf %219, %41 : vector<8x96xf32>
    %221 = arith.truncf %158 : vector<8x32xf32> to vector<8x32xbf16>
    %cst_59 = arith.constant dense<0.000000e+00> : vector<8x32xf32>
    %222 = tpu.matmul %221, %42, %cst_59 {dimension_numbers = #tpu.dot_dimension_numbers<[1], [0], [0], [1], [0, 0, 1, 1], [], []>} : vector<8x32xbf16>, vector<32x32xbf16>, vector<8x32xf32> -> vector<8x32xf32>
    %223 = arith.addf %222, %45 : vector<8x32xf32>
    %224 = vector.extract_strided_slice %220 {offsets = [0, 0], sizes = [8, 32], strides = [1, 1]} : vector<8x96xf32> to vector<8x32xf32>
    %225 = arith.negf %224 : vector<8x32xf32>
    %226 = math.exp %225 : vector<8x32xf32>
    %cst_60 = arith.constant 1.000000e+00 : f32
    %227 = vector.broadcast %cst_60 : f32 to vector<8x32xf32>
    %228 = arith.addf %227, %226 : vector<8x32xf32>
    %229 = arith.divf %227, %228 : vector<8x32xf32>
    %230 = vector.extract_strided_slice %220 {offsets = [0, 32], sizes = [8, 32], strides = [1, 1]} : vector<8x96xf32> to vector<8x32xf32>
    %231 = arith.negf %230 : vector<8x32xf32>
    %232 = math.exp %231 : vector<8x32xf32>
    %cst_61 = arith.constant 1.000000e+00 : f32
    %233 = vector.broadcast %cst_61 : f32 to vector<8x32xf32>
    %234 = arith.addf %233, %232 : vector<8x32xf32>
    %235 = arith.divf %233, %234 : vector<8x32xf32>
    %236 = vector.extract_strided_slice %220 {offsets = [0, 64], sizes = [8, 32], strides = [1, 1]} : vector<8x96xf32> to vector<8x32xf32>
    %237 = arith.mulf %229, %223 : vector<8x32xf32>
    %238 = arith.addf %236, %237 : vector<8x32xf32>
    %239 = math.tanh %238 : vector<8x32xf32>
    %cst_62 = arith.constant 1.000000e+00 : f32
    %240 = vector.broadcast %cst_62 : f32 to vector<8x32xf32>
    %241 = arith.subf %240, %235 : vector<8x32xf32>
    %242 = arith.mulf %241, %239 : vector<8x32xf32>
    %243 = arith.mulf %235, %158 : vector<8x32xf32>
    %244 = arith.addf %242, %243 : vector<8x32xf32>
    %245 = vector.extract_strided_slice %25 {offsets = [16, 0], sizes = [8, 96], strides = [1, 1]} : vector<64x96xf32> to vector<8x96xf32>
    %246 = arith.truncf %188 : vector<8x32xf32> to vector<8x32xbf16>
    %cst_63 = arith.constant dense<0.000000e+00> : vector<8x96xf32>
    %247 = tpu.matmul %246, %26, %cst_63 {dimension_numbers = #tpu.dot_dimension_numbers<[1], [0], [0], [1], [0, 0, 1, 1], [], []>} : vector<8x32xbf16>, vector<32x96xbf16>, vector<8x96xf32> -> vector<8x96xf32>
    %248 = vector.extract_strided_slice %245 {offsets = [0, 0], sizes = [8, 32], strides = [1, 1]} : vector<8x96xf32> to vector<8x32xf32>
    %249 = vector.extract_strided_slice %247 {offsets = [0, 0], sizes = [8, 32], strides = [1, 1]} : vector<8x96xf32> to vector<8x32xf32>
    %250 = arith.addf %248, %249 : vector<8x32xf32>
    %251 = arith.negf %250 : vector<8x32xf32>
    %252 = math.exp %251 : vector<8x32xf32>
    %cst_64 = arith.constant 1.000000e+00 : f32
    %253 = vector.broadcast %cst_64 : f32 to vector<8x32xf32>
    %254 = arith.addf %253, %252 : vector<8x32xf32>
    %255 = arith.divf %253, %254 : vector<8x32xf32>
    %256 = vector.extract_strided_slice %245 {offsets = [0, 32], sizes = [8, 32], strides = [1, 1]} : vector<8x96xf32> to vector<8x32xf32>
    %257 = vector.extract_strided_slice %247 {offsets = [0, 32], sizes = [8, 32], strides = [1, 1]} : vector<8x96xf32> to vector<8x32xf32>
    %258 = arith.addf %256, %257 : vector<8x32xf32>
    %259 = arith.negf %258 : vector<8x32xf32>
    %260 = math.exp %259 : vector<8x32xf32>
    %cst_65 = arith.constant 1.000000e+00 : f32
    %261 = vector.broadcast %cst_65 : f32 to vector<8x32xf32>
    %262 = arith.addf %261, %260 : vector<8x32xf32>
    %263 = arith.divf %261, %262 : vector<8x32xf32>
    %264 = vector.extract_strided_slice %245 {offsets = [0, 64], sizes = [8, 32], strides = [1, 1]} : vector<8x96xf32> to vector<8x32xf32>
    %265 = vector.extract_strided_slice %247 {offsets = [0, 64], sizes = [8, 32], strides = [1, 1]} : vector<8x96xf32> to vector<8x32xf32>
    %266 = arith.addf %265, %29 : vector<8x32xf32>
    %267 = arith.mulf %255, %266 : vector<8x32xf32>
    %268 = arith.addf %264, %267 : vector<8x32xf32>
    %269 = math.tanh %268 : vector<8x32xf32>
    %cst_66 = arith.constant 1.000000e+00 : f32
    %270 = vector.broadcast %cst_66 : f32 to vector<8x32xf32>
    %271 = arith.subf %270, %263 : vector<8x32xf32>
    %272 = arith.mulf %271, %269 : vector<8x32xf32>
    %273 = arith.mulf %263, %188 : vector<8x32xf32>
    %274 = arith.addf %272, %273 : vector<8x32xf32>
    %275 = tpu.concatenate %274, %216 in 1 : vector<8x32xf32>, vector<8x32xf32> -> vector<8x64xf32>
    %276 = arith.truncf %275 : vector<8x64xf32> to vector<8x64xbf16>
    %cst_67 = arith.constant dense<0.000000e+00> : vector<8x96xf32>
    %277 = tpu.matmul %276, %30, %cst_67 {dimension_numbers = #tpu.dot_dimension_numbers<[1], [0], [0], [1], [0, 0, 1, 1], [], []>} : vector<8x64xbf16>, vector<64x96xbf16>, vector<8x96xf32> -> vector<8x96xf32>
    %278 = arith.addf %277, %33 : vector<8x96xf32>
    %279 = arith.truncf %216 : vector<8x32xf32> to vector<8x32xbf16>
    %cst_68 = arith.constant dense<0.000000e+00> : vector<8x32xf32>
    %280 = tpu.matmul %279, %34, %cst_68 {dimension_numbers = #tpu.dot_dimension_numbers<[1], [0], [0], [1], [0, 0, 1, 1], [], []>} : vector<8x32xbf16>, vector<32x32xbf16>, vector<8x32xf32> -> vector<8x32xf32>
    %281 = arith.addf %280, %37 : vector<8x32xf32>
    %282 = vector.extract_strided_slice %278 {offsets = [0, 0], sizes = [8, 32], strides = [1, 1]} : vector<8x96xf32> to vector<8x32xf32>
    %283 = arith.negf %282 : vector<8x32xf32>
    %284 = math.exp %283 : vector<8x32xf32>
    %cst_69 = arith.constant 1.000000e+00 : f32
    %285 = vector.broadcast %cst_69 : f32 to vector<8x32xf32>
    %286 = arith.addf %285, %284 : vector<8x32xf32>
    %287 = arith.divf %285, %286 : vector<8x32xf32>
    %288 = vector.extract_strided_slice %278 {offsets = [0, 32], sizes = [8, 32], strides = [1, 1]} : vector<8x96xf32> to vector<8x32xf32>
    %289 = arith.negf %288 : vector<8x32xf32>
    %290 = math.exp %289 : vector<8x32xf32>
    %cst_70 = arith.constant 1.000000e+00 : f32
    %291 = vector.broadcast %cst_70 : f32 to vector<8x32xf32>
    %292 = arith.addf %291, %290 : vector<8x32xf32>
    %293 = arith.divf %291, %292 : vector<8x32xf32>
    %294 = vector.extract_strided_slice %278 {offsets = [0, 64], sizes = [8, 32], strides = [1, 1]} : vector<8x96xf32> to vector<8x32xf32>
    %295 = arith.mulf %287, %281 : vector<8x32xf32>
    %296 = arith.addf %294, %295 : vector<8x32xf32>
    %297 = math.tanh %296 : vector<8x32xf32>
    %cst_71 = arith.constant 1.000000e+00 : f32
    %298 = vector.broadcast %cst_71 : f32 to vector<8x32xf32>
    %299 = arith.subf %298, %293 : vector<8x32xf32>
    %300 = arith.mulf %299, %297 : vector<8x32xf32>
    %301 = arith.mulf %293, %216 : vector<8x32xf32>
    %302 = arith.addf %300, %301 : vector<8x32xf32>
    %303 = tpu.concatenate %302, %244 in 1 : vector<8x32xf32>, vector<8x32xf32> -> vector<8x64xf32>
    %304 = arith.truncf %303 : vector<8x64xf32> to vector<8x64xbf16>
    %cst_72 = arith.constant dense<0.000000e+00> : vector<8x96xf32>
    %305 = tpu.matmul %304, %38, %cst_72 {dimension_numbers = #tpu.dot_dimension_numbers<[1], [0], [0], [1], [0, 0, 1, 1], [], []>} : vector<8x64xbf16>, vector<64x96xbf16>, vector<8x96xf32> -> vector<8x96xf32>
    %306 = arith.addf %305, %41 : vector<8x96xf32>
    %307 = arith.truncf %244 : vector<8x32xf32> to vector<8x32xbf16>
    %cst_73 = arith.constant dense<0.000000e+00> : vector<8x32xf32>
    %308 = tpu.matmul %307, %42, %cst_73 {dimension_numbers = #tpu.dot_dimension_numbers<[1], [0], [0], [1], [0, 0, 1, 1], [], []>} : vector<8x32xbf16>, vector<32x32xbf16>, vector<8x32xf32> -> vector<8x32xf32>
    %309 = arith.addf %308, %45 : vector<8x32xf32>
    %310 = vector.extract_strided_slice %306 {offsets = [0, 0], sizes = [8, 32], strides = [1, 1]} : vector<8x96xf32> to vector<8x32xf32>
    %311 = arith.negf %310 : vector<8x32xf32>
    %312 = math.exp %311 : vector<8x32xf32>
    %cst_74 = arith.constant 1.000000e+00 : f32
    %313 = vector.broadcast %cst_74 : f32 to vector<8x32xf32>
    %314 = arith.addf %313, %312 : vector<8x32xf32>
    %315 = arith.divf %313, %314 : vector<8x32xf32>
    %316 = vector.extract_strided_slice %306 {offsets = [0, 32], sizes = [8, 32], strides = [1, 1]} : vector<8x96xf32> to vector<8x32xf32>
    %317 = arith.negf %316 : vector<8x32xf32>
    %318 = math.exp %317 : vector<8x32xf32>
    %cst_75 = arith.constant 1.000000e+00 : f32
    %319 = vector.broadcast %cst_75 : f32 to vector<8x32xf32>
    %320 = arith.addf %319, %318 : vector<8x32xf32>
    %321 = arith.divf %319, %320 : vector<8x32xf32>
    %322 = vector.extract_strided_slice %306 {offsets = [0, 64], sizes = [8, 32], strides = [1, 1]} : vector<8x96xf32> to vector<8x32xf32>
    %323 = arith.mulf %315, %309 : vector<8x32xf32>
    %324 = arith.addf %322, %323 : vector<8x32xf32>
    %325 = math.tanh %324 : vector<8x32xf32>
    %cst_76 = arith.constant 1.000000e+00 : f32
    %326 = vector.broadcast %cst_76 : f32 to vector<8x32xf32>
    %327 = arith.subf %326, %321 : vector<8x32xf32>
    %328 = arith.mulf %327, %325 : vector<8x32xf32>
    %329 = arith.mulf %321, %244 : vector<8x32xf32>
    %330 = arith.addf %328, %329 : vector<8x32xf32>
    %331 = vector.extract_strided_slice %25 {offsets = [24, 0], sizes = [8, 96], strides = [1, 1]} : vector<64x96xf32> to vector<8x96xf32>
    %332 = arith.truncf %274 : vector<8x32xf32> to vector<8x32xbf16>
    %cst_77 = arith.constant dense<0.000000e+00> : vector<8x96xf32>
    %333 = tpu.matmul %332, %26, %cst_77 {dimension_numbers = #tpu.dot_dimension_numbers<[1], [0], [0], [1], [0, 0, 1, 1], [], []>} : vector<8x32xbf16>, vector<32x96xbf16>, vector<8x96xf32> -> vector<8x96xf32>
    %334 = vector.extract_strided_slice %331 {offsets = [0, 0], sizes = [8, 32], strides = [1, 1]} : vector<8x96xf32> to vector<8x32xf32>
    %335 = vector.extract_strided_slice %333 {offsets = [0, 0], sizes = [8, 32], strides = [1, 1]} : vector<8x96xf32> to vector<8x32xf32>
    %336 = arith.addf %334, %335 : vector<8x32xf32>
    %337 = arith.negf %336 : vector<8x32xf32>
    %338 = math.exp %337 : vector<8x32xf32>
    %cst_78 = arith.constant 1.000000e+00 : f32
    %339 = vector.broadcast %cst_78 : f32 to vector<8x32xf32>
    %340 = arith.addf %339, %338 : vector<8x32xf32>
    %341 = arith.divf %339, %340 : vector<8x32xf32>
    %342 = vector.extract_strided_slice %331 {offsets = [0, 32], sizes = [8, 32], strides = [1, 1]} : vector<8x96xf32> to vector<8x32xf32>
    %343 = vector.extract_strided_slice %333 {offsets = [0, 32], sizes = [8, 32], strides = [1, 1]} : vector<8x96xf32> to vector<8x32xf32>
    %344 = arith.addf %342, %343 : vector<8x32xf32>
    %345 = arith.negf %344 : vector<8x32xf32>
    %346 = math.exp %345 : vector<8x32xf32>
    %cst_79 = arith.constant 1.000000e+00 : f32
    %347 = vector.broadcast %cst_79 : f32 to vector<8x32xf32>
    %348 = arith.addf %347, %346 : vector<8x32xf32>
    %349 = arith.divf %347, %348 : vector<8x32xf32>
    %350 = vector.extract_strided_slice %331 {offsets = [0, 64], sizes = [8, 32], strides = [1, 1]} : vector<8x96xf32> to vector<8x32xf32>
    %351 = vector.extract_strided_slice %333 {offsets = [0, 64], sizes = [8, 32], strides = [1, 1]} : vector<8x96xf32> to vector<8x32xf32>
    %352 = arith.addf %351, %29 : vector<8x32xf32>
    %353 = arith.mulf %341, %352 : vector<8x32xf32>
    %354 = arith.addf %350, %353 : vector<8x32xf32>
    %355 = math.tanh %354 : vector<8x32xf32>
    %cst_80 = arith.constant 1.000000e+00 : f32
    %356 = vector.broadcast %cst_80 : f32 to vector<8x32xf32>
    %357 = arith.subf %356, %349 : vector<8x32xf32>
    %358 = arith.mulf %357, %355 : vector<8x32xf32>
    %359 = arith.mulf %349, %274 : vector<8x32xf32>
    %360 = arith.addf %358, %359 : vector<8x32xf32>
    %361 = tpu.concatenate %360, %302 in 1 : vector<8x32xf32>, vector<8x32xf32> -> vector<8x64xf32>
    %362 = arith.truncf %361 : vector<8x64xf32> to vector<8x64xbf16>
    %cst_81 = arith.constant dense<0.000000e+00> : vector<8x96xf32>
    %363 = tpu.matmul %362, %30, %cst_81 {dimension_numbers = #tpu.dot_dimension_numbers<[1], [0], [0], [1], [0, 0, 1, 1], [], []>} : vector<8x64xbf16>, vector<64x96xbf16>, vector<8x96xf32> -> vector<8x96xf32>
    %364 = arith.addf %363, %33 : vector<8x96xf32>
    %365 = arith.truncf %302 : vector<8x32xf32> to vector<8x32xbf16>
    %cst_82 = arith.constant dense<0.000000e+00> : vector<8x32xf32>
    %366 = tpu.matmul %365, %34, %cst_82 {dimension_numbers = #tpu.dot_dimension_numbers<[1], [0], [0], [1], [0, 0, 1, 1], [], []>} : vector<8x32xbf16>, vector<32x32xbf16>, vector<8x32xf32> -> vector<8x32xf32>
    %367 = arith.addf %366, %37 : vector<8x32xf32>
    %368 = vector.extract_strided_slice %364 {offsets = [0, 0], sizes = [8, 32], strides = [1, 1]} : vector<8x96xf32> to vector<8x32xf32>
    %369 = arith.negf %368 : vector<8x32xf32>
    %370 = math.exp %369 : vector<8x32xf32>
    %cst_83 = arith.constant 1.000000e+00 : f32
    %371 = vector.broadcast %cst_83 : f32 to vector<8x32xf32>
    %372 = arith.addf %371, %370 : vector<8x32xf32>
    %373 = arith.divf %371, %372 : vector<8x32xf32>
    %374 = vector.extract_strided_slice %364 {offsets = [0, 32], sizes = [8, 32], strides = [1, 1]} : vector<8x96xf32> to vector<8x32xf32>
    %375 = arith.negf %374 : vector<8x32xf32>
    %376 = math.exp %375 : vector<8x32xf32>
    %cst_84 = arith.constant 1.000000e+00 : f32
    %377 = vector.broadcast %cst_84 : f32 to vector<8x32xf32>
    %378 = arith.addf %377, %376 : vector<8x32xf32>
    %379 = arith.divf %377, %378 : vector<8x32xf32>
    %380 = vector.extract_strided_slice %364 {offsets = [0, 64], sizes = [8, 32], strides = [1, 1]} : vector<8x96xf32> to vector<8x32xf32>
    %381 = arith.mulf %373, %367 : vector<8x32xf32>
    %382 = arith.addf %380, %381 : vector<8x32xf32>
    %383 = math.tanh %382 : vector<8x32xf32>
    %cst_85 = arith.constant 1.000000e+00 : f32
    %384 = vector.broadcast %cst_85 : f32 to vector<8x32xf32>
    %385 = arith.subf %384, %379 : vector<8x32xf32>
    %386 = arith.mulf %385, %383 : vector<8x32xf32>
    %387 = arith.mulf %379, %302 : vector<8x32xf32>
    %388 = arith.addf %386, %387 : vector<8x32xf32>
    %389 = tpu.concatenate %388, %330 in 1 : vector<8x32xf32>, vector<8x32xf32> -> vector<8x64xf32>
    %390 = arith.truncf %389 : vector<8x64xf32> to vector<8x64xbf16>
    %cst_86 = arith.constant dense<0.000000e+00> : vector<8x96xf32>
    %391 = tpu.matmul %390, %38, %cst_86 {dimension_numbers = #tpu.dot_dimension_numbers<[1], [0], [0], [1], [0, 0, 1, 1], [], []>} : vector<8x64xbf16>, vector<64x96xbf16>, vector<8x96xf32> -> vector<8x96xf32>
    %392 = arith.addf %391, %41 : vector<8x96xf32>
    %393 = arith.truncf %330 : vector<8x32xf32> to vector<8x32xbf16>
    %cst_87 = arith.constant dense<0.000000e+00> : vector<8x32xf32>
    %394 = tpu.matmul %393, %42, %cst_87 {dimension_numbers = #tpu.dot_dimension_numbers<[1], [0], [0], [1], [0, 0, 1, 1], [], []>} : vector<8x32xbf16>, vector<32x32xbf16>, vector<8x32xf32> -> vector<8x32xf32>
    %395 = arith.addf %394, %45 : vector<8x32xf32>
    %396 = vector.extract_strided_slice %392 {offsets = [0, 0], sizes = [8, 32], strides = [1, 1]} : vector<8x96xf32> to vector<8x32xf32>
    %397 = arith.negf %396 : vector<8x32xf32>
    %398 = math.exp %397 : vector<8x32xf32>
    %cst_88 = arith.constant 1.000000e+00 : f32
    %399 = vector.broadcast %cst_88 : f32 to vector<8x32xf32>
    %400 = arith.addf %399, %398 : vector<8x32xf32>
    %401 = arith.divf %399, %400 : vector<8x32xf32>
    %402 = vector.extract_strided_slice %392 {offsets = [0, 32], sizes = [8, 32], strides = [1, 1]} : vector<8x96xf32> to vector<8x32xf32>
    %403 = arith.negf %402 : vector<8x32xf32>
    %404 = math.exp %403 : vector<8x32xf32>
    %cst_89 = arith.constant 1.000000e+00 : f32
    %405 = vector.broadcast %cst_89 : f32 to vector<8x32xf32>
    %406 = arith.addf %405, %404 : vector<8x32xf32>
    %407 = arith.divf %405, %406 : vector<8x32xf32>
    %408 = vector.extract_strided_slice %392 {offsets = [0, 64], sizes = [8, 32], strides = [1, 1]} : vector<8x96xf32> to vector<8x32xf32>
    %409 = arith.mulf %401, %395 : vector<8x32xf32>
    %410 = arith.addf %408, %409 : vector<8x32xf32>
    %411 = math.tanh %410 : vector<8x32xf32>
    %cst_90 = arith.constant 1.000000e+00 : f32
    %412 = vector.broadcast %cst_90 : f32 to vector<8x32xf32>
    %413 = arith.subf %412, %407 : vector<8x32xf32>
    %414 = arith.mulf %413, %411 : vector<8x32xf32>
    %415 = arith.mulf %407, %330 : vector<8x32xf32>
    %416 = arith.addf %414, %415 : vector<8x32xf32>
    %417 = vector.extract_strided_slice %25 {offsets = [32, 0], sizes = [8, 96], strides = [1, 1]} : vector<64x96xf32> to vector<8x96xf32>
    %418 = arith.truncf %360 : vector<8x32xf32> to vector<8x32xbf16>
    %cst_91 = arith.constant dense<0.000000e+00> : vector<8x96xf32>
    %419 = tpu.matmul %418, %26, %cst_91 {dimension_numbers = #tpu.dot_dimension_numbers<[1], [0], [0], [1], [0, 0, 1, 1], [], []>} : vector<8x32xbf16>, vector<32x96xbf16>, vector<8x96xf32> -> vector<8x96xf32>
    %420 = vector.extract_strided_slice %417 {offsets = [0, 0], sizes = [8, 32], strides = [1, 1]} : vector<8x96xf32> to vector<8x32xf32>
    %421 = vector.extract_strided_slice %419 {offsets = [0, 0], sizes = [8, 32], strides = [1, 1]} : vector<8x96xf32> to vector<8x32xf32>
    %422 = arith.addf %420, %421 : vector<8x32xf32>
    %423 = arith.negf %422 : vector<8x32xf32>
    %424 = math.exp %423 : vector<8x32xf32>
    %cst_92 = arith.constant 1.000000e+00 : f32
    %425 = vector.broadcast %cst_92 : f32 to vector<8x32xf32>
    %426 = arith.addf %425, %424 : vector<8x32xf32>
    %427 = arith.divf %425, %426 : vector<8x32xf32>
    %428 = vector.extract_strided_slice %417 {offsets = [0, 32], sizes = [8, 32], strides = [1, 1]} : vector<8x96xf32> to vector<8x32xf32>
    %429 = vector.extract_strided_slice %419 {offsets = [0, 32], sizes = [8, 32], strides = [1, 1]} : vector<8x96xf32> to vector<8x32xf32>
    %430 = arith.addf %428, %429 : vector<8x32xf32>
    %431 = arith.negf %430 : vector<8x32xf32>
    %432 = math.exp %431 : vector<8x32xf32>
    %cst_93 = arith.constant 1.000000e+00 : f32
    %433 = vector.broadcast %cst_93 : f32 to vector<8x32xf32>
    %434 = arith.addf %433, %432 : vector<8x32xf32>
    %435 = arith.divf %433, %434 : vector<8x32xf32>
    %436 = vector.extract_strided_slice %417 {offsets = [0, 64], sizes = [8, 32], strides = [1, 1]} : vector<8x96xf32> to vector<8x32xf32>
    %437 = vector.extract_strided_slice %419 {offsets = [0, 64], sizes = [8, 32], strides = [1, 1]} : vector<8x96xf32> to vector<8x32xf32>
    %438 = arith.addf %437, %29 : vector<8x32xf32>
    %439 = arith.mulf %427, %438 : vector<8x32xf32>
    %440 = arith.addf %436, %439 : vector<8x32xf32>
    %441 = math.tanh %440 : vector<8x32xf32>
    %cst_94 = arith.constant 1.000000e+00 : f32
    %442 = vector.broadcast %cst_94 : f32 to vector<8x32xf32>
    %443 = arith.subf %442, %435 : vector<8x32xf32>
    %444 = arith.mulf %443, %441 : vector<8x32xf32>
    %445 = arith.mulf %435, %360 : vector<8x32xf32>
    %446 = arith.addf %444, %445 : vector<8x32xf32>
    %447 = tpu.concatenate %446, %388 in 1 : vector<8x32xf32>, vector<8x32xf32> -> vector<8x64xf32>
    %448 = arith.truncf %447 : vector<8x64xf32> to vector<8x64xbf16>
    %cst_95 = arith.constant dense<0.000000e+00> : vector<8x96xf32>
    %449 = tpu.matmul %448, %30, %cst_95 {dimension_numbers = #tpu.dot_dimension_numbers<[1], [0], [0], [1], [0, 0, 1, 1], [], []>} : vector<8x64xbf16>, vector<64x96xbf16>, vector<8x96xf32> -> vector<8x96xf32>
    %450 = arith.addf %449, %33 : vector<8x96xf32>
    %451 = arith.truncf %388 : vector<8x32xf32> to vector<8x32xbf16>
    %cst_96 = arith.constant dense<0.000000e+00> : vector<8x32xf32>
    %452 = tpu.matmul %451, %34, %cst_96 {dimension_numbers = #tpu.dot_dimension_numbers<[1], [0], [0], [1], [0, 0, 1, 1], [], []>} : vector<8x32xbf16>, vector<32x32xbf16>, vector<8x32xf32> -> vector<8x32xf32>
    %453 = arith.addf %452, %37 : vector<8x32xf32>
    %454 = vector.extract_strided_slice %450 {offsets = [0, 0], sizes = [8, 32], strides = [1, 1]} : vector<8x96xf32> to vector<8x32xf32>
    %455 = arith.negf %454 : vector<8x32xf32>
    %456 = math.exp %455 : vector<8x32xf32>
    %cst_97 = arith.constant 1.000000e+00 : f32
    %457 = vector.broadcast %cst_97 : f32 to vector<8x32xf32>
    %458 = arith.addf %457, %456 : vector<8x32xf32>
    %459 = arith.divf %457, %458 : vector<8x32xf32>
    %460 = vector.extract_strided_slice %450 {offsets = [0, 32], sizes = [8, 32], strides = [1, 1]} : vector<8x96xf32> to vector<8x32xf32>
    %461 = arith.negf %460 : vector<8x32xf32>
    %462 = math.exp %461 : vector<8x32xf32>
    %cst_98 = arith.constant 1.000000e+00 : f32
    %463 = vector.broadcast %cst_98 : f32 to vector<8x32xf32>
    %464 = arith.addf %463, %462 : vector<8x32xf32>
    %465 = arith.divf %463, %464 : vector<8x32xf32>
    %466 = vector.extract_strided_slice %450 {offsets = [0, 64], sizes = [8, 32], strides = [1, 1]} : vector<8x96xf32> to vector<8x32xf32>
    %467 = arith.mulf %459, %453 : vector<8x32xf32>
    %468 = arith.addf %466, %467 : vector<8x32xf32>
    %469 = math.tanh %468 : vector<8x32xf32>
    %cst_99 = arith.constant 1.000000e+00 : f32
    %470 = vector.broadcast %cst_99 : f32 to vector<8x32xf32>
    %471 = arith.subf %470, %465 : vector<8x32xf32>
    %472 = arith.mulf %471, %469 : vector<8x32xf32>
    %473 = arith.mulf %465, %388 : vector<8x32xf32>
    %474 = arith.addf %472, %473 : vector<8x32xf32>
    %475 = tpu.concatenate %474, %416 in 1 : vector<8x32xf32>, vector<8x32xf32> -> vector<8x64xf32>
    %476 = arith.truncf %475 : vector<8x64xf32> to vector<8x64xbf16>
    %cst_100 = arith.constant dense<0.000000e+00> : vector<8x96xf32>
    %477 = tpu.matmul %476, %38, %cst_100 {dimension_numbers = #tpu.dot_dimension_numbers<[1], [0], [0], [1], [0, 0, 1, 1], [], []>} : vector<8x64xbf16>, vector<64x96xbf16>, vector<8x96xf32> -> vector<8x96xf32>
    %478 = arith.addf %477, %41 : vector<8x96xf32>
    %479 = arith.truncf %416 : vector<8x32xf32> to vector<8x32xbf16>
    %cst_101 = arith.constant dense<0.000000e+00> : vector<8x32xf32>
    %480 = tpu.matmul %479, %42, %cst_101 {dimension_numbers = #tpu.dot_dimension_numbers<[1], [0], [0], [1], [0, 0, 1, 1], [], []>} : vector<8x32xbf16>, vector<32x32xbf16>, vector<8x32xf32> -> vector<8x32xf32>
    %481 = arith.addf %480, %45 : vector<8x32xf32>
    %482 = vector.extract_strided_slice %478 {offsets = [0, 0], sizes = [8, 32], strides = [1, 1]} : vector<8x96xf32> to vector<8x32xf32>
    %483 = arith.negf %482 : vector<8x32xf32>
    %484 = math.exp %483 : vector<8x32xf32>
    %cst_102 = arith.constant 1.000000e+00 : f32
    %485 = vector.broadcast %cst_102 : f32 to vector<8x32xf32>
    %486 = arith.addf %485, %484 : vector<8x32xf32>
    %487 = arith.divf %485, %486 : vector<8x32xf32>
    %488 = vector.extract_strided_slice %478 {offsets = [0, 32], sizes = [8, 32], strides = [1, 1]} : vector<8x96xf32> to vector<8x32xf32>
    %489 = arith.negf %488 : vector<8x32xf32>
    %490 = math.exp %489 : vector<8x32xf32>
    %cst_103 = arith.constant 1.000000e+00 : f32
    %491 = vector.broadcast %cst_103 : f32 to vector<8x32xf32>
    %492 = arith.addf %491, %490 : vector<8x32xf32>
    %493 = arith.divf %491, %492 : vector<8x32xf32>
    %494 = vector.extract_strided_slice %478 {offsets = [0, 64], sizes = [8, 32], strides = [1, 1]} : vector<8x96xf32> to vector<8x32xf32>
    %495 = arith.mulf %487, %481 : vector<8x32xf32>
    %496 = arith.addf %494, %495 : vector<8x32xf32>
    %497 = math.tanh %496 : vector<8x32xf32>
    %cst_104 = arith.constant 1.000000e+00 : f32
    %498 = vector.broadcast %cst_104 : f32 to vector<8x32xf32>
    %499 = arith.subf %498, %493 : vector<8x32xf32>
    %500 = arith.mulf %499, %497 : vector<8x32xf32>
    %501 = arith.mulf %493, %416 : vector<8x32xf32>
    %502 = arith.addf %500, %501 : vector<8x32xf32>
    %503 = vector.extract_strided_slice %25 {offsets = [40, 0], sizes = [8, 96], strides = [1, 1]} : vector<64x96xf32> to vector<8x96xf32>
    %504 = arith.truncf %446 : vector<8x32xf32> to vector<8x32xbf16>
    %cst_105 = arith.constant dense<0.000000e+00> : vector<8x96xf32>
    %505 = tpu.matmul %504, %26, %cst_105 {dimension_numbers = #tpu.dot_dimension_numbers<[1], [0], [0], [1], [0, 0, 1, 1], [], []>} : vector<8x32xbf16>, vector<32x96xbf16>, vector<8x96xf32> -> vector<8x96xf32>
    %506 = vector.extract_strided_slice %503 {offsets = [0, 0], sizes = [8, 32], strides = [1, 1]} : vector<8x96xf32> to vector<8x32xf32>
    %507 = vector.extract_strided_slice %505 {offsets = [0, 0], sizes = [8, 32], strides = [1, 1]} : vector<8x96xf32> to vector<8x32xf32>
    %508 = arith.addf %506, %507 : vector<8x32xf32>
    %509 = arith.negf %508 : vector<8x32xf32>
    %510 = math.exp %509 : vector<8x32xf32>
    %cst_106 = arith.constant 1.000000e+00 : f32
    %511 = vector.broadcast %cst_106 : f32 to vector<8x32xf32>
    %512 = arith.addf %511, %510 : vector<8x32xf32>
    %513 = arith.divf %511, %512 : vector<8x32xf32>
    %514 = vector.extract_strided_slice %503 {offsets = [0, 32], sizes = [8, 32], strides = [1, 1]} : vector<8x96xf32> to vector<8x32xf32>
    %515 = vector.extract_strided_slice %505 {offsets = [0, 32], sizes = [8, 32], strides = [1, 1]} : vector<8x96xf32> to vector<8x32xf32>
    %516 = arith.addf %514, %515 : vector<8x32xf32>
    %517 = arith.negf %516 : vector<8x32xf32>
    %518 = math.exp %517 : vector<8x32xf32>
    %cst_107 = arith.constant 1.000000e+00 : f32
    %519 = vector.broadcast %cst_107 : f32 to vector<8x32xf32>
    %520 = arith.addf %519, %518 : vector<8x32xf32>
    %521 = arith.divf %519, %520 : vector<8x32xf32>
    %522 = vector.extract_strided_slice %503 {offsets = [0, 64], sizes = [8, 32], strides = [1, 1]} : vector<8x96xf32> to vector<8x32xf32>
    %523 = vector.extract_strided_slice %505 {offsets = [0, 64], sizes = [8, 32], strides = [1, 1]} : vector<8x96xf32> to vector<8x32xf32>
    %524 = arith.addf %523, %29 : vector<8x32xf32>
    %525 = arith.mulf %513, %524 : vector<8x32xf32>
    %526 = arith.addf %522, %525 : vector<8x32xf32>
    %527 = math.tanh %526 : vector<8x32xf32>
    %cst_108 = arith.constant 1.000000e+00 : f32
    %528 = vector.broadcast %cst_108 : f32 to vector<8x32xf32>
    %529 = arith.subf %528, %521 : vector<8x32xf32>
    %530 = arith.mulf %529, %527 : vector<8x32xf32>
    %531 = arith.mulf %521, %446 : vector<8x32xf32>
    %532 = arith.addf %530, %531 : vector<8x32xf32>
    %533 = tpu.concatenate %532, %474 in 1 : vector<8x32xf32>, vector<8x32xf32> -> vector<8x64xf32>
    %534 = arith.truncf %533 : vector<8x64xf32> to vector<8x64xbf16>
    %cst_109 = arith.constant dense<0.000000e+00> : vector<8x96xf32>
    %535 = tpu.matmul %534, %30, %cst_109 {dimension_numbers = #tpu.dot_dimension_numbers<[1], [0], [0], [1], [0, 0, 1, 1], [], []>} : vector<8x64xbf16>, vector<64x96xbf16>, vector<8x96xf32> -> vector<8x96xf32>
    %536 = arith.addf %535, %33 : vector<8x96xf32>
    %537 = arith.truncf %474 : vector<8x32xf32> to vector<8x32xbf16>
    %cst_110 = arith.constant dense<0.000000e+00> : vector<8x32xf32>
    %538 = tpu.matmul %537, %34, %cst_110 {dimension_numbers = #tpu.dot_dimension_numbers<[1], [0], [0], [1], [0, 0, 1, 1], [], []>} : vector<8x32xbf16>, vector<32x32xbf16>, vector<8x32xf32> -> vector<8x32xf32>
    %539 = arith.addf %538, %37 : vector<8x32xf32>
    %540 = vector.extract_strided_slice %536 {offsets = [0, 0], sizes = [8, 32], strides = [1, 1]} : vector<8x96xf32> to vector<8x32xf32>
    %541 = arith.negf %540 : vector<8x32xf32>
    %542 = math.exp %541 : vector<8x32xf32>
    %cst_111 = arith.constant 1.000000e+00 : f32
    %543 = vector.broadcast %cst_111 : f32 to vector<8x32xf32>
    %544 = arith.addf %543, %542 : vector<8x32xf32>
    %545 = arith.divf %543, %544 : vector<8x32xf32>
    %546 = vector.extract_strided_slice %536 {offsets = [0, 32], sizes = [8, 32], strides = [1, 1]} : vector<8x96xf32> to vector<8x32xf32>
    %547 = arith.negf %546 : vector<8x32xf32>
    %548 = math.exp %547 : vector<8x32xf32>
    %cst_112 = arith.constant 1.000000e+00 : f32
    %549 = vector.broadcast %cst_112 : f32 to vector<8x32xf32>
    %550 = arith.addf %549, %548 : vector<8x32xf32>
    %551 = arith.divf %549, %550 : vector<8x32xf32>
    %552 = vector.extract_strided_slice %536 {offsets = [0, 64], sizes = [8, 32], strides = [1, 1]} : vector<8x96xf32> to vector<8x32xf32>
    %553 = arith.mulf %545, %539 : vector<8x32xf32>
    %554 = arith.addf %552, %553 : vector<8x32xf32>
    %555 = math.tanh %554 : vector<8x32xf32>
    %cst_113 = arith.constant 1.000000e+00 : f32
    %556 = vector.broadcast %cst_113 : f32 to vector<8x32xf32>
    %557 = arith.subf %556, %551 : vector<8x32xf32>
    %558 = arith.mulf %557, %555 : vector<8x32xf32>
    %559 = arith.mulf %551, %474 : vector<8x32xf32>
    %560 = arith.addf %558, %559 : vector<8x32xf32>
    %561 = tpu.concatenate %560, %502 in 1 : vector<8x32xf32>, vector<8x32xf32> -> vector<8x64xf32>
    %562 = arith.truncf %561 : vector<8x64xf32> to vector<8x64xbf16>
    %cst_114 = arith.constant dense<0.000000e+00> : vector<8x96xf32>
    %563 = tpu.matmul %562, %38, %cst_114 {dimension_numbers = #tpu.dot_dimension_numbers<[1], [0], [0], [1], [0, 0, 1, 1], [], []>} : vector<8x64xbf16>, vector<64x96xbf16>, vector<8x96xf32> -> vector<8x96xf32>
    %564 = arith.addf %563, %41 : vector<8x96xf32>
    %565 = arith.truncf %502 : vector<8x32xf32> to vector<8x32xbf16>
    %cst_115 = arith.constant dense<0.000000e+00> : vector<8x32xf32>
    %566 = tpu.matmul %565, %42, %cst_115 {dimension_numbers = #tpu.dot_dimension_numbers<[1], [0], [0], [1], [0, 0, 1, 1], [], []>} : vector<8x32xbf16>, vector<32x32xbf16>, vector<8x32xf32> -> vector<8x32xf32>
    %567 = arith.addf %566, %45 : vector<8x32xf32>
    %568 = vector.extract_strided_slice %564 {offsets = [0, 0], sizes = [8, 32], strides = [1, 1]} : vector<8x96xf32> to vector<8x32xf32>
    %569 = arith.negf %568 : vector<8x32xf32>
    %570 = math.exp %569 : vector<8x32xf32>
    %cst_116 = arith.constant 1.000000e+00 : f32
    %571 = vector.broadcast %cst_116 : f32 to vector<8x32xf32>
    %572 = arith.addf %571, %570 : vector<8x32xf32>
    %573 = arith.divf %571, %572 : vector<8x32xf32>
    %574 = vector.extract_strided_slice %564 {offsets = [0, 32], sizes = [8, 32], strides = [1, 1]} : vector<8x96xf32> to vector<8x32xf32>
    %575 = arith.negf %574 : vector<8x32xf32>
    %576 = math.exp %575 : vector<8x32xf32>
    %cst_117 = arith.constant 1.000000e+00 : f32
    %577 = vector.broadcast %cst_117 : f32 to vector<8x32xf32>
    %578 = arith.addf %577, %576 : vector<8x32xf32>
    %579 = arith.divf %577, %578 : vector<8x32xf32>
    %580 = vector.extract_strided_slice %564 {offsets = [0, 64], sizes = [8, 32], strides = [1, 1]} : vector<8x96xf32> to vector<8x32xf32>
    %581 = arith.mulf %573, %567 : vector<8x32xf32>
    %582 = arith.addf %580, %581 : vector<8x32xf32>
    %583 = math.tanh %582 : vector<8x32xf32>
    %cst_118 = arith.constant 1.000000e+00 : f32
    %584 = vector.broadcast %cst_118 : f32 to vector<8x32xf32>
    %585 = arith.subf %584, %579 : vector<8x32xf32>
    %586 = arith.mulf %585, %583 : vector<8x32xf32>
    %587 = arith.mulf %579, %502 : vector<8x32xf32>
    %588 = arith.addf %586, %587 : vector<8x32xf32>
    %589 = vector.extract_strided_slice %25 {offsets = [48, 0], sizes = [8, 96], strides = [1, 1]} : vector<64x96xf32> to vector<8x96xf32>
    %590 = arith.truncf %532 : vector<8x32xf32> to vector<8x32xbf16>
    %cst_119 = arith.constant dense<0.000000e+00> : vector<8x96xf32>
    %591 = tpu.matmul %590, %26, %cst_119 {dimension_numbers = #tpu.dot_dimension_numbers<[1], [0], [0], [1], [0, 0, 1, 1], [], []>} : vector<8x32xbf16>, vector<32x96xbf16>, vector<8x96xf32> -> vector<8x96xf32>
    %592 = vector.extract_strided_slice %589 {offsets = [0, 0], sizes = [8, 32], strides = [1, 1]} : vector<8x96xf32> to vector<8x32xf32>
    %593 = vector.extract_strided_slice %591 {offsets = [0, 0], sizes = [8, 32], strides = [1, 1]} : vector<8x96xf32> to vector<8x32xf32>
    %594 = arith.addf %592, %593 : vector<8x32xf32>
    %595 = arith.negf %594 : vector<8x32xf32>
    %596 = math.exp %595 : vector<8x32xf32>
    %cst_120 = arith.constant 1.000000e+00 : f32
    %597 = vector.broadcast %cst_120 : f32 to vector<8x32xf32>
    %598 = arith.addf %597, %596 : vector<8x32xf32>
    %599 = arith.divf %597, %598 : vector<8x32xf32>
    %600 = vector.extract_strided_slice %589 {offsets = [0, 32], sizes = [8, 32], strides = [1, 1]} : vector<8x96xf32> to vector<8x32xf32>
    %601 = vector.extract_strided_slice %591 {offsets = [0, 32], sizes = [8, 32], strides = [1, 1]} : vector<8x96xf32> to vector<8x32xf32>
    %602 = arith.addf %600, %601 : vector<8x32xf32>
    %603 = arith.negf %602 : vector<8x32xf32>
    %604 = math.exp %603 : vector<8x32xf32>
    %cst_121 = arith.constant 1.000000e+00 : f32
    %605 = vector.broadcast %cst_121 : f32 to vector<8x32xf32>
    %606 = arith.addf %605, %604 : vector<8x32xf32>
    %607 = arith.divf %605, %606 : vector<8x32xf32>
    %608 = vector.extract_strided_slice %589 {offsets = [0, 64], sizes = [8, 32], strides = [1, 1]} : vector<8x96xf32> to vector<8x32xf32>
    %609 = vector.extract_strided_slice %591 {offsets = [0, 64], sizes = [8, 32], strides = [1, 1]} : vector<8x96xf32> to vector<8x32xf32>
    %610 = arith.addf %609, %29 : vector<8x32xf32>
    %611 = arith.mulf %599, %610 : vector<8x32xf32>
    %612 = arith.addf %608, %611 : vector<8x32xf32>
    %613 = math.tanh %612 : vector<8x32xf32>
    %cst_122 = arith.constant 1.000000e+00 : f32
    %614 = vector.broadcast %cst_122 : f32 to vector<8x32xf32>
    %615 = arith.subf %614, %607 : vector<8x32xf32>
    %616 = arith.mulf %615, %613 : vector<8x32xf32>
    %617 = arith.mulf %607, %532 : vector<8x32xf32>
    %618 = arith.addf %616, %617 : vector<8x32xf32>
    %619 = tpu.concatenate %618, %560 in 1 : vector<8x32xf32>, vector<8x32xf32> -> vector<8x64xf32>
    %620 = arith.truncf %619 : vector<8x64xf32> to vector<8x64xbf16>
    %cst_123 = arith.constant dense<0.000000e+00> : vector<8x96xf32>
    %621 = tpu.matmul %620, %30, %cst_123 {dimension_numbers = #tpu.dot_dimension_numbers<[1], [0], [0], [1], [0, 0, 1, 1], [], []>} : vector<8x64xbf16>, vector<64x96xbf16>, vector<8x96xf32> -> vector<8x96xf32>
    %622 = arith.addf %621, %33 : vector<8x96xf32>
    %623 = arith.truncf %560 : vector<8x32xf32> to vector<8x32xbf16>
    %cst_124 = arith.constant dense<0.000000e+00> : vector<8x32xf32>
    %624 = tpu.matmul %623, %34, %cst_124 {dimension_numbers = #tpu.dot_dimension_numbers<[1], [0], [0], [1], [0, 0, 1, 1], [], []>} : vector<8x32xbf16>, vector<32x32xbf16>, vector<8x32xf32> -> vector<8x32xf32>
    %625 = arith.addf %624, %37 : vector<8x32xf32>
    %626 = vector.extract_strided_slice %622 {offsets = [0, 0], sizes = [8, 32], strides = [1, 1]} : vector<8x96xf32> to vector<8x32xf32>
    %627 = arith.negf %626 : vector<8x32xf32>
    %628 = math.exp %627 : vector<8x32xf32>
    %cst_125 = arith.constant 1.000000e+00 : f32
    %629 = vector.broadcast %cst_125 : f32 to vector<8x32xf32>
    %630 = arith.addf %629, %628 : vector<8x32xf32>
    %631 = arith.divf %629, %630 : vector<8x32xf32>
    %632 = vector.extract_strided_slice %622 {offsets = [0, 32], sizes = [8, 32], strides = [1, 1]} : vector<8x96xf32> to vector<8x32xf32>
    %633 = arith.negf %632 : vector<8x32xf32>
    %634 = math.exp %633 : vector<8x32xf32>
    %cst_126 = arith.constant 1.000000e+00 : f32
    %635 = vector.broadcast %cst_126 : f32 to vector<8x32xf32>
    %636 = arith.addf %635, %634 : vector<8x32xf32>
    %637 = arith.divf %635, %636 : vector<8x32xf32>
    %638 = vector.extract_strided_slice %622 {offsets = [0, 64], sizes = [8, 32], strides = [1, 1]} : vector<8x96xf32> to vector<8x32xf32>
    %639 = arith.mulf %631, %625 : vector<8x32xf32>
    %640 = arith.addf %638, %639 : vector<8x32xf32>
    %641 = math.tanh %640 : vector<8x32xf32>
    %cst_127 = arith.constant 1.000000e+00 : f32
    %642 = vector.broadcast %cst_127 : f32 to vector<8x32xf32>
    %643 = arith.subf %642, %637 : vector<8x32xf32>
    %644 = arith.mulf %643, %641 : vector<8x32xf32>
    %645 = arith.mulf %637, %560 : vector<8x32xf32>
    %646 = arith.addf %644, %645 : vector<8x32xf32>
    %647 = tpu.concatenate %646, %588 in 1 : vector<8x32xf32>, vector<8x32xf32> -> vector<8x64xf32>
    %648 = arith.truncf %647 : vector<8x64xf32> to vector<8x64xbf16>
    %cst_128 = arith.constant dense<0.000000e+00> : vector<8x96xf32>
    %649 = tpu.matmul %648, %38, %cst_128 {dimension_numbers = #tpu.dot_dimension_numbers<[1], [0], [0], [1], [0, 0, 1, 1], [], []>} : vector<8x64xbf16>, vector<64x96xbf16>, vector<8x96xf32> -> vector<8x96xf32>
    %650 = arith.addf %649, %41 : vector<8x96xf32>
    %651 = arith.truncf %588 : vector<8x32xf32> to vector<8x32xbf16>
    %cst_129 = arith.constant dense<0.000000e+00> : vector<8x32xf32>
    %652 = tpu.matmul %651, %42, %cst_129 {dimension_numbers = #tpu.dot_dimension_numbers<[1], [0], [0], [1], [0, 0, 1, 1], [], []>} : vector<8x32xbf16>, vector<32x32xbf16>, vector<8x32xf32> -> vector<8x32xf32>
    %653 = arith.addf %652, %45 : vector<8x32xf32>
    %654 = vector.extract_strided_slice %650 {offsets = [0, 0], sizes = [8, 32], strides = [1, 1]} : vector<8x96xf32> to vector<8x32xf32>
    %655 = arith.negf %654 : vector<8x32xf32>
    %656 = math.exp %655 : vector<8x32xf32>
    %cst_130 = arith.constant 1.000000e+00 : f32
    %657 = vector.broadcast %cst_130 : f32 to vector<8x32xf32>
    %658 = arith.addf %657, %656 : vector<8x32xf32>
    %659 = arith.divf %657, %658 : vector<8x32xf32>
    %660 = vector.extract_strided_slice %650 {offsets = [0, 32], sizes = [8, 32], strides = [1, 1]} : vector<8x96xf32> to vector<8x32xf32>
    %661 = arith.negf %660 : vector<8x32xf32>
    %662 = math.exp %661 : vector<8x32xf32>
    %cst_131 = arith.constant 1.000000e+00 : f32
    %663 = vector.broadcast %cst_131 : f32 to vector<8x32xf32>
    %664 = arith.addf %663, %662 : vector<8x32xf32>
    %665 = arith.divf %663, %664 : vector<8x32xf32>
    %666 = vector.extract_strided_slice %650 {offsets = [0, 64], sizes = [8, 32], strides = [1, 1]} : vector<8x96xf32> to vector<8x32xf32>
    %667 = arith.mulf %659, %653 : vector<8x32xf32>
    %668 = arith.addf %666, %667 : vector<8x32xf32>
    %669 = math.tanh %668 : vector<8x32xf32>
    %cst_132 = arith.constant 1.000000e+00 : f32
    %670 = vector.broadcast %cst_132 : f32 to vector<8x32xf32>
    %671 = arith.subf %670, %665 : vector<8x32xf32>
    %672 = arith.mulf %671, %669 : vector<8x32xf32>
    %673 = arith.mulf %665, %588 : vector<8x32xf32>
    %674 = arith.addf %672, %673 : vector<8x32xf32>
    %675 = vector.extract_strided_slice %25 {offsets = [56, 0], sizes = [8, 96], strides = [1, 1]} : vector<64x96xf32> to vector<8x96xf32>
    %676 = arith.truncf %618 : vector<8x32xf32> to vector<8x32xbf16>
    %cst_133 = arith.constant dense<0.000000e+00> : vector<8x96xf32>
    %677 = tpu.matmul %676, %26, %cst_133 {dimension_numbers = #tpu.dot_dimension_numbers<[1], [0], [0], [1], [0, 0, 1, 1], [], []>} : vector<8x32xbf16>, vector<32x96xbf16>, vector<8x96xf32> -> vector<8x96xf32>
    %678 = vector.extract_strided_slice %675 {offsets = [0, 0], sizes = [8, 32], strides = [1, 1]} : vector<8x96xf32> to vector<8x32xf32>
    %679 = vector.extract_strided_slice %677 {offsets = [0, 0], sizes = [8, 32], strides = [1, 1]} : vector<8x96xf32> to vector<8x32xf32>
    %680 = arith.addf %678, %679 : vector<8x32xf32>
    %681 = arith.negf %680 : vector<8x32xf32>
    %682 = math.exp %681 : vector<8x32xf32>
    %cst_134 = arith.constant 1.000000e+00 : f32
    %683 = vector.broadcast %cst_134 : f32 to vector<8x32xf32>
    %684 = arith.addf %683, %682 : vector<8x32xf32>
    %685 = arith.divf %683, %684 : vector<8x32xf32>
    %686 = vector.extract_strided_slice %675 {offsets = [0, 32], sizes = [8, 32], strides = [1, 1]} : vector<8x96xf32> to vector<8x32xf32>
    %687 = vector.extract_strided_slice %677 {offsets = [0, 32], sizes = [8, 32], strides = [1, 1]} : vector<8x96xf32> to vector<8x32xf32>
    %688 = arith.addf %686, %687 : vector<8x32xf32>
    %689 = arith.negf %688 : vector<8x32xf32>
    %690 = math.exp %689 : vector<8x32xf32>
    %cst_135 = arith.constant 1.000000e+00 : f32
    %691 = vector.broadcast %cst_135 : f32 to vector<8x32xf32>
    %692 = arith.addf %691, %690 : vector<8x32xf32>
    %693 = arith.divf %691, %692 : vector<8x32xf32>
    %694 = vector.extract_strided_slice %675 {offsets = [0, 64], sizes = [8, 32], strides = [1, 1]} : vector<8x96xf32> to vector<8x32xf32>
    %695 = vector.extract_strided_slice %677 {offsets = [0, 64], sizes = [8, 32], strides = [1, 1]} : vector<8x96xf32> to vector<8x32xf32>
    %696 = arith.addf %695, %29 : vector<8x32xf32>
    %697 = arith.mulf %685, %696 : vector<8x32xf32>
    %698 = arith.addf %694, %697 : vector<8x32xf32>
    %699 = math.tanh %698 : vector<8x32xf32>
    %cst_136 = arith.constant 1.000000e+00 : f32
    %700 = vector.broadcast %cst_136 : f32 to vector<8x32xf32>
    %701 = arith.subf %700, %693 : vector<8x32xf32>
    %702 = arith.mulf %701, %699 : vector<8x32xf32>
    %703 = arith.mulf %693, %618 : vector<8x32xf32>
    %704 = arith.addf %702, %703 : vector<8x32xf32>
    %705 = tpu.concatenate %704, %646 in 1 : vector<8x32xf32>, vector<8x32xf32> -> vector<8x64xf32>
    %706 = arith.truncf %705 : vector<8x64xf32> to vector<8x64xbf16>
    %cst_137 = arith.constant dense<0.000000e+00> : vector<8x96xf32>
    %707 = tpu.matmul %706, %30, %cst_137 {dimension_numbers = #tpu.dot_dimension_numbers<[1], [0], [0], [1], [0, 0, 1, 1], [], []>} : vector<8x64xbf16>, vector<64x96xbf16>, vector<8x96xf32> -> vector<8x96xf32>
    %708 = arith.addf %707, %33 : vector<8x96xf32>
    %709 = arith.truncf %646 : vector<8x32xf32> to vector<8x32xbf16>
    %cst_138 = arith.constant dense<0.000000e+00> : vector<8x32xf32>
    %710 = tpu.matmul %709, %34, %cst_138 {dimension_numbers = #tpu.dot_dimension_numbers<[1], [0], [0], [1], [0, 0, 1, 1], [], []>} : vector<8x32xbf16>, vector<32x32xbf16>, vector<8x32xf32> -> vector<8x32xf32>
    %711 = arith.addf %710, %37 : vector<8x32xf32>
    %712 = vector.extract_strided_slice %708 {offsets = [0, 0], sizes = [8, 32], strides = [1, 1]} : vector<8x96xf32> to vector<8x32xf32>
    %713 = arith.negf %712 : vector<8x32xf32>
    %714 = math.exp %713 : vector<8x32xf32>
    %cst_139 = arith.constant 1.000000e+00 : f32
    %715 = vector.broadcast %cst_139 : f32 to vector<8x32xf32>
    %716 = arith.addf %715, %714 : vector<8x32xf32>
    %717 = arith.divf %715, %716 : vector<8x32xf32>
    %718 = vector.extract_strided_slice %708 {offsets = [0, 32], sizes = [8, 32], strides = [1, 1]} : vector<8x96xf32> to vector<8x32xf32>
    %719 = arith.negf %718 : vector<8x32xf32>
    %720 = math.exp %719 : vector<8x32xf32>
    %cst_140 = arith.constant 1.000000e+00 : f32
    %721 = vector.broadcast %cst_140 : f32 to vector<8x32xf32>
    %722 = arith.addf %721, %720 : vector<8x32xf32>
    %723 = arith.divf %721, %722 : vector<8x32xf32>
    %724 = vector.extract_strided_slice %708 {offsets = [0, 64], sizes = [8, 32], strides = [1, 1]} : vector<8x96xf32> to vector<8x32xf32>
    %725 = arith.mulf %717, %711 : vector<8x32xf32>
    %726 = arith.addf %724, %725 : vector<8x32xf32>
    %727 = math.tanh %726 : vector<8x32xf32>
    %cst_141 = arith.constant 1.000000e+00 : f32
    %728 = vector.broadcast %cst_141 : f32 to vector<8x32xf32>
    %729 = arith.subf %728, %723 : vector<8x32xf32>
    %730 = arith.mulf %729, %727 : vector<8x32xf32>
    %731 = arith.mulf %723, %646 : vector<8x32xf32>
    %732 = arith.addf %730, %731 : vector<8x32xf32>
    %733 = tpu.concatenate %732, %674 in 1 : vector<8x32xf32>, vector<8x32xf32> -> vector<8x64xf32>
    %734 = arith.truncf %733 : vector<8x64xf32> to vector<8x64xbf16>
    %cst_142 = arith.constant dense<0.000000e+00> : vector<8x96xf32>
    %735 = tpu.matmul %734, %38, %cst_142 {dimension_numbers = #tpu.dot_dimension_numbers<[1], [0], [0], [1], [0, 0, 1, 1], [], []>} : vector<8x64xbf16>, vector<64x96xbf16>, vector<8x96xf32> -> vector<8x96xf32>
    %736 = arith.addf %735, %41 : vector<8x96xf32>
    %737 = arith.truncf %674 : vector<8x32xf32> to vector<8x32xbf16>
    %cst_143 = arith.constant dense<0.000000e+00> : vector<8x32xf32>
    %738 = tpu.matmul %737, %42, %cst_143 {dimension_numbers = #tpu.dot_dimension_numbers<[1], [0], [0], [1], [0, 0, 1, 1], [], []>} : vector<8x32xbf16>, vector<32x32xbf16>, vector<8x32xf32> -> vector<8x32xf32>
    %739 = arith.addf %738, %45 : vector<8x32xf32>
    %740 = vector.extract_strided_slice %736 {offsets = [0, 0], sizes = [8, 32], strides = [1, 1]} : vector<8x96xf32> to vector<8x32xf32>
    %741 = arith.negf %740 : vector<8x32xf32>
    %742 = math.exp %741 : vector<8x32xf32>
    %cst_144 = arith.constant 1.000000e+00 : f32
    %743 = vector.broadcast %cst_144 : f32 to vector<8x32xf32>
    %744 = arith.addf %743, %742 : vector<8x32xf32>
    %745 = arith.divf %743, %744 : vector<8x32xf32>
    %746 = vector.extract_strided_slice %736 {offsets = [0, 32], sizes = [8, 32], strides = [1, 1]} : vector<8x96xf32> to vector<8x32xf32>
    %747 = arith.negf %746 : vector<8x32xf32>
    %748 = math.exp %747 : vector<8x32xf32>
    %cst_145 = arith.constant 1.000000e+00 : f32
    %749 = vector.broadcast %cst_145 : f32 to vector<8x32xf32>
    %750 = arith.addf %749, %748 : vector<8x32xf32>
    %751 = arith.divf %749, %750 : vector<8x32xf32>
    %752 = vector.extract_strided_slice %736 {offsets = [0, 64], sizes = [8, 32], strides = [1, 1]} : vector<8x96xf32> to vector<8x32xf32>
    %753 = arith.mulf %745, %739 : vector<8x32xf32>
    %754 = arith.addf %752, %753 : vector<8x32xf32>
    %755 = math.tanh %754 : vector<8x32xf32>
    %cst_146 = arith.constant 1.000000e+00 : f32
    %756 = vector.broadcast %cst_146 : f32 to vector<8x32xf32>
    %757 = arith.subf %756, %751 : vector<8x32xf32>
    %758 = arith.mulf %757, %755 : vector<8x32xf32>
    %759 = arith.mulf %751, %674 : vector<8x32xf32>
    %760 = arith.addf %758, %759 : vector<8x32xf32>
    %761 = vector.extract_strided_slice %18 {offsets = [56, 0], sizes = [8, 32], strides = [1, 1]} : vector<64x32xf32> to vector<8x32xf32>
    %762 = tpu.concatenate %761, %704 in 1 : vector<8x32xf32>, vector<8x32xf32> -> vector<8x64xf32>
    %763 = arith.truncf %762 : vector<8x64xf32> to vector<8x64xbf16>
    %cst_147 = arith.constant dense<0.000000e+00> : vector<8x96xf32>
    %764 = tpu.matmul %763, %46, %cst_147 {dimension_numbers = #tpu.dot_dimension_numbers<[1], [0], [0], [1], [0, 0, 1, 1], [], []>} : vector<8x64xbf16>, vector<64x96xbf16>, vector<8x96xf32> -> vector<8x96xf32>
    %765 = arith.addf %764, %49 : vector<8x96xf32>
    %766 = arith.truncf %704 : vector<8x32xf32> to vector<8x32xbf16>
    %cst_148 = arith.constant dense<0.000000e+00> : vector<8x32xf32>
    %767 = tpu.matmul %766, %50, %cst_148 {dimension_numbers = #tpu.dot_dimension_numbers<[1], [0], [0], [1], [0, 0, 1, 1], [], []>} : vector<8x32xbf16>, vector<32x32xbf16>, vector<8x32xf32> -> vector<8x32xf32>
    %768 = arith.addf %767, %53 : vector<8x32xf32>
    %769 = vector.extract_strided_slice %765 {offsets = [0, 0], sizes = [8, 32], strides = [1, 1]} : vector<8x96xf32> to vector<8x32xf32>
    %770 = arith.negf %769 : vector<8x32xf32>
    %771 = math.exp %770 : vector<8x32xf32>
    %cst_149 = arith.constant 1.000000e+00 : f32
    %772 = vector.broadcast %cst_149 : f32 to vector<8x32xf32>
    %773 = arith.addf %772, %771 : vector<8x32xf32>
    %774 = arith.divf %772, %773 : vector<8x32xf32>
    %775 = vector.extract_strided_slice %765 {offsets = [0, 32], sizes = [8, 32], strides = [1, 1]} : vector<8x96xf32> to vector<8x32xf32>
    %776 = arith.negf %775 : vector<8x32xf32>
    %777 = math.exp %776 : vector<8x32xf32>
    %cst_150 = arith.constant 1.000000e+00 : f32
    %778 = vector.broadcast %cst_150 : f32 to vector<8x32xf32>
    %779 = arith.addf %778, %777 : vector<8x32xf32>
    %780 = arith.divf %778, %779 : vector<8x32xf32>
    %781 = vector.extract_strided_slice %765 {offsets = [0, 64], sizes = [8, 32], strides = [1, 1]} : vector<8x96xf32> to vector<8x32xf32>
    %782 = arith.mulf %774, %768 : vector<8x32xf32>
    %783 = arith.addf %781, %782 : vector<8x32xf32>
    %784 = math.tanh %783 : vector<8x32xf32>
    %cst_151 = arith.constant 1.000000e+00 : f32
    %785 = vector.broadcast %cst_151 : f32 to vector<8x32xf32>
    %786 = arith.subf %785, %780 : vector<8x32xf32>
    %787 = arith.mulf %786, %784 : vector<8x32xf32>
    %788 = arith.mulf %780, %704 : vector<8x32xf32>
    %789 = arith.addf %787, %788 : vector<8x32xf32>
    %790 = tpu.concatenate %789, %732 in 1 : vector<8x32xf32>, vector<8x32xf32> -> vector<8x64xf32>
    %791 = arith.truncf %790 : vector<8x64xf32> to vector<8x64xbf16>
    %cst_152 = arith.constant dense<0.000000e+00> : vector<8x96xf32>
    %792 = tpu.matmul %791, %54, %cst_152 {dimension_numbers = #tpu.dot_dimension_numbers<[1], [0], [0], [1], [0, 0, 1, 1], [], []>} : vector<8x64xbf16>, vector<64x96xbf16>, vector<8x96xf32> -> vector<8x96xf32>
    %793 = arith.addf %792, %57 : vector<8x96xf32>
    %794 = arith.truncf %732 : vector<8x32xf32> to vector<8x32xbf16>
    %cst_153 = arith.constant dense<0.000000e+00> : vector<8x32xf32>
    %795 = tpu.matmul %794, %58, %cst_153 {dimension_numbers = #tpu.dot_dimension_numbers<[1], [0], [0], [1], [0, 0, 1, 1], [], []>} : vector<8x32xbf16>, vector<32x32xbf16>, vector<8x32xf32> -> vector<8x32xf32>
    %796 = arith.addf %795, %61 : vector<8x32xf32>
    %797 = vector.extract_strided_slice %793 {offsets = [0, 0], sizes = [8, 32], strides = [1, 1]} : vector<8x96xf32> to vector<8x32xf32>
    %798 = arith.negf %797 : vector<8x32xf32>
    %799 = math.exp %798 : vector<8x32xf32>
    %cst_154 = arith.constant 1.000000e+00 : f32
    %800 = vector.broadcast %cst_154 : f32 to vector<8x32xf32>
    %801 = arith.addf %800, %799 : vector<8x32xf32>
    %802 = arith.divf %800, %801 : vector<8x32xf32>
    %803 = vector.extract_strided_slice %793 {offsets = [0, 32], sizes = [8, 32], strides = [1, 1]} : vector<8x96xf32> to vector<8x32xf32>
    %804 = arith.negf %803 : vector<8x32xf32>
    %805 = math.exp %804 : vector<8x32xf32>
    %cst_155 = arith.constant 1.000000e+00 : f32
    %806 = vector.broadcast %cst_155 : f32 to vector<8x32xf32>
    %807 = arith.addf %806, %805 : vector<8x32xf32>
    %808 = arith.divf %806, %807 : vector<8x32xf32>
    %809 = vector.extract_strided_slice %793 {offsets = [0, 64], sizes = [8, 32], strides = [1, 1]} : vector<8x96xf32> to vector<8x32xf32>
    %810 = arith.mulf %802, %796 : vector<8x32xf32>
    %811 = arith.addf %809, %810 : vector<8x32xf32>
    %812 = math.tanh %811 : vector<8x32xf32>
    %cst_156 = arith.constant 1.000000e+00 : f32
    %813 = vector.broadcast %cst_156 : f32 to vector<8x32xf32>
    %814 = arith.subf %813, %808 : vector<8x32xf32>
    %815 = arith.mulf %814, %812 : vector<8x32xf32>
    %816 = arith.mulf %808, %732 : vector<8x32xf32>
    %817 = arith.addf %815, %816 : vector<8x32xf32>
    %818 = tpu.concatenate %817, %760 in 1 : vector<8x32xf32>, vector<8x32xf32> -> vector<8x64xf32>
    %819 = arith.truncf %818 : vector<8x64xf32> to vector<8x64xbf16>
    %cst_157 = arith.constant dense<0.000000e+00> : vector<8x96xf32>
    %820 = tpu.matmul %819, %62, %cst_157 {dimension_numbers = #tpu.dot_dimension_numbers<[1], [0], [0], [1], [0, 0, 1, 1], [], []>} : vector<8x64xbf16>, vector<64x96xbf16>, vector<8x96xf32> -> vector<8x96xf32>
    %821 = arith.addf %820, %65 : vector<8x96xf32>
    %822 = arith.truncf %760 : vector<8x32xf32> to vector<8x32xbf16>
    %cst_158 = arith.constant dense<0.000000e+00> : vector<8x32xf32>
    %823 = tpu.matmul %822, %66, %cst_158 {dimension_numbers = #tpu.dot_dimension_numbers<[1], [0], [0], [1], [0, 0, 1, 1], [], []>} : vector<8x32xbf16>, vector<32x32xbf16>, vector<8x32xf32> -> vector<8x32xf32>
    %824 = arith.addf %823, %69 : vector<8x32xf32>
    %825 = vector.extract_strided_slice %821 {offsets = [0, 0], sizes = [8, 32], strides = [1, 1]} : vector<8x96xf32> to vector<8x32xf32>
    %826 = arith.negf %825 : vector<8x32xf32>
    %827 = math.exp %826 : vector<8x32xf32>
    %cst_159 = arith.constant 1.000000e+00 : f32
    %828 = vector.broadcast %cst_159 : f32 to vector<8x32xf32>
    %829 = arith.addf %828, %827 : vector<8x32xf32>
    %830 = arith.divf %828, %829 : vector<8x32xf32>
    %831 = vector.extract_strided_slice %821 {offsets = [0, 32], sizes = [8, 32], strides = [1, 1]} : vector<8x96xf32> to vector<8x32xf32>
    %832 = arith.negf %831 : vector<8x32xf32>
    %833 = math.exp %832 : vector<8x32xf32>
    %cst_160 = arith.constant 1.000000e+00 : f32
    %834 = vector.broadcast %cst_160 : f32 to vector<8x32xf32>
    %835 = arith.addf %834, %833 : vector<8x32xf32>
    %836 = arith.divf %834, %835 : vector<8x32xf32>
    %837 = vector.extract_strided_slice %821 {offsets = [0, 64], sizes = [8, 32], strides = [1, 1]} : vector<8x96xf32> to vector<8x32xf32>
    %838 = arith.mulf %830, %824 : vector<8x32xf32>
    %839 = arith.addf %837, %838 : vector<8x32xf32>
    %840 = math.tanh %839 : vector<8x32xf32>
    %cst_161 = arith.constant 1.000000e+00 : f32
    %841 = vector.broadcast %cst_161 : f32 to vector<8x32xf32>
    %842 = arith.subf %841, %836 : vector<8x32xf32>
    %843 = arith.mulf %842, %840 : vector<8x32xf32>
    %844 = arith.mulf %836, %760 : vector<8x32xf32>
    %845 = arith.addf %843, %844 : vector<8x32xf32>
    %cst_162 = arith.constant 0.000000e+00 : f32
    %846 = vector.broadcast %cst_162 : f32 to vector<8x32xf32>
    %847 = arith.maximumf %845, %846 : vector<8x32xf32>
    %848 = tpu.concatenate %847, %789 in 1 : vector<8x32xf32>, vector<8x32xf32> -> vector<8x64xf32>
    %849 = arith.truncf %848 : vector<8x64xf32> to vector<8x64xbf16>
    %cst_163 = arith.constant dense<0.000000e+00> : vector<8x96xf32>
    %850 = tpu.matmul %849, %46, %cst_163 {dimension_numbers = #tpu.dot_dimension_numbers<[1], [0], [0], [1], [0, 0, 1, 1], [], []>} : vector<8x64xbf16>, vector<64x96xbf16>, vector<8x96xf32> -> vector<8x96xf32>
    %851 = arith.addf %850, %49 : vector<8x96xf32>
    %852 = arith.truncf %789 : vector<8x32xf32> to vector<8x32xbf16>
    %cst_164 = arith.constant dense<0.000000e+00> : vector<8x32xf32>
    %853 = tpu.matmul %852, %50, %cst_164 {dimension_numbers = #tpu.dot_dimension_numbers<[1], [0], [0], [1], [0, 0, 1, 1], [], []>} : vector<8x32xbf16>, vector<32x32xbf16>, vector<8x32xf32> -> vector<8x32xf32>
    %854 = arith.addf %853, %53 : vector<8x32xf32>
    %855 = vector.extract_strided_slice %851 {offsets = [0, 0], sizes = [8, 32], strides = [1, 1]} : vector<8x96xf32> to vector<8x32xf32>
    %856 = arith.negf %855 : vector<8x32xf32>
    %857 = math.exp %856 : vector<8x32xf32>
    %cst_165 = arith.constant 1.000000e+00 : f32
    %858 = vector.broadcast %cst_165 : f32 to vector<8x32xf32>
    %859 = arith.addf %858, %857 : vector<8x32xf32>
    %860 = arith.divf %858, %859 : vector<8x32xf32>
    %861 = vector.extract_strided_slice %851 {offsets = [0, 32], sizes = [8, 32], strides = [1, 1]} : vector<8x96xf32> to vector<8x32xf32>
    %862 = arith.negf %861 : vector<8x32xf32>
    %863 = math.exp %862 : vector<8x32xf32>
    %cst_166 = arith.constant 1.000000e+00 : f32
    %864 = vector.broadcast %cst_166 : f32 to vector<8x32xf32>
    %865 = arith.addf %864, %863 : vector<8x32xf32>
    %866 = arith.divf %864, %865 : vector<8x32xf32>
    %867 = vector.extract_strided_slice %851 {offsets = [0, 64], sizes = [8, 32], strides = [1, 1]} : vector<8x96xf32> to vector<8x32xf32>
    %868 = arith.mulf %860, %854 : vector<8x32xf32>
    %869 = arith.addf %867, %868 : vector<8x32xf32>
    %870 = math.tanh %869 : vector<8x32xf32>
    %cst_167 = arith.constant 1.000000e+00 : f32
    %871 = vector.broadcast %cst_167 : f32 to vector<8x32xf32>
    %872 = arith.subf %871, %866 : vector<8x32xf32>
    %873 = arith.mulf %872, %870 : vector<8x32xf32>
    %874 = arith.mulf %866, %789 : vector<8x32xf32>
    %875 = arith.addf %873, %874 : vector<8x32xf32>
    %876 = tpu.concatenate %875, %817 in 1 : vector<8x32xf32>, vector<8x32xf32> -> vector<8x64xf32>
    %877 = arith.truncf %876 : vector<8x64xf32> to vector<8x64xbf16>
    %cst_168 = arith.constant dense<0.000000e+00> : vector<8x96xf32>
    %878 = tpu.matmul %877, %54, %cst_168 {dimension_numbers = #tpu.dot_dimension_numbers<[1], [0], [0], [1], [0, 0, 1, 1], [], []>} : vector<8x64xbf16>, vector<64x96xbf16>, vector<8x96xf32> -> vector<8x96xf32>
    %879 = arith.addf %878, %57 : vector<8x96xf32>
    %880 = arith.truncf %817 : vector<8x32xf32> to vector<8x32xbf16>
    %cst_169 = arith.constant dense<0.000000e+00> : vector<8x32xf32>
    %881 = tpu.matmul %880, %58, %cst_169 {dimension_numbers = #tpu.dot_dimension_numbers<[1], [0], [0], [1], [0, 0, 1, 1], [], []>} : vector<8x32xbf16>, vector<32x32xbf16>, vector<8x32xf32> -> vector<8x32xf32>
    %882 = arith.addf %881, %61 : vector<8x32xf32>
    %883 = vector.extract_strided_slice %879 {offsets = [0, 0], sizes = [8, 32], strides = [1, 1]} : vector<8x96xf32> to vector<8x32xf32>
    %884 = arith.negf %883 : vector<8x32xf32>
    %885 = math.exp %884 : vector<8x32xf32>
    %cst_170 = arith.constant 1.000000e+00 : f32
    %886 = vector.broadcast %cst_170 : f32 to vector<8x32xf32>
    %887 = arith.addf %886, %885 : vector<8x32xf32>
    %888 = arith.divf %886, %887 : vector<8x32xf32>
    %889 = vector.extract_strided_slice %879 {offsets = [0, 32], sizes = [8, 32], strides = [1, 1]} : vector<8x96xf32> to vector<8x32xf32>
    %890 = arith.negf %889 : vector<8x32xf32>
    %891 = math.exp %890 : vector<8x32xf32>
    %cst_171 = arith.constant 1.000000e+00 : f32
    %892 = vector.broadcast %cst_171 : f32 to vector<8x32xf32>
    %893 = arith.addf %892, %891 : vector<8x32xf32>
    %894 = arith.divf %892, %893 : vector<8x32xf32>
    %895 = vector.extract_strided_slice %879 {offsets = [0, 64], sizes = [8, 32], strides = [1, 1]} : vector<8x96xf32> to vector<8x32xf32>
    %896 = arith.mulf %888, %882 : vector<8x32xf32>
    %897 = arith.addf %895, %896 : vector<8x32xf32>
    %898 = math.tanh %897 : vector<8x32xf32>
    %cst_172 = arith.constant 1.000000e+00 : f32
    %899 = vector.broadcast %cst_172 : f32 to vector<8x32xf32>
    %900 = arith.subf %899, %894 : vector<8x32xf32>
    %901 = arith.mulf %900, %898 : vector<8x32xf32>
    %902 = arith.mulf %894, %817 : vector<8x32xf32>
    %903 = arith.addf %901, %902 : vector<8x32xf32>
    %904 = tpu.concatenate %903, %845 in 1 : vector<8x32xf32>, vector<8x32xf32> -> vector<8x64xf32>
    %905 = arith.truncf %904 : vector<8x64xf32> to vector<8x64xbf16>
    %cst_173 = arith.constant dense<0.000000e+00> : vector<8x96xf32>
    %906 = tpu.matmul %905, %62, %cst_173 {dimension_numbers = #tpu.dot_dimension_numbers<[1], [0], [0], [1], [0, 0, 1, 1], [], []>} : vector<8x64xbf16>, vector<64x96xbf16>, vector<8x96xf32> -> vector<8x96xf32>
    %907 = arith.addf %906, %65 : vector<8x96xf32>
    %908 = arith.truncf %845 : vector<8x32xf32> to vector<8x32xbf16>
    %cst_174 = arith.constant dense<0.000000e+00> : vector<8x32xf32>
    %909 = tpu.matmul %908, %66, %cst_174 {dimension_numbers = #tpu.dot_dimension_numbers<[1], [0], [0], [1], [0, 0, 1, 1], [], []>} : vector<8x32xbf16>, vector<32x32xbf16>, vector<8x32xf32> -> vector<8x32xf32>
    %910 = arith.addf %909, %69 : vector<8x32xf32>
    %911 = vector.extract_strided_slice %907 {offsets = [0, 0], sizes = [8, 32], strides = [1, 1]} : vector<8x96xf32> to vector<8x32xf32>
    %912 = arith.negf %911 : vector<8x32xf32>
    %913 = math.exp %912 : vector<8x32xf32>
    %cst_175 = arith.constant 1.000000e+00 : f32
    %914 = vector.broadcast %cst_175 : f32 to vector<8x32xf32>
    %915 = arith.addf %914, %913 : vector<8x32xf32>
    %916 = arith.divf %914, %915 : vector<8x32xf32>
    %917 = vector.extract_strided_slice %907 {offsets = [0, 32], sizes = [8, 32], strides = [1, 1]} : vector<8x96xf32> to vector<8x32xf32>
    %918 = arith.negf %917 : vector<8x32xf32>
    %919 = math.exp %918 : vector<8x32xf32>
    %cst_176 = arith.constant 1.000000e+00 : f32
    %920 = vector.broadcast %cst_176 : f32 to vector<8x32xf32>
    %921 = arith.addf %920, %919 : vector<8x32xf32>
    %922 = arith.divf %920, %921 : vector<8x32xf32>
    %923 = vector.extract_strided_slice %907 {offsets = [0, 64], sizes = [8, 32], strides = [1, 1]} : vector<8x96xf32> to vector<8x32xf32>
    %924 = arith.mulf %916, %910 : vector<8x32xf32>
    %925 = arith.addf %923, %924 : vector<8x32xf32>
    %926 = math.tanh %925 : vector<8x32xf32>
    %cst_177 = arith.constant 1.000000e+00 : f32
    %927 = vector.broadcast %cst_177 : f32 to vector<8x32xf32>
    %928 = arith.subf %927, %922 : vector<8x32xf32>
    %929 = arith.mulf %928, %926 : vector<8x32xf32>
    %930 = arith.mulf %922, %845 : vector<8x32xf32>
    %931 = arith.addf %929, %930 : vector<8x32xf32>
    %cst_178 = arith.constant 0.000000e+00 : f32
    %932 = vector.broadcast %cst_178 : f32 to vector<8x32xf32>
    %933 = arith.maximumf %931, %932 : vector<8x32xf32>
    %934 = tpu.concatenate %933, %875 in 1 : vector<8x32xf32>, vector<8x32xf32> -> vector<8x64xf32>
    %935 = arith.truncf %934 : vector<8x64xf32> to vector<8x64xbf16>
    %cst_179 = arith.constant dense<0.000000e+00> : vector<8x96xf32>
    %936 = tpu.matmul %935, %46, %cst_179 {dimension_numbers = #tpu.dot_dimension_numbers<[1], [0], [0], [1], [0, 0, 1, 1], [], []>} : vector<8x64xbf16>, vector<64x96xbf16>, vector<8x96xf32> -> vector<8x96xf32>
    %937 = arith.addf %936, %49 : vector<8x96xf32>
    %938 = arith.truncf %875 : vector<8x32xf32> to vector<8x32xbf16>
    %cst_180 = arith.constant dense<0.000000e+00> : vector<8x32xf32>
    %939 = tpu.matmul %938, %50, %cst_180 {dimension_numbers = #tpu.dot_dimension_numbers<[1], [0], [0], [1], [0, 0, 1, 1], [], []>} : vector<8x32xbf16>, vector<32x32xbf16>, vector<8x32xf32> -> vector<8x32xf32>
    %940 = arith.addf %939, %53 : vector<8x32xf32>
    %941 = vector.extract_strided_slice %937 {offsets = [0, 0], sizes = [8, 32], strides = [1, 1]} : vector<8x96xf32> to vector<8x32xf32>
    %942 = arith.negf %941 : vector<8x32xf32>
    %943 = math.exp %942 : vector<8x32xf32>
    %cst_181 = arith.constant 1.000000e+00 : f32
    %944 = vector.broadcast %cst_181 : f32 to vector<8x32xf32>
    %945 = arith.addf %944, %943 : vector<8x32xf32>
    %946 = arith.divf %944, %945 : vector<8x32xf32>
    %947 = vector.extract_strided_slice %937 {offsets = [0, 32], sizes = [8, 32], strides = [1, 1]} : vector<8x96xf32> to vector<8x32xf32>
    %948 = arith.negf %947 : vector<8x32xf32>
    %949 = math.exp %948 : vector<8x32xf32>
    %cst_182 = arith.constant 1.000000e+00 : f32
    %950 = vector.broadcast %cst_182 : f32 to vector<8x32xf32>
    %951 = arith.addf %950, %949 : vector<8x32xf32>
    %952 = arith.divf %950, %951 : vector<8x32xf32>
    %953 = vector.extract_strided_slice %937 {offsets = [0, 64], sizes = [8, 32], strides = [1, 1]} : vector<8x96xf32> to vector<8x32xf32>
    %954 = arith.mulf %946, %940 : vector<8x32xf32>
    %955 = arith.addf %953, %954 : vector<8x32xf32>
    %956 = math.tanh %955 : vector<8x32xf32>
    %cst_183 = arith.constant 1.000000e+00 : f32
    %957 = vector.broadcast %cst_183 : f32 to vector<8x32xf32>
    %958 = arith.subf %957, %952 : vector<8x32xf32>
    %959 = arith.mulf %958, %956 : vector<8x32xf32>
    %960 = arith.mulf %952, %875 : vector<8x32xf32>
    %961 = arith.addf %959, %960 : vector<8x32xf32>
    %962 = tpu.concatenate %961, %903 in 1 : vector<8x32xf32>, vector<8x32xf32> -> vector<8x64xf32>
    %963 = arith.truncf %962 : vector<8x64xf32> to vector<8x64xbf16>
    %cst_184 = arith.constant dense<0.000000e+00> : vector<8x96xf32>
    %964 = tpu.matmul %963, %54, %cst_184 {dimension_numbers = #tpu.dot_dimension_numbers<[1], [0], [0], [1], [0, 0, 1, 1], [], []>} : vector<8x64xbf16>, vector<64x96xbf16>, vector<8x96xf32> -> vector<8x96xf32>
    %965 = arith.addf %964, %57 : vector<8x96xf32>
    %966 = arith.truncf %903 : vector<8x32xf32> to vector<8x32xbf16>
    %cst_185 = arith.constant dense<0.000000e+00> : vector<8x32xf32>
    %967 = tpu.matmul %966, %58, %cst_185 {dimension_numbers = #tpu.dot_dimension_numbers<[1], [0], [0], [1], [0, 0, 1, 1], [], []>} : vector<8x32xbf16>, vector<32x32xbf16>, vector<8x32xf32> -> vector<8x32xf32>
    %968 = arith.addf %967, %61 : vector<8x32xf32>
    %969 = vector.extract_strided_slice %965 {offsets = [0, 0], sizes = [8, 32], strides = [1, 1]} : vector<8x96xf32> to vector<8x32xf32>
    %970 = arith.negf %969 : vector<8x32xf32>
    %971 = math.exp %970 : vector<8x32xf32>
    %cst_186 = arith.constant 1.000000e+00 : f32
    %972 = vector.broadcast %cst_186 : f32 to vector<8x32xf32>
    %973 = arith.addf %972, %971 : vector<8x32xf32>
    %974 = arith.divf %972, %973 : vector<8x32xf32>
    %975 = vector.extract_strided_slice %965 {offsets = [0, 32], sizes = [8, 32], strides = [1, 1]} : vector<8x96xf32> to vector<8x32xf32>
    %976 = arith.negf %975 : vector<8x32xf32>
    %977 = math.exp %976 : vector<8x32xf32>
    %cst_187 = arith.constant 1.000000e+00 : f32
    %978 = vector.broadcast %cst_187 : f32 to vector<8x32xf32>
    %979 = arith.addf %978, %977 : vector<8x32xf32>
    %980 = arith.divf %978, %979 : vector<8x32xf32>
    %981 = vector.extract_strided_slice %965 {offsets = [0, 64], sizes = [8, 32], strides = [1, 1]} : vector<8x96xf32> to vector<8x32xf32>
    %982 = arith.mulf %974, %968 : vector<8x32xf32>
    %983 = arith.addf %981, %982 : vector<8x32xf32>
    %984 = math.tanh %983 : vector<8x32xf32>
    %cst_188 = arith.constant 1.000000e+00 : f32
    %985 = vector.broadcast %cst_188 : f32 to vector<8x32xf32>
    %986 = arith.subf %985, %980 : vector<8x32xf32>
    %987 = arith.mulf %986, %984 : vector<8x32xf32>
    %988 = arith.mulf %980, %903 : vector<8x32xf32>
    %989 = arith.addf %987, %988 : vector<8x32xf32>
    %990 = tpu.concatenate %989, %931 in 1 : vector<8x32xf32>, vector<8x32xf32> -> vector<8x64xf32>
    %991 = arith.truncf %990 : vector<8x64xf32> to vector<8x64xbf16>
    %cst_189 = arith.constant dense<0.000000e+00> : vector<8x96xf32>
    %992 = tpu.matmul %991, %62, %cst_189 {dimension_numbers = #tpu.dot_dimension_numbers<[1], [0], [0], [1], [0, 0, 1, 1], [], []>} : vector<8x64xbf16>, vector<64x96xbf16>, vector<8x96xf32> -> vector<8x96xf32>
    %993 = arith.addf %992, %65 : vector<8x96xf32>
    %994 = arith.truncf %931 : vector<8x32xf32> to vector<8x32xbf16>
    %cst_190 = arith.constant dense<0.000000e+00> : vector<8x32xf32>
    %995 = tpu.matmul %994, %66, %cst_190 {dimension_numbers = #tpu.dot_dimension_numbers<[1], [0], [0], [1], [0, 0, 1, 1], [], []>} : vector<8x32xbf16>, vector<32x32xbf16>, vector<8x32xf32> -> vector<8x32xf32>
    %996 = arith.addf %995, %69 : vector<8x32xf32>
    %997 = vector.extract_strided_slice %993 {offsets = [0, 0], sizes = [8, 32], strides = [1, 1]} : vector<8x96xf32> to vector<8x32xf32>
    %998 = arith.negf %997 : vector<8x32xf32>
    %999 = math.exp %998 : vector<8x32xf32>
    %cst_191 = arith.constant 1.000000e+00 : f32
    %1000 = vector.broadcast %cst_191 : f32 to vector<8x32xf32>
    %1001 = arith.addf %1000, %999 : vector<8x32xf32>
    %1002 = arith.divf %1000, %1001 : vector<8x32xf32>
    %1003 = vector.extract_strided_slice %993 {offsets = [0, 32], sizes = [8, 32], strides = [1, 1]} : vector<8x96xf32> to vector<8x32xf32>
    %1004 = arith.negf %1003 : vector<8x32xf32>
    %1005 = math.exp %1004 : vector<8x32xf32>
    %cst_192 = arith.constant 1.000000e+00 : f32
    %1006 = vector.broadcast %cst_192 : f32 to vector<8x32xf32>
    %1007 = arith.addf %1006, %1005 : vector<8x32xf32>
    %1008 = arith.divf %1006, %1007 : vector<8x32xf32>
    %1009 = vector.extract_strided_slice %993 {offsets = [0, 64], sizes = [8, 32], strides = [1, 1]} : vector<8x96xf32> to vector<8x32xf32>
    %1010 = arith.mulf %1002, %996 : vector<8x32xf32>
    %1011 = arith.addf %1009, %1010 : vector<8x32xf32>
    %1012 = math.tanh %1011 : vector<8x32xf32>
    %cst_193 = arith.constant 1.000000e+00 : f32
    %1013 = vector.broadcast %cst_193 : f32 to vector<8x32xf32>
    %1014 = arith.subf %1013, %1008 : vector<8x32xf32>
    %1015 = arith.mulf %1014, %1012 : vector<8x32xf32>
    %1016 = arith.mulf %1008, %931 : vector<8x32xf32>
    %1017 = arith.addf %1015, %1016 : vector<8x32xf32>
    %cst_194 = arith.constant 0.000000e+00 : f32
    %1018 = vector.broadcast %cst_194 : f32 to vector<8x32xf32>
    %1019 = arith.maximumf %1017, %1018 : vector<8x32xf32>
    %1020 = tpu.concatenate %1019, %961 in 1 : vector<8x32xf32>, vector<8x32xf32> -> vector<8x64xf32>
    %1021 = arith.truncf %1020 : vector<8x64xf32> to vector<8x64xbf16>
    %cst_195 = arith.constant dense<0.000000e+00> : vector<8x96xf32>
    %1022 = tpu.matmul %1021, %46, %cst_195 {dimension_numbers = #tpu.dot_dimension_numbers<[1], [0], [0], [1], [0, 0, 1, 1], [], []>} : vector<8x64xbf16>, vector<64x96xbf16>, vector<8x96xf32> -> vector<8x96xf32>
    %1023 = arith.addf %1022, %49 : vector<8x96xf32>
    %1024 = arith.truncf %961 : vector<8x32xf32> to vector<8x32xbf16>
    %cst_196 = arith.constant dense<0.000000e+00> : vector<8x32xf32>
    %1025 = tpu.matmul %1024, %50, %cst_196 {dimension_numbers = #tpu.dot_dimension_numbers<[1], [0], [0], [1], [0, 0, 1, 1], [], []>} : vector<8x32xbf16>, vector<32x32xbf16>, vector<8x32xf32> -> vector<8x32xf32>
    %1026 = arith.addf %1025, %53 : vector<8x32xf32>
    %1027 = vector.extract_strided_slice %1023 {offsets = [0, 0], sizes = [8, 32], strides = [1, 1]} : vector<8x96xf32> to vector<8x32xf32>
    %1028 = arith.negf %1027 : vector<8x32xf32>
    %1029 = math.exp %1028 : vector<8x32xf32>
    %cst_197 = arith.constant 1.000000e+00 : f32
    %1030 = vector.broadcast %cst_197 : f32 to vector<8x32xf32>
    %1031 = arith.addf %1030, %1029 : vector<8x32xf32>
    %1032 = arith.divf %1030, %1031 : vector<8x32xf32>
    %1033 = vector.extract_strided_slice %1023 {offsets = [0, 32], sizes = [8, 32], strides = [1, 1]} : vector<8x96xf32> to vector<8x32xf32>
    %1034 = arith.negf %1033 : vector<8x32xf32>
    %1035 = math.exp %1034 : vector<8x32xf32>
    %cst_198 = arith.constant 1.000000e+00 : f32
    %1036 = vector.broadcast %cst_198 : f32 to vector<8x32xf32>
    %1037 = arith.addf %1036, %1035 : vector<8x32xf32>
    %1038 = arith.divf %1036, %1037 : vector<8x32xf32>
    %1039 = vector.extract_strided_slice %1023 {offsets = [0, 64], sizes = [8, 32], strides = [1, 1]} : vector<8x96xf32> to vector<8x32xf32>
    %1040 = arith.mulf %1032, %1026 : vector<8x32xf32>
    %1041 = arith.addf %1039, %1040 : vector<8x32xf32>
    %1042 = math.tanh %1041 : vector<8x32xf32>
    %cst_199 = arith.constant 1.000000e+00 : f32
    %1043 = vector.broadcast %cst_199 : f32 to vector<8x32xf32>
    %1044 = arith.subf %1043, %1038 : vector<8x32xf32>
    %1045 = arith.mulf %1044, %1042 : vector<8x32xf32>
    %1046 = arith.mulf %1038, %961 : vector<8x32xf32>
    %1047 = arith.addf %1045, %1046 : vector<8x32xf32>
    %1048 = tpu.concatenate %1047, %989 in 1 : vector<8x32xf32>, vector<8x32xf32> -> vector<8x64xf32>
    %1049 = arith.truncf %1048 : vector<8x64xf32> to vector<8x64xbf16>
    %cst_200 = arith.constant dense<0.000000e+00> : vector<8x96xf32>
    %1050 = tpu.matmul %1049, %54, %cst_200 {dimension_numbers = #tpu.dot_dimension_numbers<[1], [0], [0], [1], [0, 0, 1, 1], [], []>} : vector<8x64xbf16>, vector<64x96xbf16>, vector<8x96xf32> -> vector<8x96xf32>
    %1051 = arith.addf %1050, %57 : vector<8x96xf32>
    %1052 = arith.truncf %989 : vector<8x32xf32> to vector<8x32xbf16>
    %cst_201 = arith.constant dense<0.000000e+00> : vector<8x32xf32>
    %1053 = tpu.matmul %1052, %58, %cst_201 {dimension_numbers = #tpu.dot_dimension_numbers<[1], [0], [0], [1], [0, 0, 1, 1], [], []>} : vector<8x32xbf16>, vector<32x32xbf16>, vector<8x32xf32> -> vector<8x32xf32>
    %1054 = arith.addf %1053, %61 : vector<8x32xf32>
    %1055 = vector.extract_strided_slice %1051 {offsets = [0, 0], sizes = [8, 32], strides = [1, 1]} : vector<8x96xf32> to vector<8x32xf32>
    %1056 = arith.negf %1055 : vector<8x32xf32>
    %1057 = math.exp %1056 : vector<8x32xf32>
    %cst_202 = arith.constant 1.000000e+00 : f32
    %1058 = vector.broadcast %cst_202 : f32 to vector<8x32xf32>
    %1059 = arith.addf %1058, %1057 : vector<8x32xf32>
    %1060 = arith.divf %1058, %1059 : vector<8x32xf32>
    %1061 = vector.extract_strided_slice %1051 {offsets = [0, 32], sizes = [8, 32], strides = [1, 1]} : vector<8x96xf32> to vector<8x32xf32>
    %1062 = arith.negf %1061 : vector<8x32xf32>
    %1063 = math.exp %1062 : vector<8x32xf32>
    %cst_203 = arith.constant 1.000000e+00 : f32
    %1064 = vector.broadcast %cst_203 : f32 to vector<8x32xf32>
    %1065 = arith.addf %1064, %1063 : vector<8x32xf32>
    %1066 = arith.divf %1064, %1065 : vector<8x32xf32>
    %1067 = vector.extract_strided_slice %1051 {offsets = [0, 64], sizes = [8, 32], strides = [1, 1]} : vector<8x96xf32> to vector<8x32xf32>
    %1068 = arith.mulf %1060, %1054 : vector<8x32xf32>
    %1069 = arith.addf %1067, %1068 : vector<8x32xf32>
    %1070 = math.tanh %1069 : vector<8x32xf32>
    %cst_204 = arith.constant 1.000000e+00 : f32
    %1071 = vector.broadcast %cst_204 : f32 to vector<8x32xf32>
    %1072 = arith.subf %1071, %1066 : vector<8x32xf32>
    %1073 = arith.mulf %1072, %1070 : vector<8x32xf32>
    %1074 = arith.mulf %1066, %989 : vector<8x32xf32>
    %1075 = arith.addf %1073, %1074 : vector<8x32xf32>
    %1076 = tpu.concatenate %1075, %1017 in 1 : vector<8x32xf32>, vector<8x32xf32> -> vector<8x64xf32>
    %1077 = arith.truncf %1076 : vector<8x64xf32> to vector<8x64xbf16>
    %cst_205 = arith.constant dense<0.000000e+00> : vector<8x96xf32>
    %1078 = tpu.matmul %1077, %62, %cst_205 {dimension_numbers = #tpu.dot_dimension_numbers<[1], [0], [0], [1], [0, 0, 1, 1], [], []>} : vector<8x64xbf16>, vector<64x96xbf16>, vector<8x96xf32> -> vector<8x96xf32>
    %1079 = arith.addf %1078, %65 : vector<8x96xf32>
    %1080 = arith.truncf %1017 : vector<8x32xf32> to vector<8x32xbf16>
    %cst_206 = arith.constant dense<0.000000e+00> : vector<8x32xf32>
    %1081 = tpu.matmul %1080, %66, %cst_206 {dimension_numbers = #tpu.dot_dimension_numbers<[1], [0], [0], [1], [0, 0, 1, 1], [], []>} : vector<8x32xbf16>, vector<32x32xbf16>, vector<8x32xf32> -> vector<8x32xf32>
    %1082 = arith.addf %1081, %69 : vector<8x32xf32>
    %1083 = vector.extract_strided_slice %1079 {offsets = [0, 0], sizes = [8, 32], strides = [1, 1]} : vector<8x96xf32> to vector<8x32xf32>
    %1084 = arith.negf %1083 : vector<8x32xf32>
    %1085 = math.exp %1084 : vector<8x32xf32>
    %cst_207 = arith.constant 1.000000e+00 : f32
    %1086 = vector.broadcast %cst_207 : f32 to vector<8x32xf32>
    %1087 = arith.addf %1086, %1085 : vector<8x32xf32>
    %1088 = arith.divf %1086, %1087 : vector<8x32xf32>
    %1089 = vector.extract_strided_slice %1079 {offsets = [0, 32], sizes = [8, 32], strides = [1, 1]} : vector<8x96xf32> to vector<8x32xf32>
    %1090 = arith.negf %1089 : vector<8x32xf32>
    %1091 = math.exp %1090 : vector<8x32xf32>
    %cst_208 = arith.constant 1.000000e+00 : f32
    %1092 = vector.broadcast %cst_208 : f32 to vector<8x32xf32>
    %1093 = arith.addf %1092, %1091 : vector<8x32xf32>
    %1094 = arith.divf %1092, %1093 : vector<8x32xf32>
    %1095 = vector.extract_strided_slice %1079 {offsets = [0, 64], sizes = [8, 32], strides = [1, 1]} : vector<8x96xf32> to vector<8x32xf32>
    %1096 = arith.mulf %1088, %1082 : vector<8x32xf32>
    %1097 = arith.addf %1095, %1096 : vector<8x32xf32>
    %1098 = math.tanh %1097 : vector<8x32xf32>
    %cst_209 = arith.constant 1.000000e+00 : f32
    %1099 = vector.broadcast %cst_209 : f32 to vector<8x32xf32>
    %1100 = arith.subf %1099, %1094 : vector<8x32xf32>
    %1101 = arith.mulf %1100, %1098 : vector<8x32xf32>
    %1102 = arith.mulf %1094, %1017 : vector<8x32xf32>
    %1103 = arith.addf %1101, %1102 : vector<8x32xf32>
    %cst_210 = arith.constant 0.000000e+00 : f32
    %1104 = vector.broadcast %cst_210 : f32 to vector<8x32xf32>
    %1105 = arith.maximumf %1103, %1104 : vector<8x32xf32>
    %1106 = tpu.concatenate %704, %732, %760 in 0 : vector<8x32xf32>, vector<8x32xf32>, vector<8x32xf32> -> vector<24x32xf32>
    %1107 = arith.truncf %1106 : vector<24x32xf32> to vector<24x32xbf16>
    %c544 = arith.constant 544 : index
    %c0_211 = arith.constant 0 : index
    %1108 = vector.load %arg2[%c544, %c0_211] : memref<608x128xbf16, #tpu.memory_space<vmem>>, vector<32x128xbf16>
    %cst_212 = arith.constant dense<0.000000e+00> : vector<24x128xf32>
    %1109 = tpu.matmul %1107, %1108, %cst_212 {dimension_numbers = #tpu.dot_dimension_numbers<[1], [0], [0], [1], [0, 0, 1, 1], [], []>} : vector<24x32xbf16>, vector<32x128xbf16>, vector<24x128xf32> -> vector<24x128xf32>
    %c112 = arith.constant 112 : index
    %c0_213 = arith.constant 0 : index
    %1110 = vector.load %arg3[%c112, %c0_213] : memref<128x128xf32, #tpu.memory_space<vmem>>, vector<1x128xf32>
    %1111 = vector.shape_cast %1110 : vector<1x128xf32> to vector<1x128xf32>
    %1112 = vector.broadcast %1111 : vector<1x128xf32> to vector<24x128xf32>
    %1113 = arith.addf %1109, %1112 : vector<24x128xf32>
    %1114 = tpu.concatenate %847, %933, %1019, %1105 in 0 : vector<8x32xf32>, vector<8x32xf32>, vector<8x32xf32>, vector<8x32xf32> -> vector<32x32xf32>
    %1115 = arith.truncf %1114 : vector<32x32xf32> to vector<32x32xbf16>
    %c576 = arith.constant 576 : index
    %c0_214 = arith.constant 0 : index
    %1116 = vector.load %arg2[%c576, %c0_214] : memref<608x128xbf16, #tpu.memory_space<vmem>>, vector<32x128xbf16>
    %cst_215 = arith.constant dense<0.000000e+00> : vector<32x128xf32>
    %1117 = tpu.matmul %1115, %1116, %cst_215 {dimension_numbers = #tpu.dot_dimension_numbers<[1], [0], [0], [1], [0, 0, 1, 1], [], []>} : vector<32x32xbf16>, vector<32x128xbf16>, vector<32x128xf32> -> vector<32x128xf32>
    %c120 = arith.constant 120 : index
    %c0_216 = arith.constant 0 : index
    %1118 = vector.load %arg3[%c120, %c0_216] : memref<128x128xf32, #tpu.memory_space<vmem>>, vector<1x128xf32>
    %1119 = vector.shape_cast %1118 : vector<1x128xf32> to vector<1x128xf32>
    %1120 = vector.broadcast %1119 : vector<1x128xf32> to vector<32x128xf32>
    %1121 = arith.addf %1117, %1120 : vector<32x128xf32>
    %c0_217 = arith.constant 0 : index
    %c0_218 = arith.constant 0 : index
    %1122 = vector.load %arg4[%c0_217, %c0_218] : memref<56x128xf32, #tpu.memory_space<vmem>>, vector<24x128xf32>
    tpu.vector_store %arg4[%c0_217, %c0_218], %1113 {strides = array<i32>} : memref<56x128xf32, #tpu.memory_space<vmem>>, vector<24x128xf32>,
    %c24_219 = arith.constant 24 : index
    %c0_220 = arith.constant 0 : index
    %1123 = vector.load %arg4[%c24_219, %c0_220] : memref<56x128xf32, #tpu.memory_space<vmem>>, vector<32x128xf32>
    tpu.vector_store %arg4[%c24_219, %c0_220], %1121 {strides = array<i32>} : memref<56x128xf32, #tpu.memory_space<vmem>>, vector<32x128xf32>,
    return
  }
  func.func @transform_0(%arg0: i32) -> (i32, i32) {
    %c0_i32 = arith.constant 0 : i32
    %c0_i32_0 = arith.constant 0 : i32
    return %arg0, %c0_i32 : i32, i32
  }
  func.func @transform_1(%arg0: i32) -> (i32, i32) {
    %c0_i32 = arith.constant 0 : i32
    %c0_i32_0 = arith.constant 0 : i32
    %c0_i32_1 = arith.constant 0 : i32
    return %c0_i32, %c0_i32_0 : i32, i32
  }
  func.func @transform_2(%arg0: i32) -> (i32, i32) {
    %c0_i32 = arith.constant 0 : i32
    %c0_i32_0 = arith.constant 0 : i32
    %c0_i32_1 = arith.constant 0 : i32
    return %c0_i32, %c0_i32_0 : i32, i32
  }
  func.func @transform_3(%arg0: i32) -> (i32, i32) {
    %c0_i32 = arith.constant 0 : i32
    %c0_i32_0 = arith.constant 0 : i32
    return %arg0, %c0_i32 : i32, i32
  }
}

</mosaic_0001>

<bundles_post_ra>
// kernel: tpu_custom_call.1
= control target key start
LH: loop header
LB: loop body
LE: loop exit
PB: predicated region body
PF: predicated region fallthrough
CT: control target
= control target key end

     0   :  { %8 = vsyncpa [#allocation3], 0  ;;  %s4937_s0 = inlined_call_operand.vmem [shape: f32[64,2], index: 0, kind: input, shape index: {}]   ;;  %s4938_s1 = inlined_call_operand.hbm [shape: bf16[608,128], index: 1, kind: input, shape index: {}]   ;;  %s4939_s2 = inlined_call_operand.hbm [shape: f32[128,128], index: 2, kind: input, shape index: {}]   ;;  %s4940_s3 = inlined_call_operand.hbm [shape: f32[56,128], index: 3, kind: output, shape index: {}]  }
   0x1   :  { %9 = vsyncpa [#allocation6], 0 }
   0x2   :  { %10 = vsyncpa [#allocation4], 0  ;;  %s17_s14 = sshll.u32 %s4938_s1, 4  ;;  %s3881_s15 = smov [#allocation2]   ;;  %s18_s14 = int_to_ptr.hbm [resolvable:$true] %s17_s14 }
   0x3   :  { %s19_s16 = sshll.u32 %s3881_s15, 4  ;;  %s30_s19 = sshll.u32 %s4939_s2, 4  ;;  %s20_s16 = int_to_ptr.vmem [resolvable:$true] %s19_s16  ;;  %s31_s19 = int_to_ptr.hbm [resolvable:$true] %s30_s19 }
   0x4   :  { %s3882_s20 = smov 64   ;;  %s3883_s21 = smov 4  }
   0x5   :  { %25 = dma.hbm_to_vmem [thread:$0]  %s18_s14, 4864, %s20_s16, [#allocation3], %s3882_s20, %s3882_s20, %s3883_s21  }
   0x6   :  { %s3884_s22 = smov [#allocation5]   ;;  %s3885_s24 = smov 128  }
   0x7   :  { %s32_s23 = sshll.u32 %s3884_s22, 4  ;;  %s3886_s25 = smov 8   ;;  %s33_s23 = int_to_ptr.vmem [resolvable:$true] %s32_s23 }
   0x8   :  { %38 = dma.hbm_to_vmem [thread:$0]  %s31_s19, 2048, %s33_s23, [#allocation6], %s3885_s24, %s3885_s24, %s3886_s25  }
   0x9   :  { %3875 = dma.done.wait [#allocation3], 4864  }
   0xa   :  { %3876 = vsyncadd [#allocation3], 4294962432 }
   0xb   :  { %3877 = dma.done.wait [#allocation6], 2048  }
   0xc   :  { %3878 = vsyncadd [#allocation6], 4294965248  ;;  %v3887_v0 = vmov 1   ;;  %v3888_v1 = vmov 0   ;;  %v48_v2 = vld [vmem:[%s4937_s0] sm:$0xff]  ;;  %v3928_v3 = vld [vmem:[#allocation2 + $0x18] sm:$0xff] }
   0xd   :  { %3537 = vset.pattern.permute.xlu1 %v3887_v0  ;;  %3536 = vset.pattern.permute.xlu0 %v3888_v1  ;;  %v3547_v4 = vld [vmem:[#allocation5 + $0x18] ss:$0 sm:$0xff]  ;;  %v3931_v5 = vld [vmem:[#allocation2 + $0x10] sm:$0xff]  ;;  %v3488_v8 = vld [vmem:[#allocation2] sm:$0xff]  ;;  %vm195_vm0 = vcmask 261120   ;;  %s3889_s28 = smov 96  }
   0xe   :  { %3539 = vset.pattern.permute.xlu2 %v3888_v1  ;;  %117 = vperm.xlu1 %3537, %v48_v2   ;;  %v49_v6 = vld [vmem:[%s4937_s0 + $0x8] sm:$0xff]  ;;  %v56_v9 = vld [vmem:[#allocation5] sm:$0x3]  ;;  %v3945_v14 = vld [vmem:[#allocation5 + $0x8] ss:$0 sm:$0xff]  ;;  %vm425_vm5 = vcmask 523264  }
   0xf   :  { %61 = vperm.xlu0 %3536, %v48_v2   ;;  %344 = vmatpush.bf16.msra.mxu2 %v3928_v3  ;;  %v3489_v7 = vld [vmem:[#allocation2 + $0x8] sm:$0xff]  ;;  %v3941_v10 = vperm.slane %v56_v9, 0  ;;  %v3943_v13 = vperm.slane %v56_v9, 1  ;;  %v3958_v32 = vld [vmem:[#allocation5 + $0x10] ss:$0 sm:$0xff]  ;;  %v3963_v54 = vld [vmem:[#allocation2 + $0x38] sm:$0xff] }
  0x10   :  { %372 = vrot.lane.b32.xlu2 %v3547_v4, %s3882_s20  ;;  %214 = vmatpush.bf16.msra.mxu0 %v3489_v7  ;;  %v3966_v55 = vld [vmem:[#allocation2 + $0x30] sm:$0xff]  ;;  %v3970_v56 = vld [vmem:[#allocation2 + $0x28] sm:$0xff]  ;;  %v3982_v63 = vld [vmem:[#allocation2 + $0x20] sm:$0xff]  ;;  %s3217_s17 = sshll.u32 %s4940_s3, 4  ;;  %s3218_s17 = int_to_ptr.hbm [resolvable:$true] %s3217_s17 }
  0x11   :  { %v3988_v2 = vld [vmem:[#allocation2 + $0x48] sm:$0xff]  ;;  %v3993_v4 = vld [vmem:[#allocation2 + $0x40] sm:$0xff] }
  0x12   :  { %460 = vmatpush.bf16.msra.mxu3 %v3988_v2 }
  0x13   :  { %345 = vmatpush.bf16.msra.mxu2 %v3931_v5 }
  0x14   :  { %215 = vmatpush.bf16.msra.mxu0 %v3488_v8 }
  0x16   :  { %121 = vperm.xlu1 %3537, %v49_v6   ;;  %346 = vmatmul.bf16.vlgmr.msra.gmra.mxu2 %v3888_v1 }
  0x17   :  { %66 = vperm.xlu0 %3536, %v49_v6   ;;  %433 = vmatpush.bf16.msrb.mxu2 %v3963_v54 }
  0x18   :  { %1103 = vmatpush.bf16.msrb.mxu0 %v3963_v54  ;;  %461 = vmatpush.bf16.msra.mxu3 %v3993_v4 }
  0x1b   :  { %434 = vmatpush.bf16.msrb.mxu2 %v3966_v55  ;;  %462 = vmatmul.bf16.vlgmr.msra.gmra.mxu3 %v3888_v1 }
  0x1c   :  { %1104 = vmatpush.bf16.msrb.mxu0 %v3966_v55 }
  0x1e   :  { %3538 = vset.pattern.permute.xlu1 %v3888_v1 }
  0x1f   :  { %3540 = vset.pattern.permute.xlu0 %v3887_v0  ;;  %435 = vmatpush.bf16.msrb.mxu2 %v3970_v56 }
  0x20   :  { %1105 = vmatpush.bf16.msrb.mxu0 %v3970_v56 }
  0x23   :  { %436 = vmatpush.bf16.msrb.mxu2 %v3982_v63 }
  0x24   :  { %1106 = vmatpush.bf16.msrb.mxu0 %v3982_v63 }
  0x27   :  { %619 = vmatpush.bf16.msra.mxu2 %v3928_v3 }
  0x2b   :  { %620 = vmatpush.bf16.msra.mxu2 %v3931_v5 }
  0x6a   :  { %v3954_v28 = vpop.permute.xlu2 %372 }
  0x80   :  { %v118_v11 = vpop.permute.xlu1 %117 }
  0x81   :  { %v62_v12 = vpop.permute.xlu0 %61  ;;  %v149_v16 = vmul.f32 %v3943_v13, %v118_v11 }
  0x82   :  { %v100_v15 = vmul.f32 %v3941_v10, %v62_v12  ;;  %v4000_v12 = vld [vmem:[#allocation5 + $0x20] ss:$0 sm:$0xff] }
  0x84   :  { %v108_v17 = vadd.f32 %v3945_v14, %v100_v15 }
  0x86   :  { %v157_v21 = vadd.f32 %v149_v16, %v108_v17 }
  0x88   :  { %v122_v18 = vpop.permute.xlu1 %121  ;;  %v165_v25 = vmax.f32 %v157_v21, 0.0 }
  0x89   :  { %v67_v19 = vpop.permute.xlu0 %66  ;;  %v150_v22 = vmul.f32 %v3943_v13, %v122_v18 }
  0x8a   :  { %v101_v20 = vmul.f32 %v3941_v10, %v67_v19 }
  0x8c   :  { %v109_v23 = vadd.f32 %v3945_v14, %v101_v20 }
  0x8e   :  { %v158_v24 = vadd.f32 %v150_v22, %v109_v23 }
  0x90   :  { %v166_v26 = vmax.f32 %v158_v24, 0.0 }
  0x92   :  { %v173_v27 = vpack.c.bf16 %v166_v26, %v165_v25  ;;  %v4003_v25 = vld [vmem:[#allocation5 + $0x28] ss:$0 sm:$0xff] }
  0x94   :  { %3239 = vmatmul.msk.bf16.vlgmr.msra.gmra.mxu0 %vm195_vm0, %v173_v27 }
  0x95   :  { %1255 = vmatpush.bf16.msra.mxu0 %v3928_v3 }
  0x99   :  { %v347_v29 = vpop.f32.mrf.mxu2  ;;  %1256 = vmatpush.bf16.msra.mxu0 %v3931_v5 }
  0x9a   :  { %v375_v30 = vadd.f32 %v3954_v28, %v347_v29 }
  0x9c   :  { %377 = vrot.lane.b32.xlu2 %v375_v30, %s3882_s20 }
  0x9e   :  { %v463_v11 = vpop.f32.mrf.mxu3 }
  0xa1   :  { %v349_v31 = vpop.f32.mrf.mxu2 }
  0xa6   :  { %v465_v18 = vpop.f32.mrf.mxu3 }
  0xf6   :  { %v378_v46 = vpop.permute.xlu2 %377 }
 0x111   :  { %v217_v33 = vpop.f32.mrf.mxu0 }
 0x112   :  { %v218_v34 = vadd.f32 %v3958_v32, %v217_v33  ;;  %v464_v33 = vadd.f32 %v4003_v25, %v463_v11  ;;  %v4017_v11 = vld [vmem:[#allocation2 + $0x70] sm:$0xff] }
 0x114   :  { %v351_v35 = vadd.f32 %v347_v29, %v218_v34 }
 0x116   :  { %v3251_v36 = vmul.f32 -1.442695, %v351_v35 }
 0x118   :  { %3562 = vpow2.f32 %v3251_v36 }
 0x11e   :  { %v3563_v37 = vpop.eup %3562 }
 0x11f   :  { %v355_v38 = vadd.f32 1.0, %v3563_v37 }
 0x121   :  { %3564 = vrcp.f32 %v355_v38  ;;  %v367_v42 = vand.u32 2147483648, %v355_v38  ;;  %v365_v44 = vand.u32 2147483647, %v355_v38  ;;  %vm361_vm2 = vweird.f32 %v355_v38 }
 0x123   :  { %v368_v47 = vor.u32 1.1754944e-38, %v367_v42  ;;  %vm366_vm4 = vcmp.eq.f32.partialorder %v365_v44, 8.507059e+37 }
 0x127   :  { %v3565_v39 = vpop.eup %3564 }
 0x128   :  { %v357_v40 = vmul.f32 %v3565_v39, %v355_v38  ;;  %vm362_vm1 = vweird.f32 %v3565_v39 }
 0x129   :  { %vm363_vm3 = vmor %vm361_vm2, %vm362_vm1 }
 0x12a   :  { %v358_v41 = vsub.f32 1.0, %v357_v40  ;;  %v219_v40 = vpop.f32.mrf.mxu0 }
 0x12c   :  { %v359_v43 = vmul.f32 %v3565_v39, %v358_v41  ;;  %v220_v41 = vadd.f32 %v3958_v32, %v219_v40 }
 0x12e   :  { %v360_v45 = vadd.f32 %v3565_v39, %v359_v43 }
 0x130   :  { %v364_v48 = vsel %vm363_vm3, %v3565_v39, %v360_v45 }
 0x131   :  { %v369_v49 = vsel %vm366_vm4, %v368_v47, %v364_v48 }
 0x132   :  { %v380_v50 = vmul.f32 %v378_v46, %v369_v49  ;;  %v387_v57 = vsub.f32 1.0, %v369_v49  ;;  %v393_v59 = vmul.f32 0.0, %v369_v49 }
 0x134   :  { %382 = vrot.lane.b32.xlu0 %v380_v50, %s3882_s20 }
 0x1a6   :  { %v383_v51 = vpop.permute.xlu0 %382 }
 0x1a7   :  { %v385_v52 = vadd.f32 %v383_v51, %v218_v34 }
 0x1a9   :  { %3566 = vtanh.f32 %v385_v52 }
 0x1af   :  { %v3567_v53 = vpop.eup %3566 }
 0x1b0   :  { %389 = vrot.lane.b32.xlu1 %v3567_v53, %s3889_s28 }
 0x222   :  { %v390_v58 = vpop.permute.xlu1 %389 }
 0x223   :  { %v392_v60 = vmul.f32 %v390_v58, %v387_v57 }
 0x225   :  { %v3975_v61 = vadd.f32 %v393_v59, %v392_v60 }
 0x227   :  { %396 = vrot.lane.b32.xlu2 %v3975_v61, %s3889_s28  ;;  %v606_v62 = vpack.c.bf16 %v3975_v61, %v3975_v61 }
 0x229   :  { %608 = vrot.lane.b32.xlu0 %v606_v62, %s3889_s28 }
 0x281   :  { %v397_v6 = vpop.permute.xlu2 %396 }
 0x282   :  { %v399_v7 = vsel %vm195_vm0, %v397_v6, 0.0 }
 0x283   :  { %v400_v8 = vpack.c.bf16 %v399_v7, %v399_v7 }
 0x285   :  { %3268 = vmatmul.msk.bf16.vlgmr.msrb.gmra.mxu2 %vm425_vm5, %v400_v8  ;;  %v4012_v8 = vld [vmem:[#allocation2 + $0x78] sm:$0xff] }
 0x286   :  { %565 = vmatpush.bf16.msrb.mxu3 %v4012_v8 }
 0x28a   :  { %566 = vmatpush.bf16.msrb.mxu3 %v4017_v11 }
 0x28d   :  { %567 = vmatmul.bf16.vlgmr.msrb.gmra.mxu3 %v3888_v1 }
 0x28e   :  { %701 = vmatpush.bf16.msra.mxu3 %v3988_v2 }
 0x292   :  { %702 = vmatpush.bf16.msra.mxu3 %v3993_v4 }
 0x296   :  { %831 = vmatpush.bf16.msrb.mxu3 %v3928_v3 }
 0x29a   :  { %832 = vmatpush.bf16.msrb.mxu3 %v3931_v5 }
 0x29b   :  { %v609_v9 = vpop.permute.xlu0 %608 }
 0x29c   :  { %3304 = vmatmul.msk.bf16.vlgmr.msra.gmra.mxu2 %vm195_vm0, %v609_v9  ;;  %v4014_v9 = vld [vmem:[#allocation2 + $0x68] sm:$0xff] }
 0x29d   :  { %538 = vmatpush.bf16.msra.mxu1 %v4014_v9  ;;  %755 = vmatpush.bf16.msrb.mxu2 %v4014_v9 }
 0x308   :  { %v438_v15 = vpop.f32.mrf.mxu2 }
 0x309   :  { %v439_v16 = vadd.f32 %v4000_v12, %v438_v15 }
 0x30b   :  { %v3277_v17 = vmul.f32 -1.442695, %v439_v16 }
 0x30d   :  { %3568 = vpow2.f32 %v3277_v17 }
 0x310   :  { %v440_v19 = vpop.f32.mrf.mxu2 }
 0x313   :  { %v3569_v20 = vpop.eup %3568 }
 0x314   :  { %v470_v21 = vadd.f32 1.0, %v3569_v20 }
 0x316   :  { %3570 = vrcp.f32 %v470_v21  ;;  %v482_v29 = vand.u32 2147483648, %v470_v21  ;;  %v480_v31 = vand.u32 2147483647, %v470_v21  ;;  %vm476_vm7 = vweird.f32 %v470_v21 }
 0x318   :  { %v483_v35 = vor.u32 1.1754944e-38, %v482_v29  ;;  %vm481_vm9 = vcmp.eq.f32.partialorder %v480_v31, 8.507059e+37  ;;  %v4046_v29 = vld [vmem:[#allocation2 + $0x50] sm:$0xff] }
 0x31c   :  { %v3571_v22 = vpop.eup %3570 }
 0x31d   :  { %v472_v23 = vmul.f32 %v3571_v22, %v470_v21  ;;  %vm477_vm6 = vweird.f32 %v3571_v22 }
 0x31e   :  { %vm478_vm8 = vmor %vm476_vm7, %vm477_vm6 }
 0x31f   :  { %v622_v24 = vpop.f32.mrf.mxu2  ;;  %v473_v26 = vsub.f32 1.0, %v472_v23 }
 0x320   :  { %v646_v27 = vadd.f32 %v622_v24, %v3954_v28  ;;  %v626_v42 = vadd.f32 %v622_v24, %v220_v41  ;;  %v4035_v24 = vld [vmem:[#allocation2 + $0x60] sm:$0xff] }
 0x321   :  { %v474_v30 = vmul.f32 %v3571_v22, %v473_v26  ;;  %539 = vmatpush.bf16.msra.mxu1 %v4035_v24  ;;  %756 = vmatpush.bf16.msrb.mxu2 %v4035_v24  ;;  %v4039_v26 = vld [vmem:[#allocation2 + $0x58] sm:$0xff] }
 0x322   :  { %648 = vrot.lane.b32.xlu1 %v646_v27, %s3882_s20  ;;  %v3305_v43 = vmul.f32 -1.442695, %v626_v42  ;;  %v50_v27 = vld [vmem:[%s4937_s0 + $0x10] sm:$0xff] }
 0x323   :  { %v475_v34 = vadd.f32 %v3571_v22, %v474_v30  ;;  %v51_v30 = vld [vmem:[%s4937_s0 + $0x18] sm:$0xff] }
 0x324   :  { %3572 = vpow2.f32 %v3305_v43 }
 0x325   :  { %v479_v36 = vsel %vm478_vm8, %v3571_v22, %v475_v34  ;;  %540 = vmatpush.bf16.msra.mxu1 %v4039_v26  ;;  %757 = vmatpush.bf16.msrb.mxu2 %v4039_v26 }
 0x326   :  { %v484_v37 = vsel %vm481_vm9, %v483_v35, %v479_v36 }
 0x327   :  { %v624_v38 = vpop.f32.mrf.mxu2  ;;  %v486_v39 = vmul.f32 %v484_v37, %v464_v33  ;;  %v493_v15 = vsub.f32 1.0, %v484_v37  ;;  %v499_v17 = vmul.f32 0.0, %v484_v37 }
 0x329   :  { %488 = vrot.lane.b32.xlu2 %v486_v39, %s3882_s20  ;;  %541 = vmatpush.bf16.msra.mxu1 %v4046_v29 }
 0x32a   :  { %v3573_v44 = vpop.eup %3572  ;;  %758 = vmatpush.bf16.msrb.mxu2 %v4046_v29 }
 0x32b   :  { %v630_v45 = vadd.f32 1.0, %v3573_v44 }
 0x32d   :  { %3574 = vrcp.f32 %v630_v45  ;;  %v642_v57 = vand.u32 2147483648, %v630_v45  ;;  %vm636_vm11 = vweird.f32 %v630_v45  ;;  %v640_v58 = vand.u32 2147483647, %v630_v45  ;;  %679 = vmatpush.bf16.msrb.mxu1 %v3963_v54 }
 0x32e   :  { %891 = vmatpush.bf16.msra.mxu2 %v3963_v54 }
 0x32f   :  { %v643_v60 = vor.u32 1.1754944e-38, %v642_v57  ;;  %vm641_vm13 = vcmp.eq.f32.partialorder %v640_v58, 8.507059e+37 }
 0x331   :  { %680 = vmatpush.bf16.msrb.mxu1 %v3966_v55 }
 0x332   :  { %892 = vmatpush.bf16.msra.mxu2 %v3966_v55 }
 0x333   :  { %v3575_v46 = vpop.eup %3574 }
 0x334   :  { %v632_v47 = vmul.f32 %v3575_v46, %v630_v45  ;;  %vm637_vm10 = vweird.f32 %v3575_v46 }
 0x335   :  { %vm638_vm12 = vmor %vm636_vm11, %vm637_vm10  ;;  %681 = vmatpush.bf16.msrb.mxu1 %v3970_v56 }
 0x336   :  { %v633_v50 = vsub.f32 1.0, %v632_v47  ;;  %893 = vmatpush.bf16.msra.mxu2 %v3970_v56 }
 0x338   :  { %v634_v51 = vmul.f32 %v3575_v46, %v633_v50 }
 0x339   :  { %682 = vmatpush.bf16.msrb.mxu1 %v3982_v63 }
 0x33a   :  { %v635_v53 = vadd.f32 %v3575_v46, %v634_v51  ;;  %894 = vmatpush.bf16.msra.mxu2 %v3982_v63 }
 0x33c   :  { %v639_v59 = vsel %vm638_vm12, %v3575_v46, %v635_v53 }
 0x33d   :  { %v644_v6 = vsel %vm641_vm13, %v643_v60, %v639_v59  ;;  %v4094_v60 = vld [vmem:[#allocation5 + $0x30] ss:$0 sm:$0xff] }
 0x33e   :  { %v658_v54 = vsub.f32 1.0, %v644_v6  ;;  %v664_v33 = vmul.f32 %v644_v6, %v3975_v61  ;;  %v568_v61 = vpop.f32.mrf.mxu3 }
 0x383   :  { %v489_v48 = vpop.permute.xlu2 %488 }
 0x384   :  { %v491_v49 = vadd.f32 %v489_v48, %v439_v16 }
 0x386   :  { %3576 = vtanh.f32 %v491_v49 }
 0x38c   :  { %v3577_v52 = vpop.eup %3576 }
 0x38d   :  { %495 = vrot.lane.b32.xlu1 %v3577_v52, %s3889_s28 }
 0x394   :  { %v649_v62 = vpop.permute.xlu1 %648 }
 0x395   :  { %v651_v7 = vmul.f32 %v649_v62, %v644_v6 }
 0x397   :  { %653 = vrot.lane.b32.xlu0 %v651_v7, %s3882_s20 }
 0x3ff   :  { %v496_v16 = vpop.permute.xlu1 %495 }
 0x400   :  { %v498_v18 = vmul.f32 %v496_v16, %v493_v15 }
 0x402   :  { %v4026_v19 = vadd.f32 %v499_v17, %v498_v18 }
 0x404   :  { %502 = vrot.lane.b32.xlu0 %v4026_v19, %s3889_s28  ;;  %v688_v20 = vpack.c.bf16 %v4026_v19, %v4026_v19 }
 0x406   :  { %690 = vrot.lane.b32.xlu1 %v688_v20, %s3889_s28 }
 0x409   :  { %v654_v21 = vpop.permute.xlu0 %653 }
 0x40a   :  { %v656_v22 = vadd.f32 %v654_v21, %v220_v41  ;;  %v570_v41 = vpop.f32.mrf.mxu3 }
 0x40c   :  { %3578 = vtanh.f32 %v656_v22 }
 0x40e   :  { %71 = vperm.xlu1 %3538, %v50_v27  }
 0x412   :  { %v3579_v23 = vpop.eup %3578 }
 0x413   :  { %660 = vrot.lane.b32.xlu2 %v3579_v23, %s3889_s28  ;;  %v4098_v23 = vld [vmem:[#allocation5 + $0x38] ss:$0 sm:$0xff] }
 0x416   :  { %3541 = vset.pattern.permute.xlu1 %v3887_v0 }
 0x417   :  { %129 = vperm.xlu1 %3541, %v51_v30  }
 0x41f   :  { %3542 = vset.pattern.permute.xlu1 %v3888_v1 }
 0x46d   :  { %v661_v31 = vpop.permute.xlu2 %660 }
 0x46e   :  { %v663_v34 = vmul.f32 %v661_v31, %v658_v54 }
 0x470   :  { %v4064_v35 = vadd.f32 %v664_v33, %v663_v34  ;;  %v569_v33 = vadd.f32 %v4098_v23, %v568_v61 }
 0x472   :  { %667 = vrot.lane.b32.xlu2 %v4064_v35, %s3889_s28  ;;  %v818_v55 = vpack.c.bf16 %v4064_v35, %v4064_v35 }
 0x474   :  { %820 = vrot.lane.b32.xlu0 %v818_v55, %s3889_s28 }
 0x476   :  { %v503_v56 = vpop.permute.xlu0 %502 }
 0x477   :  { %v505_v36 = vsel %vm195_vm0, %v503_v56, 0.0 }
 0x478   :  { %v506_v37 = vpack.c.bf16 %v505_v36, %v505_v36  ;;  %v691_v63 = vpop.permute.xlu1 %690 }
 0x479   :  { %3307 = vmatmul.msk.bf16.vlgmr.msra.gmra.mxu3 %vm195_vm0, %v691_v63 }
 0x47a   :  { %3294 = vmatmul.msk.bf16.vlgmr.msra.gmra.mxu1 %vm425_vm5, %v506_v37  ;;  %76 = vperm.xlu2 %3539, %v51_v30  }
 0x47b   :  { %913 = vmatpush.bf16.msra.mxu3 %v3988_v2  ;;  %777 = vmatpush.bf16.msra.mxu1 %v4012_v8 }
 0x47c   :  { %125 = vperm.xlu0 %3540, %v50_v27  }
 0x47f   :  { %914 = vmatpush.bf16.msra.mxu3 %v3993_v4  ;;  %778 = vmatpush.bf16.msra.mxu1 %v4017_v11 }
 0x480   :  { %v72_v42 = vpop.permute.xlu1 %71 }
 0x481   :  { %v102_v47 = vmul.f32 %v3941_v10, %v72_v42 }
 0x483   :  { %v110_v50 = vadd.f32 %v3945_v14, %v102_v47 }
 0x489   :  { %v130_v46 = vpop.permute.xlu1 %129 }
 0x48a   :  { %v152_v49 = vmul.f32 %v3943_v13, %v130_v46 }
 0x4cc   :  { %v668_v38 = vpop.permute.xlu2 %667 }
 0x4cd   :  { %v670_v39 = vsel %vm195_vm0, %v668_v38, %v4026_v19 }
 0x4ce   :  { %v671_v40 = vpack.c.bf16 %v670_v39, %v670_v39 }
 0x4d0   :  { %3306 = vmatmul.msk.bf16.vlgmr.msrb.gmra.mxu1 %vm425_vm5, %v671_v40 }
 0x4d1   :  { %967 = vmatpush.bf16.msrb.mxu1 %v4014_v9 }
 0x4d4   :  { %v77_v43 = vpop.permute.xlu2 %76 }
 0x4d5   :  { %968 = vmatpush.bf16.msrb.mxu1 %v4035_v24  ;;  %v103_v44 = vmul.f32 %v3941_v10, %v77_v43 }
 0x4d7   :  { %v111_v48 = vadd.f32 %v3945_v14, %v103_v44 }
 0x4d9   :  { %969 = vmatpush.bf16.msrb.mxu1 %v4039_v26  ;;  %v160_v51 = vadd.f32 %v152_v49, %v111_v48 }
 0x4db   :  { %v168_v57 = vmax.f32 %v160_v51, 0.0 }
 0x4dd   :  { %970 = vmatpush.bf16.msrb.mxu1 %v4046_v29 }
 0x4e6   :  { %v821_v45 = vpop.permute.xlu0 %820 }
 0x4e7   :  { %3312 = vmatmul.msk.bf16.vlgmr.msrb.gmra.mxu3 %vm195_vm0, %v821_v45 }
 0x4e8   :  { %989 = vmatpush.bf16.msrb.mxu3 %v4012_v8 }
 0x4ec   :  { %990 = vmatpush.bf16.msrb.mxu3 %v4017_v11 }
 0x4ee   :  { %v126_v52 = vpop.permute.xlu0 %125 }
 0x4ef   :  { %v151_v53 = vmul.f32 %v3943_v13, %v126_v52 }
 0x4f1   :  { %v159_v58 = vadd.f32 %v151_v53, %v110_v50 }
 0x4f3   :  { %v167_v59 = vmax.f32 %v159_v58, 0.0 }
 0x4f5   :  { %v174_v62 = vpack.c.bf16 %v168_v57, %v167_v59 }
 0x4f7   :  { %3240 = vmatmul.msk.bf16.gmra.mxu0 %vm195_vm0, %v174_v62  ;;  %v543_v6 = vpop.f32.mrf.mxu1 }
 0x4f8   :  { %v544_v7 = vadd.f32 %v4094_v60, %v543_v6 }
 0x4fa   :  { %v3303_v15 = vmul.f32 -1.442695, %v544_v7 }
 0x4fc   :  { %3580 = vpow2.f32 %v3303_v15  ;;  %v704_v16 = vpop.f32.mrf.mxu3 }
 0x4fd   :  { %v705_v50 = vadd.f32 %v4003_v25, %v704_v16 }
 0x4ff   :  { %v545_v17 = vpop.f32.mrf.mxu1 }
 0x502   :  { %v3581_v14 = vpop.eup %3580 }
 0x503   :  { %v575_v18 = vadd.f32 1.0, %v3581_v14 }
 0x504   :  { %v706_v20 = vpop.f32.mrf.mxu3 }
 0x505   :  { %3582 = vrcp.f32 %v575_v18  ;;  %v587_v30 = vand.u32 2147483648, %v575_v18  ;;  %v585_v31 = vand.u32 2147483647, %v575_v18  ;;  %vm581_vm15 = vweird.f32 %v575_v18 }
 0x507   :  { %v588_v55 = vor.u32 1.1754944e-38, %v587_v30  ;;  %vm586_vm2 = vcmp.eq.f32.partialorder %v585_v31, 8.507059e+37 }
 0x50b   :  { %v3583_v21 = vpop.eup %3582 }
 0x50c   :  { %v577_v22 = vmul.f32 %v3583_v21, %v575_v18  ;;  %vm582_vm14 = vweird.f32 %v3583_v21 }
 0x50d   :  { %vm583_vm1 = vmor %vm581_vm15, %vm582_vm14 }
 0x50e   :  { %v578_v27 = vsub.f32 1.0, %v577_v22 }
 0x510   :  { %v579_v54 = vmul.f32 %v3583_v21, %v578_v27 }
 0x512   :  { %v580_v34 = vadd.f32 %v3583_v21, %v579_v54 }
 0x514   :  { %v584_v56 = vsel %vm583_vm1, %v3583_v21, %v580_v34 }
 0x515   :  { %v4101_v36 = vsel %vm586_vm2, %v588_v55, %v584_v56 }
 0x516   :  { %v591_v37 = vmul.f32 %v4101_v36, %v569_v33 }
 0x518   :  { %593 = vrot.lane.b32.xlu0 %v591_v37, %s3882_s20 }
 0x54d   :  { %v684_v63 = vpop.f32.mrf.mxu1 }
 0x54e   :  { %v685_v38 = vadd.f32 %v4000_v12, %v684_v63 }
 0x550   :  { %v3308_v39 = vmul.f32 -1.442695, %v685_v38 }
 0x552   :  { %3584 = vpow2.f32 %v3308_v39 }
 0x555   :  { %v686_v40 = vpop.f32.mrf.mxu1 }
 0x558   :  { %v3585_v41 = vpop.eup %3584 }
 0x559   :  { %v711_v61 = vadd.f32 1.0, %v3585_v41 }
 0x55b   :  { %3586 = vrcp.f32 %v711_v61  ;;  %v723_v45 = vand.u32 2147483648, %v711_v61  ;;  %v721_v47 = vand.u32 2147483647, %v711_v61  ;;  %vm717_vm4 = vweird.f32 %v711_v61 }
 0x55d   :  { %v724_v49 = vor.u32 1.1754944e-38, %v723_v45  ;;  %vm722_vm7 = vcmp.eq.f32.partialorder %v721_v47, 8.507059e+37 }
 0x561   :  { %v3587_v42 = vpop.eup %3586 }
 0x562   :  { %v713_v43 = vmul.f32 %v3587_v42, %v711_v61  ;;  %vm718_vm3 = vweird.f32 %v3587_v42 }
 0x563   :  { %vm719_vm6 = vmor %vm717_vm4, %vm718_vm3 }
 0x564   :  { %v714_v44 = vsub.f32 1.0, %v713_v43 }
 0x566   :  { %v715_v46 = vmul.f32 %v3587_v42, %v714_v44 }
 0x568   :  { %v716_v48 = vadd.f32 %v3587_v42, %v715_v46 }
 0x56a   :  { %v834_v51 = vpop.f32.mrf.mxu3  ;;  %v720_v52 = vsel %vm719_vm6, %v3587_v42, %v716_v48 }
 0x56b   :  { %v858_v53 = vadd.f32 %v834_v51, %v3954_v28  ;;  %v725_v57 = vsel %vm722_vm7, %v724_v49, %v720_v52  ;;  %v598_v52 = vsub.f32 1.0, %v4101_v36 }
 0x56c   :  { %v727_v58 = vmul.f32 %v725_v57, %v705_v50  ;;  %v734_v44 = vsub.f32 1.0, %v725_v57  ;;  %v740_v46 = vmul.f32 %v725_v57, %v4026_v19 }
 0x56d   :  { %860 = vrot.lane.b32.xlu2 %v858_v53, %s3882_s20 }
 0x56e   :  { %729 = vrot.lane.b32.xlu1 %v727_v58, %s3882_s20 }
 0x572   :  { %v836_v59 = vpop.f32.mrf.mxu3 }
 0x573   :  { %v604_v59 = vmul.f32 0.0, %v4101_v36 }
 0x574   :  { %v222_v15 = vpop.f32.mrf.mxu0 }
 0x575   :  { %v223_v17 = vadd.f32 %v3958_v32, %v222_v15 }
 0x577   :  { %v838_v16 = vadd.f32 %v834_v51, %v223_v17 }
 0x579   :  { %v3313_v18 = vmul.f32 -1.442695, %v838_v16 }
 0x58a   :  { %v594_v62 = vpop.permute.xlu0 %593 }
 0x58b   :  { %v596_v6 = vadd.f32 %v594_v62, %v544_v7 }
 0x58d   :  { %3588 = vtanh.f32 %v596_v6 }
 0x58e   :  { %3590 = vpow2.f32 %v3313_v18 }
 0x593   :  { %v3589_v14 = vpop.eup %3588 }
 0x594   :  { %600 = vrot.lane.b32.xlu0 %v3589_v14, %s3889_s28  ;;  %v3591_v20 = vpop.eup %3590 }
 0x595   :  { %v842_v21 = vadd.f32 1.0, %v3591_v20 }
 0x597   :  { %3592 = vrcp.f32 %v842_v21  ;;  %v854_v7 = vand.u32 2147483648, %v842_v21  ;;  %vm848_vm9 = vweird.f32 %v842_v21  ;;  %v852_v33 = vand.u32 2147483647, %v842_v21 }
 0x599   :  { %v855_v55 = vor.u32 1.1754944e-38, %v854_v7  ;;  %vm853_vm11 = vcmp.eq.f32.partialorder %v852_v33, 8.507059e+37 }
 0x59d   :  { %v3593_v22 = vpop.eup %3592 }
 0x59e   :  { %v844_v27 = vmul.f32 %v3593_v22, %v842_v21  ;;  %vm849_vm8 = vweird.f32 %v3593_v22 }
 0x59f   :  { %vm850_vm10 = vmor %vm848_vm9, %vm849_vm8 }
 0x5a0   :  { %v845_v30 = vsub.f32 1.0, %v844_v27 }
 0x5a2   :  { %v846_v54 = vmul.f32 %v3593_v22, %v845_v30 }
 0x5a4   :  { %v847_v31 = vadd.f32 %v3593_v22, %v846_v54 }
 0x5a6   :  { %v851_v34 = vsel %vm850_vm10, %v3593_v22, %v847_v31 }
 0x5a7   :  { %v856_v37 = vsel %vm853_vm11, %v855_v55, %v851_v34 }
 0x5a8   :  { %v870_v49 = vsub.f32 1.0, %v856_v37  ;;  %v876_v53 = vmul.f32 %v856_v37, %v4064_v35 }
 0x5c7   :  { %v861_v56 = vpop.permute.xlu2 %860 }
 0x5c8   :  { %v863_v63 = vmul.f32 %v861_v56, %v856_v37 }
 0x5ca   :  { %865 = vrot.lane.b32.xlu2 %v863_v63, %s3882_s20 }
 0x5e0   :  { %v730_v39 = vpop.permute.xlu1 %729 }
 0x5e1   :  { %v732_v40 = vadd.f32 %v730_v39, %v685_v38 }
 0x5e3   :  { %3594 = vtanh.f32 %v732_v40 }
 0x5e9   :  { %v3595_v41 = vpop.eup %3594 }
 0x5ea   :  { %736 = vrot.lane.b32.xlu1 %v3595_v41, %s3889_s28 }
 0x606   :  { %v601_v50 = vpop.permute.xlu0 %600 }
 0x607   :  { %v603_v19 = vmul.f32 %v601_v50, %v598_v52  ;;  %v53_v50 = vld [vmem:[%s4937_s0 + $0x28] sm:$0xff] }
 0x609   :  { %v4132_v6 = vadd.f32 %v604_v59, %v603_v19 }
 0x60b   :  { %v764_v15 = vpack.c.bf16 %v4132_v6, %v4132_v6 }
 0x624   :  { %v866_v61 = vpop.permute.xlu2 %865 }
 0x625   :  { %v868_v42 = vadd.f32 %v866_v61, %v223_v17 }
 0x627   :  { %3596 = vtanh.f32 %v868_v42 }
 0x62d   :  { %v3597_v43 = vpop.eup %3596 }
 0x62e   :  { %872 = vrot.lane.b32.xlu2 %v3597_v43, %s3889_s28 }
 0x65c   :  { %v737_v45 = vpop.permute.xlu1 %736 }
 0x65d   :  { %v739_v47 = vmul.f32 %v737_v45, %v734_v44 }
 0x65f   :  { %v4116_v48 = vadd.f32 %v740_v46, %v739_v47 }
 0x661   :  { %743 = vrot.lane.b32.xlu1 %v4116_v48, %s3889_s28  ;;  %v900_v38 = vpack.c.bf16 %v4116_v48, %v4116_v48 }
 0x669   :  { %902 = vrot.lane.b32.xlu1 %v900_v38, %s3889_s28 }
 0x688   :  { %v873_v51 = vpop.permute.xlu2 %872 }
 0x689   :  { %v875_v58 = vmul.f32 %v873_v51, %v870_v49  ;;  %v54_v51 = vld [vmem:[%s4937_s0 + $0x30] sm:$0xff] }
 0x68b   :  { %v4125_v57 = vadd.f32 %v876_v53, %v875_v58 }
 0x68d   :  { %879 = vrot.lane.b32.xlu2 %v4125_v57, %s3889_s28  ;;  %v1030_v62 = vpack.c.bf16 %v4125_v57, %v4125_v57 }
 0x68f   :  { %1032 = vrot.lane.b32.xlu0 %v1030_v62, %s3889_s28 }
 0x695   :  { %766 = vrot.lane.b32.xlu2 %v764_v15, %s3889_s28 }
 0x6d3   :  { %v744_v35 = vpop.permute.xlu1 %743 }
 0x6d4   :  { %v746_v17 = vsel %vm195_vm0, %v744_v35, %v4132_v6 }
 0x6d5   :  { %v747_v36 = vpack.c.bf16 %v746_v17, %v746_v17 }
 0x6d7   :  { %3309 = vmatmul.msk.bf16.vlgmr.msrb.gmra.mxu2 %vm425_vm5, %v747_v36 }
 0x6d8   :  { %1043 = vmatpush.bf16.msrb.mxu2 %v3928_v3 }
 0x6db   :  { %v903_v14 = vpop.permute.xlu1 %902 }
 0x6dc   :  { %3315 = vmatmul.msk.bf16.vlgmr.msra.gmra.mxu3 %vm195_vm0, %v903_v14  ;;  %1044 = vmatpush.bf16.msrb.mxu2 %v3931_v5 }
 0x6dd   :  { %1179 = vmatpush.bf16.msra.mxu3 %v4014_v9 }
 0x6e1   :  { %1180 = vmatpush.bf16.msra.mxu3 %v4035_v24 }
 0x6e5   :  { %1181 = vmatpush.bf16.msra.mxu3 %v4039_v26 }
 0x6e7   :  { %v880_v16 = vpop.permute.xlu2 %879 }
 0x6e8   :  { %v882_v18 = vsel %vm195_vm0, %v880_v16, %v4116_v48 }
 0x6e9   :  { %v883_v20 = vpack.c.bf16 %v882_v18, %v882_v18  ;;  %1182 = vmatpush.bf16.msra.mxu3 %v4046_v29 }
 0x6eb   :  { %3314 = vmatmul.msk.bf16.vlgmr.msra.gmra.mxu2 %vm425_vm5, %v883_v20 }
 0x6ec   :  { %1201 = vmatpush.bf16.msra.mxu2 %v4012_v8 }
 0x6ef   :  { %v767_v3 = vpop.permute.xlu2 %766 }
 0x6f0   :  { %3310 = vmatmul.msk.bf16.vlgmr.msra.gmra.mxu1 %vm195_vm0, %v767_v3  ;;  %1202 = vmatpush.bf16.msra.mxu2 %v4017_v11 }
 0x6f1   :  { %1125 = vmatpush.bf16.msra.mxu1 %v3988_v2 }
 0x6f5   :  { %1126 = vmatpush.bf16.msra.mxu1 %v3993_v4 }
 0x701   :  { %v1033_v5 = vpop.permute.xlu0 %1032 }
 0x702   :  { %3320 = vmatmul.msk.bf16.vlgmr.msrb.gmra.mxu2 %vm195_vm0, %v1033_v5 }
 0x703   :  { %1391 = vmatpush.bf16.msrb.mxu2 %v4014_v9 }
 0x707   :  { %1392 = vmatpush.bf16.msrb.mxu2 %v4035_v24 }
 0x70b   :  { %1393 = vmatpush.bf16.msrb.mxu2 %v4039_v26 }
 0x70f   :  { %1394 = vmatpush.bf16.msrb.mxu2 %v4046_v29 }
 0x75a   :  { %v760_v21 = vpop.f32.mrf.mxu2 }
 0x75b   :  { %v4183_v36 = vadd.f32 %v4094_v60, %v760_v21 }
 0x75d   :  { %v3311_v16 = vmul.f32 -1.442695, %v4183_v36 }
 0x75f   :  { %v916_v22 = vpop.f32.mrf.mxu3 }
 0x760   :  { %v917_v45 = vadd.f32 %v4003_v25, %v916_v22  ;;  %v224_v25 = vpop.f32.mrf.mxu0 }
 0x761   :  { %v225_v52 = vadd.f32 %v3958_v32, %v224_v25 }
 0x762   :  { %v762_v27 = vpop.f32.mrf.mxu2 }
 0x767   :  { %v918_v30 = vpop.f32.mrf.mxu3 }
 0x76d   :  { %v4161_v54 = vpop.f32.mrf.mxu1 }
 0x76e   :  { %v896_v2 = vpop.f32.mrf.mxu2 }
 0x76f   :  { %v4164_v4 = vadd.f32 %v4000_v12, %v896_v2  ;;  %v52_v2 = vld [vmem:[%s4937_s0 + $0x20] sm:$0xff] }
 0x771   :  { %v3316_v31 = vmul.f32 -1.442695, %v4164_v4 }
 0x773   :  { %3598 = vpow2.f32 %v3316_v31 }
 0x775   :  { %v782_v7 = vpop.f32.mrf.mxu1 }
 0x776   :  { %v898_v33 = vpop.f32.mrf.mxu2 }
 0x779   :  { %v3599_v34 = vpop.eup %3598 }
 0x77a   :  { %v923_v55 = vadd.f32 1.0, %v3599_v34 }
 0x77c   :  { %3600 = vrcp.f32 %v923_v55  ;;  %v935_v41 = vand.u32 2147483648, %v923_v55  ;;  %v933_v42 = vand.u32 2147483647, %v923_v55  ;;  %vm929_vm13 = vweird.f32 %v923_v55 }
 0x77e   :  { %v936_v44 = vor.u32 1.1754944e-38, %v935_v41  ;;  %vm934_vm15 = vcmp.eq.f32.partialorder %v933_v42, 8.507059e+37 }
 0x782   :  { %v3601_v56 = vpop.eup %3600 }
 0x783   :  { %v925_v37 = vmul.f32 %v3601_v56, %v923_v55  ;;  %vm930_vm12 = vweird.f32 %v3601_v56 }
 0x784   :  { %vm931_vm14 = vmor %vm929_vm13, %vm930_vm12 }
 0x785   :  { %v1046_v63 = vpop.f32.mrf.mxu2  ;;  %v926_v39 = vsub.f32 1.0, %v925_v37 }
 0x786   :  { %v1070_v40 = vadd.f32 %v1046_v63, %v3954_v28  ;;  %v1050_v53 = vadd.f32 %v1046_v63, %v225_v52 }
 0x787   :  { %v927_v61 = vmul.f32 %v3601_v56, %v926_v39 }
 0x788   :  { %1072 = vrot.lane.b32.xlu0 %v1070_v40, %s3882_s20  ;;  %v3321_v58 = vmul.f32 -1.442695, %v1050_v53 }
 0x789   :  { %v928_v43 = vadd.f32 %v3601_v56, %v927_v61 }
 0x78a   :  { %3602 = vpow2.f32 %v3321_v58 }
 0x78b   :  { %v932_v46 = vsel %vm931_vm14, %v3601_v56, %v928_v43 }
 0x78c   :  { %v4170_v47 = vsel %vm934_vm15, %v936_v44, %v932_v46  ;;  %v55_v44 = vld [vmem:[%s4937_s0 + $0x38] sm:$0xff]  ;;  %s3890_s0 = smov [#allocation7]  }
 0x78d   :  { %v1048_v38 = vpop.f32.mrf.mxu2  ;;  %v939_v49 = vmul.f32 %v4170_v47, %v917_v45  ;;  %v952_v53 = vmul.f32 %v4170_v47, %v4116_v48  ;;  %s3215_s14 = sshll.u32 %s3890_s0, 4  ;;  %s3216_s14 = int_to_ptr.vmem [resolvable:$true] %s3215_s14 }
 0x78f   :  { %941 = vrot.lane.b32.xlu2 %v939_v49, %s3882_s20 }
 0x790   :  { %v3603_v19 = vpop.eup %3602 }
 0x791   :  { %v1054_v59 = vadd.f32 1.0, %v3603_v19 }
 0x793   :  { %3604 = vrcp.f32 %v1054_v59  ;;  %v1066_v18 = vand.u32 2147483648, %v1054_v59  ;;  %vm1060_vm2 = vweird.f32 %v1054_v59  ;;  %v1064_v32 = vand.u32 2147483647, %v1054_v59 }
 0x794   :  { %3606 = vpow2.f32 %v3311_v16 }
 0x795   :  { %v1067_v3 = vor.u32 1.1754944e-38, %v1066_v18  ;;  %vm1065_vm4 = vcmp.eq.f32.partialorder %v1064_v32, 8.507059e+37  ;;  %v3778_v32 = vld [vmem:[#allocation5 + $0x8] ss:$0 sm:$0xff] }
 0x797   :  { %86 = vperm.xlu2 %3539, %v53_v50  }
 0x799   :  { %v3605_v62 = vpop.eup %3604 }
 0x79a   :  { %v1056_v15 = vmul.f32 %v3605_v62, %v1054_v59  ;;  %vm1061_vm1 = vweird.f32 %v3605_v62  ;;  %v3607_v30 = vpop.eup %3606 }
 0x79b   :  { %vm1062_vm3 = vmor %vm1060_vm2, %vm1061_vm1  ;;  %v787_v21 = vadd.f32 1.0, %v3607_v30 }
 0x79c   :  { %v1057_v35 = vsub.f32 1.0, %v1056_v15 }
 0x79d   :  { %3608 = vrcp.f32 %v787_v21  ;;  %v799_v63 = vand.u32 2147483648, %v787_v21  ;;  %vm793_vm7 = vweird.f32 %v787_v21  ;;  %v797_v39 = vand.u32 2147483647, %v787_v21 }
 0x79e   :  { %v1058_v17 = vmul.f32 %v3605_v62, %v1057_v35 }
 0x79f   :  { %91 = vperm.xlu2 %3539, %v54_v51   ;;  %v800_v61 = vor.u32 1.1754944e-38, %v799_v63  ;;  %vm798_vm9 = vcmp.eq.f32.partialorder %v797_v39, 8.507059e+37 }
 0x7a0   :  { %v1059_v14 = vadd.f32 %v3605_v62, %v1058_v17 }
 0x7a2   :  { %v1063_v20 = vsel %vm1062_vm3, %v3605_v62, %v1059_v14 }
 0x7a3   :  { %v1068_v22 = vsel %vm1065_vm4, %v1067_v3, %v1063_v20  ;;  %v3609_v31 = vpop.eup %3608 }
 0x7a4   :  { %v789_v7 = vmul.f32 %v3609_v31, %v787_v21  ;;  %vm794_vm6 = vweird.f32 %v3609_v31  ;;  %v1088_v35 = vmul.f32 %v1068_v22, %v4125_v57 }
 0x7a5   :  { %vm795_vm8 = vmor %vm793_vm7, %vm794_vm6 }
 0x7a6   :  { %v790_v34 = vsub.f32 1.0, %v789_v7 }
 0x7a7   :  { %3545 = vset.pattern.permute.xlu2 %v3887_v0 }
 0x7a8   :  { %v791_v56 = vmul.f32 %v3609_v31, %v790_v34  ;;  %145 = vperm.xlu2 %3545, %v55_v44  }
 0x7aa   :  { %v792_v37 = vadd.f32 %v3609_v31, %v791_v56 }
 0x7ac   :  { %v796_v41 = vsel %vm795_vm8, %v3609_v31, %v792_v37 }
 0x7ad   :  { %v4193_v42 = vsel %vm798_vm9, %v800_v61, %v796_v41 }
 0x7e9   :  { %v942_v33 = vpop.permute.xlu2 %941 }
 0x7ea   :  { %v944_v55 = vadd.f32 %v942_v33, %v4164_v4  ;;  %v781_v4 = vadd.f32 %v4098_v23, %v4161_v54  ;;  %v946_v54 = vsub.f32 1.0, %v4170_v47 }
 0x7ec   :  { %3610 = vtanh.f32 %v944_v55  ;;  %v803_v43 = vmul.f32 %v4193_v42, %v781_v4 }
 0x7f1   :  { %v87_v59 = vpop.permute.xlu2 %86 }
 0x7f2   :  { %v3611_v40 = vpop.eup %3610  ;;  %v105_v48 = vmul.f32 %v3941_v10, %v87_v59 }
 0x7f4   :  { %v113_v57 = vadd.f32 %v3778_v32, %v105_v48 }
 0x7fa   :  { %v1073_v5 = vpop.permute.xlu0 %1072 }
 0x7fb   :  { %v1075_v27 = vmul.f32 %v1073_v5, %v1068_v22 }
 0x7fd   :  { %1077 = vrot.lane.b32.xlu1 %v1075_v27, %s3882_s20 }
 0x805   :  { %81 = vperm.xlu1 %3542, %v52_v2  }
 0x80d   :  { %3543 = vset.pattern.permute.xlu1 %v3887_v0 }
 0x80e   :  { %137 = vperm.xlu1 %3543, %v53_v50  }
 0x816   :  { %141 = vperm.xlu1 %3543, %v54_v51  }
 0x81e   :  { %948 = vrot.lane.b32.xlu1 %v3611_v40, %s3889_s28 }
 0x826   :  { %805 = vrot.lane.b32.xlu1 %v803_v43, %s3882_s20 }
 0x86f   :  { %v1078_v45 = vpop.permute.xlu1 %1077 }
 0x870   :  { %v1080_v46 = vadd.f32 %v1078_v45, %v225_v52 }
 0x872   :  { %3612 = vtanh.f32 %v1080_v46 }
 0x877   :  { %v82_v38 = vpop.permute.xlu1 %81 }
 0x878   :  { %v3613_v49 = vpop.eup %3612 }
 0x879   :  { %1084 = vrot.lane.b32.xlu0 %v3613_v49, %s3889_s28 }
 0x880   :  { %v138_v50 = vpop.permute.xlu1 %137 }
 0x881   :  { %133 = vperm.xlu0 %3540, %v52_v2   ;;  %v154_v16 = vmul.f32 %v3943_v13, %v138_v50 }
 0x883   :  { %v162_v5 = vadd.f32 %v154_v16, %v113_v57 }
 0x885   :  { %v170_v21 = vmax.f32 %v162_v5, 0.0 }
 0x888   :  { %v142_v51 = vpop.permute.xlu1 %141 }
 0x889   :  { %3544 = vset.pattern.permute.xlu0 %v3888_v1  ;;  %v1082_v1 = vsub.f32 1.0, %v1068_v22  ;;  %v155_v63 = vmul.f32 %v3943_v13, %v142_v51 }
 0x88a   :  { %96 = vperm.xlu0 %3544, %v55_v44  }
 0x890   :  { %v949_v25 = vpop.permute.xlu1 %948 }
 0x891   :  { %v951_v58 = vmul.f32 %v949_v25, %v946_v54  ;;  %v4264_v25 = vld [vmem:[#allocation2 + $0x30] sm:$0xff] }
 0x892   :  { %3546 = vset.pattern.permute.xlu0 %v3887_v0  ;;  %v104_v0 = vmul.f32 %v3941_v10, %v82_v38  ;;  %v816_v38 = vmul.f32 %v4193_v42, %v4132_v6 }
 0x893   :  { %v4208_v52 = vadd.f32 %v952_v53, %v951_v58  ;;  %v4274_v53 = vld [vmem:[#allocation2 + $0x18] sm:$0xff] }
 0x894   :  { %v112_v20 = vadd.f32 %v3778_v32, %v104_v0 }
 0x895   :  { %v1112_v19 = vpack.c.bf16 %v4208_v52, %v4208_v52 }
 0x897   :  { %1114 = vrot.lane.b32.xlu1 %v1112_v19, %s3889_s28 }
 0x898   :  { %v806_v62 = vpop.permute.xlu1 %805 }
 0x899   :  { %v808_v14 = vadd.f32 %v806_v62, %v4183_v36  ;;  %v92_v36 = vpop.permute.xlu2 %91  ;;  %v4283_v62 = vld [vmem:[#allocation2 + $0x48] sm:$0xff] }
 0x89a   :  { %v106_v55 = vmul.f32 %v3941_v10, %v92_v36 }
 0x89b   :  { %3614 = vtanh.f32 %v808_v14 }
 0x89c   :  { %v114_v39 = vadd.f32 %v3778_v32, %v106_v55 }
 0x89e   :  { %v163_v41 = vadd.f32 %v155_v63, %v114_v39  ;;  %v4306_v39 = vld [vmem:[#allocation5 + $0x10] ss:$0 sm:$0xff] }
 0x8a0   :  { %v171_v4 = vmax.f32 %v163_v41, 0.0 }
 0x8a1   :  { %v3615_v30 = vpop.eup %3614  ;;  %v146_v7 = vpop.permute.xlu2 %145 }
 0x8a2   :  { %v156_v56 = vmul.f32 %v3943_v13, %v146_v7 }
 0x8eb   :  { %v1085_v15 = vpop.permute.xlu0 %1084 }
 0x8ec   :  { %v1087_v17 = vmul.f32 %v1085_v15, %v1082_v1  ;;  %v4288_v15 = vld [vmem:[#allocation2 + $0x40] sm:$0xff] }
 0x8ee   :  { %v4217_v47 = vadd.f32 %v1088_v35, %v1087_v17 }
 0x8f0   :  { %1091 = vrot.lane.b32.xlu2 %v4217_v47, %s3889_s28  ;;  %v1242_v18 = vpack.c.bf16 %v4217_v47, %v4217_v47 }
 0x8f2   :  { %1244 = vrot.lane.b32.xlu0 %v1242_v18, %s3889_s28 }
 0x8f3   :  { %v134_v3 = vpop.permute.xlu0 %133 }
 0x8f4   :  { %v153_v22 = vmul.f32 %v3943_v13, %v134_v3  ;;  %v810_v13 = vsub.f32 1.0, %v4193_v42 }
 0x8f6   :  { %v161_v27 = vadd.f32 %v153_v22, %v112_v20 }
 0x8f8   :  { %v169_v2 = vmax.f32 %v161_v27, 0.0  ;;  %812 = vrot.lane.b32.xlu2 %v3615_v30, %s3889_s28 }
 0x8fa   :  { %955 = vrot.lane.b32.xlu0 %v4208_v52, %s3889_s28  ;;  %v175_v31 = vpack.c.bf16 %v170_v21, %v169_v2 }
 0x8fc   :  { %v97_v33 = vpop.permute.xlu0 %96  ;;  %3241 = vmatmul.msk.bf16.gmra.mxu0 %vm195_vm0, %v175_v31 }
 0x8fd   :  { %v107_v34 = vmul.f32 %v3941_v10, %v97_v33 }
 0x8ff   :  { %v115_v37 = vadd.f32 %v3778_v32, %v107_v34  ;;  %v4299_v34 = vld [vmem:[#allocation5 + $0x28] ss:$0 sm:$0xff] }
 0x901   :  { %v4234_v40 = vadd.f32 %v156_v56, %v115_v37 }
 0x903   :  { %v172_v61 = vmax.f32 %v4234_v40, 0.0 }
 0x905   :  { %v176_v43 = vpack.c.bf16 %v172_v61, %v171_v4 }
 0x90c   :  { %3242 = vmatmul.msk.bf16.gmra.mxu0 %vm195_vm0, %v176_v43 }
 0x94a   :  { %v1092_v44 = vpop.permute.xlu2 %1091 }
 0x94b   :  { %v1094_v10 = vsel %vm195_vm0, %v1092_v44, %v4208_v52 }
 0x94c   :  { %v1095_v45 = vpack.c.bf16 %v1094_v10, %v1094_v10 }
 0x94e   :  { %3322 = vmatmul.msk.bf16.vlgmr.msrb.gmra.mxu0 %vm425_vm5, %v1095_v45 }
 0x94f   :  { %1413 = vmatpush.bf16.msrb.mxu0 %v4012_v8 }
 0x952   :  { %v813_v46 = vpop.permute.xlu2 %812 }
 0x953   :  { %v815_v49 = vmul.f32 %v813_v46, %v810_v13  ;;  %1414 = vmatpush.bf16.msrb.mxu0 %v4017_v11  ;;  %v4260_v11 = vld [vmem:[#allocation2 + $0x38] sm:$0xff] }
 0x955   :  { %v4248_v50 = vadd.f32 %v816_v38, %v815_v49 }
 0x957   :  { %v976_v51 = vpack.c.bf16 %v4248_v50, %v4248_v50 }
 0x959   :  { %978 = vrot.lane.b32.xlu2 %v976_v51, %s3889_s28 }
 0x964   :  { %v1245_v54 = vpop.permute.xlu0 %1244 }
 0x965   :  { %3328 = vmatmul.msk.bf16.vlgmr.msra.gmra.mxu0 %vm195_vm0, %v1245_v54 }
 0x966   :  { %1603 = vmatpush.bf16.msra.mxu0 %v4014_v9  ;;  %v4267_v9 = vld [vmem:[#allocation2 + $0x28] sm:$0xff] }
 0x96a   :  { %1604 = vmatpush.bf16.msra.mxu0 %v4035_v24  ;;  %v4270_v24 = vld [vmem:[#allocation2 + $0x20] sm:$0xff] }
 0x96c   :  { %v956_v8 = vpop.permute.xlu0 %955 }
 0x96d   :  { %v958_v6 = vsel %vm195_vm0, %v956_v8, %v4248_v50 }
 0x96e   :  { %v959_v42 = vpack.c.bf16 %v958_v6, %v958_v6  ;;  %1605 = vmatpush.bf16.msra.mxu0 %v4039_v26  ;;  %v1115_v26 = vpop.permute.xlu1 %1114 }
 0x970   :  { %3317 = vmatmul.msk.bf16.vlgmr.msrb.gmra.mxu1 %vm425_vm5, %v959_v42 }
 0x971   :  { %1315 = vmatpush.bf16.msrb.mxu1 %v4260_v11 }
 0x972   :  { %1606 = vmatpush.bf16.msra.mxu0 %v4046_v29  ;;  %v4277_v29 = vld [vmem:[#allocation2 + $0x10] sm:$0xff] }
 0x975   :  { %1316 = vmatpush.bf16.msrb.mxu1 %v4264_v25 }
 0x979   :  { %1317 = vmatpush.bf16.msrb.mxu1 %v4267_v9  ;;  %v227_v58 = vpop.f32.mrf.mxu0 }
 0x97a   :  { %v228_v41 = vadd.f32 %v4306_v39, %v227_v58 }
 0x97d   :  { %1318 = vmatpush.bf16.msrb.mxu1 %v4270_v24 }
 0x980   :  { %3323 = vmatmul.msk.bf16.vlgmr.msra.gmra.mxu1 %vm195_vm0, %v1115_v26 }
 0x981   :  { %1467 = vmatpush.bf16.msra.mxu1 %v4274_v53  ;;  %v4280_v19 = vpop.f32.mrf.mxu0 }
 0x985   :  { %1468 = vmatpush.bf16.msra.mxu1 %v4277_v29 }
 0x989   :  { %v4286_v1 = vpop.f32.mrf.mxu0 }
 0x991   :  { %v4291_v35 = vpop.f32.mrf.mxu0 }
 0x9b3   :  { %v979_v59 = vpop.permute.xlu2 %978 }
 0x9b4   :  { %3318 = vmatmul.msk.bf16.vlgmr.msrb.gmra.mxu3 %vm195_vm0, %v979_v59 }
 0x9b5   :  { %1337 = vmatpush.bf16.msrb.mxu3 %v4283_v62 }
 0x9b9   :  { %1338 = vmatpush.bf16.msrb.mxu3 %v4288_v15 }
 0x9cb   :  { %v1108_v17 = vpop.f32.mrf.mxu0 }
 0x9cc   :  { %v4294_v14 = vadd.f32 %v4000_v12, %v1108_v17 }
 0x9ce   :  { %v3324_v48 = vmul.f32 -1.442695, %v4294_v14 }
 0x9d0   :  { %3616 = vpow2.f32 %v3324_v48 }
 0x9d3   :  { %v1110_v0 = vpop.f32.mrf.mxu0 }
 0x9d6   :  { %v3617_v16 = vpop.eup %3616 }
 0x9d7   :  { %v1135_v18 = vadd.f32 1.0, %v3617_v16 }
 0x9d9   :  { %3618 = vrcp.f32 %v1135_v18  ;;  %v1147_v21 = vand.u32 2147483648, %v1135_v18  ;;  %vm1141_vm11 = vweird.f32 %v1135_v18  ;;  %v1145_v2 = vand.u32 2147483647, %v1135_v18 }
 0x9db   :  { %v1148_v33 = vor.u32 1.1754944e-38, %v1147_v21  ;;  %vm1146_vm13 = vcmp.eq.f32.partialorder %v1145_v2, 8.507059e+37 }
 0x9df   :  { %v3619_v20 = vpop.eup %3618 }
 0x9e0   :  { %v1137_v3 = vmul.f32 %v3619_v20, %v1135_v18  ;;  %vm1142_vm10 = vweird.f32 %v3619_v20 }
 0x9e1   :  { %vm1143_vm12 = vmor %vm1141_vm11, %vm1142_vm10 }
 0x9e2   :  { %v1258_v32 = vpop.f32.mrf.mxu0  ;;  %v1138_v22 = vsub.f32 1.0, %v1137_v3 }
 0x9e3   :  { %v1282_v57 = vadd.f32 %v1258_v32, %v3954_v28  ;;  %v1262_v4 = vadd.f32 %v1258_v32, %v228_v41 }
 0x9e4   :  { %v1139_v27 = vmul.f32 %v3619_v20, %v1138_v22 }
 0x9e5   :  { %1284 = vrot.lane.b32.xlu0 %v1282_v57, %s3882_s20  ;;  %v3329_v43 = vmul.f32 -1.442695, %v1262_v4 }
 0x9e6   :  { %v1140_v30 = vadd.f32 %v3619_v20, %v1139_v27 }
 0x9e7   :  { %3620 = vpow2.f32 %v3329_v43 }
 0x9e8   :  { %v1144_v31 = vsel %vm1143_vm12, %v3619_v20, %v1140_v30 }
 0x9e9   :  { %v4302_v56 = vsel %vm1146_vm13, %v1148_v33, %v1144_v31 }
 0x9ea   :  { %v1260_v36 = vpop.f32.mrf.mxu0  ;;  %v1164_v4 = vmul.f32 %v4302_v56, %v4208_v52 }
 0x9ed   :  { %v972_v5 = vpop.f32.mrf.mxu1  ;;  %v3621_v44 = vpop.eup %3620 }
 0x9ee   :  { %v1266_v10 = vadd.f32 1.0, %v3621_v44  ;;  %v4310_v13 = vadd.f32 %v4094_v60, %v972_v5 }
 0x9f0   :  { %3622 = vrcp.f32 %v1266_v10  ;;  %v3319_v46 = vmul.f32 -1.442695, %v4310_v13  ;;  %v1278_v58 = vand.u32 2147483648, %v1266_v10  ;;  %vm1272_vm15 = vweird.f32 %v1266_v10 }
 0x9f1   :  { %v1276_v59 = vand.u32 2147483647, %v1266_v10 }
 0x9f2   :  { %3624 = vpow2.f32 %v3319_v46  ;;  %v1279_v48 = vor.u32 1.1754944e-38, %v1278_v58 }
 0x9f3   :  { %vm1277_vm2 = vcmp.eq.f32.partialorder %v1276_v59, 8.507059e+37  ;;  %v4346_v59 = vld [vmem:[#allocation2 + $0x70] sm:$0xff] }
 0x9f5   :  { %v974_v12 = vpop.f32.mrf.mxu1 }
 0x9f6   :  { %v3623_v49 = vpop.eup %3622 }
 0x9f7   :  { %v1268_v51 = vmul.f32 %v3623_v49, %v1266_v10  ;;  %vm1273_vm14 = vweird.f32 %v3623_v49 }
 0x9f8   :  { %v3625_v54 = vpop.eup %3624  ;;  %vm1274_vm1 = vmor %vm1272_vm15, %vm1273_vm14 }
 0x9f9   :  { %v1269_v8 = vsub.f32 1.0, %v1268_v51  ;;  %v999_v6 = vadd.f32 1.0, %v3625_v54 }
 0x9fb   :  { %v1270_v42 = vmul.f32 %v3623_v49, %v1269_v8  ;;  %3626 = vrcp.f32 %v999_v6  ;;  %v1011_v27 = vand.u32 2147483648, %v999_v6  ;;  %vm1005_vm4 = vweird.f32 %v999_v6  ;;  %v4342_v8 = vld [vmem:[#allocation2 + $0x78] sm:$0xff] }
 0x9fc   :  { %v1009_v12 = vand.u32 2147483647, %v999_v6 }
 0x9fd   :  { %v1128_v7 = vpop.f32.mrf.mxu1  ;;  %v1271_v26 = vadd.f32 %v3623_v49, %v1270_v42  ;;  %v1012_v2 = vor.u32 1.1754944e-38, %v1011_v27  ;;  %v4380_v27 = vld [vmem:[#allocation5 + $0x20] ss:$0 sm:$0xff] }
 0x9fe   :  { %v1129_v55 = vadd.f32 %v4299_v34, %v1128_v7  ;;  %vm1010_vm7 = vcmp.eq.f32.partialorder %v1009_v12, 8.507059e+37 }
 0x9ff   :  { %v1275_v60 = vsel %vm1274_vm1, %v3623_v49, %v1271_v26 }
 0xa00   :  { %v1151_v37 = vmul.f32 %v4302_v56, %v1129_v55  ;;  %v1280_v16 = vsel %vm1277_vm2, %v1279_v48, %v1275_v60 }
 0xa01   :  { %v3627_v17 = vpop.eup %3626  ;;  %v1300_v46 = vmul.f32 %v1280_v16, %v4217_v47 }
 0xa02   :  { %1153 = vrot.lane.b32.xlu2 %v1151_v37, %s3882_s20  ;;  %v1001_v32 = vmul.f32 %v3627_v17, %v999_v6  ;;  %vm1006_vm3 = vweird.f32 %v3627_v17  ;;  %v1158_v37 = vsub.f32 1.0, %v4302_v56 }
 0xa03   :  { %vm1007_vm6 = vmor %vm1005_vm4, %vm1006_vm3 }
 0xa04   :  { %v1002_v20 = vsub.f32 1.0, %v1001_v32 }
 0xa05   :  { %v1130_v63 = vpop.f32.mrf.mxu1 }
 0xa06   :  { %v1003_v3 = vmul.f32 %v3627_v17, %v1002_v20  ;;  %v4368_v20 = vld [vmem:[#allocation2 + $0x50] sm:$0xff] }
 0xa08   :  { %v1004_v5 = vadd.f32 %v3627_v17, %v1003_v3 }
 0xa0a   :  { %v1008_v21 = vsel %vm1007_vm6, %v3627_v17, %v1004_v5 }
 0xa0b   :  { %v1013_v31 = vsel %vm1010_vm7, %v1012_v2, %v1008_v21 }
 0xa0c   :  { %v1022_v6 = vsub.f32 1.0, %v1013_v31  ;;  %v1028_v26 = vmul.f32 %v1013_v31, %v4248_v50  ;;  %v4358_v50 = vld [vmem:[#allocation2 + $0x60] sm:$0xff] }
 0xa37   :  { %v992_v45 = vpop.f32.mrf.mxu3 }
 0xa38   :  { %v993_v30 = vadd.f32 %v4098_v23, %v992_v45 }
 0xa3a   :  { %v1015_v7 = vmul.f32 %v1013_v31, %v993_v30 }
 0xa3f   :  { %v994_v38 = vpop.f32.mrf.mxu3 }
 0xa57   :  { %v1285_v0 = vpop.permute.xlu0 %1284 }
 0xa58   :  { %v1287_v18 = vmul.f32 %v1285_v0, %v1280_v16  ;;  %v4355_v0 = vld [vmem:[#allocation2 + $0x68] sm:$0xff] }
 0xa5a   :  { %1289 = vrot.lane.b32.xlu1 %v1287_v18, %s3882_s20 }
 0xa5c   :  { %v1154_v57 = vpop.permute.xlu2 %1153 }
 0xa5d   :  { %v1156_v36 = vadd.f32 %v1154_v57, %v4294_v14  ;;  %v4363_v57 = vld [vmem:[#allocation2 + $0x58] sm:$0xff] }
 0xa5f   :  { %3628 = vtanh.f32 %v1156_v36 }
 0xa65   :  { %v3629_v22 = vpop.eup %3628 }
 0xa66   :  { %1160 = vrot.lane.b32.xlu1 %v3629_v22, %s3889_s28 }
 0xa6e   :  { %1017 = vrot.lane.b32.xlu1 %v1015_v7, %s3882_s20 }
 0xacc   :  { %v1290_v14 = vpop.permute.xlu1 %1289 }
 0xacd   :  { %v1292_v33 = vadd.f32 %v1290_v14, %v228_v41  ;;  %v1294_v41 = vsub.f32 1.0, %v1280_v16 }
 0xacf   :  { %3630 = vtanh.f32 %v1292_v33 }
 0xad5   :  { %v3631_v55 = vpop.eup %3630 }
 0xad6   :  { %1296 = vrot.lane.b32.xlu0 %v3631_v55, %s3889_s28 }
 0xad8   :  { %v1161_v63 = vpop.permute.xlu1 %1160 }
 0xad9   :  { %v1163_v23 = vmul.f32 %v1161_v63, %v1158_v37 }
 0xadb   :  { %v4322_v43 = vadd.f32 %v1164_v4, %v1163_v23 }
 0xadd   :  { %v1324_v44 = vpack.c.bf16 %v4322_v43, %v4322_v43 }
 0xadf   :  { %1326 = vrot.lane.b32.xlu1 %v1324_v44, %s3889_s28 }
 0xae0   :  { %v1018_v10 = vpop.permute.xlu1 %1017 }
 0xae1   :  { %v1020_v49 = vadd.f32 %v1018_v10, %v4310_v13 }
 0xae3   :  { %3632 = vtanh.f32 %v1020_v49 }
 0xae9   :  { %v3633_v56 = vpop.eup %3632 }
 0xb48   :  { %v1297_v45 = vpop.permute.xlu0 %1296 }
 0xb49   :  { %v1299_v38 = vmul.f32 %v1297_v45, %v1294_v41 }
 0xb4b   :  { %v4329_v51 = vadd.f32 %v1300_v46, %v1299_v38 }
 0xb4d   :  { %1303 = vrot.lane.b32.xlu2 %v4329_v51, %s3889_s28  ;;  %v1454_v52 = vpack.c.bf16 %v4329_v51, %v4329_v51 }
 0xb4f   :  { %1456 = vrot.lane.b32.xlu0 %v1454_v52, %s3889_s28 }
 0xb51   :  { %v1327_v36 = vpop.permute.xlu1 %1326 }
 0xb55   :  { %1024 = vrot.lane.b32.xlu2 %v3633_v56, %s3889_s28 }
 0xb57   :  { %1167 = vrot.lane.b32.xlu0 %v4322_v43, %s3889_s28 }
 0xba7   :  { %v1304_v47 = vpop.permute.xlu2 %1303 }
 0xba8   :  { %v1306_v13 = vsel %vm195_vm0, %v1304_v47, %v4322_v43 }
 0xba9   :  { %v1307_v54 = vpack.c.bf16 %v1306_v13, %v1306_v13  ;;  %v230_v13 = vadd.f32 %v4306_v39, %v4280_v19 }
 0xbab   :  { %3330 = vmatmul.msk.bf16.vlgmr.msrb.gmra.mxu1 %vm425_vm5, %v1307_v54 }
 0xbac   :  { %1625 = vmatpush.bf16.msrb.mxu1 %v4342_v8 }
 0xbaf   :  { %v1025_v42 = vpop.permute.xlu2 %1024 }
 0xbb0   :  { %v1027_v58 = vmul.f32 %v1025_v42, %v1022_v6  ;;  %1626 = vmatpush.bf16.msrb.mxu1 %v4346_v59 }
 0xbb2   :  { %v4349_v60 = vadd.f32 %v1028_v26, %v1027_v58 }
 0xbb4   :  { %v1188_v17 = vpack.c.bf16 %v4349_v60, %v4349_v60 }
 0xbb6   :  { %1190 = vrot.lane.b32.xlu2 %v1188_v17, %s3889_s28 }
 0xbc1   :  { %v1457_v48 = vpop.permute.xlu0 %1456 }
 0xbc2   :  { %3336 = vmatmul.msk.bf16.vlgmr.msra.gmra.mxu1 %vm195_vm0, %v1457_v48  ;;  %v4395_v48 = vld [vmem:[#allocation5 + $0x30] ss:$0 sm:$0xff] }
 0xbc3   :  { %1815 = vmatpush.bf16.msra.mxu1 %v4355_v0 }
 0xbc7   :  { %1816 = vmatpush.bf16.msra.mxu1 %v4358_v50 }
 0xbc9   :  { %v1168_v16 = vpop.permute.xlu0 %1167 }
 0xbca   :  { %v1170_v18 = vsel %vm195_vm0, %v1168_v16, %v4349_v60 }
 0xbcb   :  { %v1171_v32 = vpack.c.bf16 %v1170_v18, %v1170_v18  ;;  %1817 = vmatpush.bf16.msra.mxu1 %v4363_v57 }
 0xbcd   :  { %3325 = vmatmul.msk.bf16.vlgmr.msra.gmra.mxu3 %vm425_vm5, %v1171_v32 }
 0xbce   :  { %1527 = vmatpush.bf16.msra.mxu3 %v4260_v11 }
 0xbcf   :  { %1818 = vmatpush.bf16.msra.mxu1 %v4368_v20 }
 0xbd2   :  { %1528 = vmatpush.bf16.msra.mxu3 %v4264_v25 }
 0xbd6   :  { %1529 = vmatpush.bf16.msra.mxu3 %v4267_v9 }
 0xbda   :  { %1530 = vmatpush.bf16.msra.mxu3 %v4270_v24 }
 0xbdd   :  { %3331 = vmatmul.msk.bf16.vlgmr.msrb.gmra.mxu3 %vm195_vm0, %v1327_v36 }
 0xbde   :  { %1679 = vmatpush.bf16.msrb.mxu3 %v4274_v53 }
 0xbe2   :  { %1680 = vmatpush.bf16.msrb.mxu3 %v4277_v29 }
 0xc10   :  { %v1191_v3 = vpop.permute.xlu2 %1190 }
 0xc11   :  { %3326 = vmatmul.msk.bf16.vlgmr.msra.gmra.mxu2 %vm195_vm0, %v1191_v3 }
 0xc12   :  { %1549 = vmatpush.bf16.msra.mxu2 %v4283_v62 }
 0xc16   :  { %1550 = vmatpush.bf16.msra.mxu2 %v4288_v15 }
 0xc28   :  { %v1320_v5 = vpop.f32.mrf.mxu1 }
 0xc29   :  { %v4383_v12 = vadd.f32 %v4380_v27, %v1320_v5 }
 0xc2b   :  { %v3332_v30 = vmul.f32 -1.442695, %v4383_v12 }
 0xc2d   :  { %3634 = vpow2.f32 %v3332_v30 }
 0xc30   :  { %v1322_v22 = vpop.f32.mrf.mxu1 }
 0xc33   :  { %v3635_v21 = vpop.eup %3634 }
 0xc34   :  { %v1347_v7 = vadd.f32 1.0, %v3635_v21 }
 0xc36   :  { %3636 = vrcp.f32 %v1347_v7  ;;  %v1359_v10 = vand.u32 2147483648, %v1347_v7  ;;  %vm1353_vm9 = vweird.f32 %v1347_v7  ;;  %v1357_v41 = vand.u32 2147483647, %v1347_v7 }
 0xc38   :  { %v1360_v38 = vor.u32 1.1754944e-38, %v1359_v10  ;;  %vm1358_vm11 = vcmp.eq.f32.partialorder %v1357_v41, 8.507059e+37 }
 0xc3c   :  { %v3637_v33 = vpop.eup %3636 }
 0xc3d   :  { %v1349_v55 = vmul.f32 %v3637_v33, %v1347_v7  ;;  %vm1354_vm8 = vweird.f32 %v3637_v33 }
 0xc3e   :  { %vm1355_vm10 = vmor %vm1353_vm9, %vm1354_vm8 }
 0xc3f   :  { %v1470_v2 = vpop.f32.mrf.mxu1  ;;  %v1350_v63 = vsub.f32 1.0, %v1349_v55 }
 0xc40   :  { %v1494_v31 = vadd.f32 %v1470_v2, %v3954_v28  ;;  %v1474_v54 = vadd.f32 %v1470_v2, %v230_v13 }
 0xc41   :  { %v1351_v4 = vmul.f32 %v3637_v33, %v1350_v63 }
 0xc42   :  { %1496 = vrot.lane.b32.xlu0 %v1494_v31, %s3882_s20  ;;  %v3337_v6 = vmul.f32 -1.442695, %v1474_v54 }
 0xc43   :  { %v1352_v44 = vadd.f32 %v3637_v33, %v1351_v4 }
 0xc44   :  { %3638 = vpow2.f32 %v3337_v6 }
 0xc45   :  { %v1356_v45 = vsel %vm1355_vm10, %v3637_v33, %v1352_v44 }
 0xc46   :  { %v4389_v52 = vsel %vm1358_vm11, %v1360_v38, %v1356_v45 }
 0xc47   :  { %v1472_v14 = vpop.f32.mrf.mxu1 }
 0xc4a   :  { %v3639_v42 = vpop.eup %3638 }
 0xc4b   :  { %v1478_v26 = vadd.f32 1.0, %v3639_v42 }
 0xc4d   :  { %3640 = vrcp.f32 %v1478_v26  ;;  %v1490_v21 = vand.u32 2147483648, %v1478_v26  ;;  %vm1484_vm13 = vweird.f32 %v1478_v26  ;;  %v1488_v2 = vand.u32 2147483647, %v1478_v26 }
 0xc4f   :  { %v1491_v7 = vor.u32 1.1754944e-38, %v1490_v21  ;;  %vm1489_vm15 = vcmp.eq.f32.partialorder %v1488_v2, 8.507059e+37 }
 0xc50   :  { %v1184_v37 = vpop.f32.mrf.mxu3 }
 0xc51   :  { %v4398_v16 = vadd.f32 %v4395_v48, %v1184_v37 }
 0xc53   :  { %v3641_v18 = vpop.eup %3640  ;;  %v3327_v32 = vmul.f32 -1.442695, %v4398_v16 }
 0xc54   :  { %v1480_v36 = vmul.f32 %v3641_v18, %v1478_v26  ;;  %vm1485_vm12 = vweird.f32 %v3641_v18 }
 0xc55   :  { %3642 = vpow2.f32 %v3327_v32  ;;  %vm1486_vm14 = vmor %vm1484_vm13, %vm1485_vm12 }
 0xc56   :  { %v1481_v3 = vsub.f32 1.0, %v1480_v36  ;;  %v1376_v36 = vmul.f32 %v4389_v52, %v4322_v43 }
 0xc58   :  { %v1186_v23 = vpop.f32.mrf.mxu3  ;;  %v1482_v19 = vmul.f32 %v3641_v18, %v1481_v3 }
 0xc5a   :  { %v1483_v22 = vadd.f32 %v3641_v18, %v1482_v19 }
 0xc5b   :  { %v3643_v5 = vpop.eup %3642 }
 0xc5c   :  { %v1211_v30 = vadd.f32 1.0, %v3643_v5  ;;  %v1487_v31 = vsel %vm1486_vm14, %v3641_v18, %v1483_v22  ;;  %v1370_v18 = vsub.f32 1.0, %v4389_v52 }
 0xc5d   :  { %v1492_v33 = vsel %vm1489_vm15, %v1491_v7, %v1487_v31 }
 0xc5e   :  { %3644 = vrcp.f32 %v1211_v30  ;;  %vm1217_vm2 = vweird.f32 %v1211_v30  ;;  %v1221_v38 = vand.u32 2147483647, %v1211_v30 }
 0xc60   :  { %v1340_v46 = vpop.f32.mrf.mxu3  ;;  %vm1222_vm4 = vcmp.eq.f32.partialorder %v1221_v38, 8.507059e+37 }
 0xc61   :  { %v1341_v49 = vadd.f32 %v4299_v34, %v1340_v46  ;;  %v1223_v46 = vand.u32 2147483648, %v1211_v30 }
 0xc63   :  { %v1363_v56 = vmul.f32 %v4389_v52, %v1341_v49  ;;  %v4404_v49 = vld [vmem:[#allocation5 + $0x38] ss:$0 sm:$0xff]  ;;  %v1224_v54 = vor.u32 1.1754944e-38, %v1223_v46 }
 0xc64   :  { %v3645_v37 = vpop.eup %3644 }
 0xc65   :  { %1365 = vrot.lane.b32.xlu2 %v1363_v56, %s3882_s20  ;;  %v1213_v63 = vmul.f32 %v3645_v37, %v1211_v30  ;;  %vm1218_vm1 = vweird.f32 %v3645_v37  ;;  %v1512_v30 = vmul.f32 %v1492_v33, %v4329_v51 }
 0xc66   :  { %vm1219_vm3 = vmor %vm1217_vm2, %vm1218_vm1 }
 0xc67   :  { %v1214_v23 = vsub.f32 1.0, %v1213_v63 }
 0xc68   :  { %v1342_v47 = vpop.f32.mrf.mxu3 }
 0xc69   :  { %v1215_v10 = vmul.f32 %v3645_v37, %v1214_v23 }
 0xc6b   :  { %v1216_v41 = vadd.f32 %v3645_v37, %v1215_v10 }
 0xc6d   :  { %v1220_v47 = vsel %vm1219_vm3, %v3645_v37, %v1216_v41 }
 0xc6e   :  { %v1225_v6 = vsel %vm1222_vm4, %v1224_v54, %v1220_v47 }
 0xc94   :  { %v1204_v58 = vpop.f32.mrf.mxu2 }
 0xc95   :  { %v1205_v56 = vadd.f32 %v4404_v49, %v1204_v58 }
 0xc9c   :  { %v1206_v17 = vpop.f32.mrf.mxu2 }
 0xcb4   :  { %v1497_v14 = vpop.permute.xlu0 %1496 }
 0xcb5   :  { %v1499_v55 = vmul.f32 %v1497_v14, %v1492_v33  ;;  %v1234_v14 = vsub.f32 1.0, %v1225_v6 }
 0xcb7   :  { %1501 = vrot.lane.b32.xlu1 %v1499_v55, %s3882_s20  ;;  %v1240_v55 = vmul.f32 %v1225_v6, %v4349_v60 }
 0xcbf   :  { %v1366_v4 = vpop.permute.xlu2 %1365 }
 0xcc0   :  { %v1368_v44 = vadd.f32 %v1366_v4, %v4383_v12  ;;  %v1227_v12 = vmul.f32 %v1225_v6, %v1205_v56 }
 0xcc2   :  { %3646 = vtanh.f32 %v1368_v44 }
 0xcc8   :  { %v3647_v45 = vpop.eup %3646 }
 0xcc9   :  { %1372 = vrot.lane.b32.xlu1 %v3647_v45, %s3889_s28 }
 0xcd1   :  { %1229 = vrot.lane.b32.xlu1 %v1227_v12, %s3882_s20 }
 0xd29   :  { %v1502_v42 = vpop.permute.xlu1 %1501 }
 0xd2a   :  { %v1504_v26 = vadd.f32 %v1502_v42, %v230_v13  ;;  %v1506_v13 = vsub.f32 1.0, %v1492_v33 }
 0xd2c   :  { %3648 = vtanh.f32 %v1504_v26 }
 0xd32   :  { %v3649_v17 = vpop.eup %3648 }
 0xd33   :  { %1508 = vrot.lane.b32.xlu0 %v3649_v17, %s3889_s28 }
 0xd3b   :  { %v1373_v32 = vpop.permute.xlu1 %1372 }
 0xd3c   :  { %v1375_v58 = vmul.f32 %v1373_v32, %v1370_v18 }
 0xd3e   :  { %v4412_v3 = vadd.f32 %v1376_v36, %v1375_v58 }
 0xd40   :  { %v1536_v19 = vpack.c.bf16 %v4412_v3, %v4412_v3 }
 0xd42   :  { %1538 = vrot.lane.b32.xlu1 %v1536_v19, %s3889_s28 }
 0xd43   :  { %v1230_v5 = vpop.permute.xlu1 %1229 }
 0xd44   :  { %v1232_v2 = vadd.f32 %v1230_v5, %v4398_v16 }
 0xd46   :  { %3650 = vtanh.f32 %v1232_v2 }
 0xd4c   :  { %v3651_v52 = vpop.eup %3650 }
 0xda5   :  { %v1509_v22 = vpop.permute.xlu0 %1508 }
 0xda6   :  { %v1511_v21 = vmul.f32 %v1509_v22, %v1506_v13 }
 0xda8   :  { %v4419_v31 = vadd.f32 %v1512_v30, %v1511_v21  ;;  %v233_v21 = vadd.f32 %v4306_v39, %v4286_v1 }
 0xdaa   :  { %1515 = vrot.lane.b32.xlu2 %v4419_v31, %s3889_s28  ;;  %v1666_v43 = vpack.c.bf16 %v4419_v31, %v4419_v31 }
 0xdac   :  { %1668 = vrot.lane.b32.xlu0 %v1666_v43, %s3889_s28 }
 0xdb2   :  { %1236 = vrot.lane.b32.xlu2 %v3651_v52, %s3889_s28 }
 0xdb4   :  { %1379 = vrot.lane.b32.xlu0 %v4412_v3, %s3889_s28 }
 0xe04   :  { %v1516_v51 = vpop.permute.xlu2 %1515 }
 0xe05   :  { %v1518_v16 = vsel %vm195_vm0, %v1516_v51, %v4412_v3 }
 0xe06   :  { %v1519_v7 = vpack.c.bf16 %v1518_v16, %v1518_v16 }
 0xe08   :  { %3338 = vmatmul.msk.bf16.vlgmr.msra.gmra.mxu3 %vm425_vm5, %v1519_v7 }
 0xe09   :  { %1837 = vmatpush.bf16.msra.mxu3 %v4342_v8 }
 0xe0c   :  { %v1237_v33 = vpop.permute.xlu2 %1236 }
 0xe0d   :  { %v1239_v37 = vmul.f32 %v1237_v33, %v1234_v14  ;;  %1838 = vmatpush.bf16.msra.mxu3 %v4346_v59 }
 0xe0f   :  { %v4435_v63 = vadd.f32 %v1240_v55, %v1239_v37 }
 0xe11   :  { %v1400_v4 = vpack.c.bf16 %v4435_v63, %v4435_v63 }
 0xe13   :  { %1402 = vrot.lane.b32.xlu2 %v1400_v4, %s3889_s28 }
 0xe1e   :  { %v1669_v23 = vpop.permute.xlu0 %1668 }
 0xe1f   :  { %3344 = vmatmul.msk.bf16.vlgmr.msrb.gmra.mxu3 %vm195_vm0, %v1669_v23 }
 0xe20   :  { %2027 = vmatpush.bf16.msrb.mxu3 %v4355_v0  ;;  %v1539_v0 = vpop.permute.xlu1 %1538 }
 0xe24   :  { %2028 = vmatpush.bf16.msrb.mxu3 %v4358_v50 }
 0xe26   :  { %v1380_v44 = vpop.permute.xlu0 %1379 }
 0xe27   :  { %v1382_v60 = vsel %vm195_vm0, %v1380_v44, %v4435_v63 }
 0xe28   :  { %v1383_v10 = vpack.c.bf16 %v1382_v60, %v1382_v60  ;;  %2029 = vmatpush.bf16.msrb.mxu3 %v4363_v57 }
 0xe2a   :  { %3333 = vmatmul.msk.bf16.vlgmr.msrb.gmra.mxu2 %vm425_vm5, %v1383_v10 }
 0xe2b   :  { %1739 = vmatpush.bf16.msrb.mxu2 %v4260_v11 }
 0xe2c   :  { %2030 = vmatpush.bf16.msrb.mxu3 %v4368_v20 }
 0xe2f   :  { %1740 = vmatpush.bf16.msrb.mxu2 %v4264_v25 }
 0xe33   :  { %1741 = vmatpush.bf16.msrb.mxu2 %v4267_v9 }
 0xe37   :  { %1742 = vmatpush.bf16.msrb.mxu2 %v4270_v24 }
 0xe3a   :  { %3339 = vmatmul.msk.bf16.vlgmr.msra.gmra.mxu2 %vm195_vm0, %v1539_v0 }
 0xe3b   :  { %1891 = vmatpush.bf16.msra.mxu2 %v4274_v53 }
 0xe3f   :  { %1892 = vmatpush.bf16.msra.mxu2 %v4277_v29 }
 0xe6d   :  { %v1403_v50 = vpop.permute.xlu2 %1402 }
 0xe6e   :  { %3334 = vmatmul.msk.bf16.vlgmr.msrb.gmra.mxu0 %vm195_vm0, %v1403_v50 }
 0xe6f   :  { %1761 = vmatpush.bf16.msrb.mxu0 %v4283_v62 }
 0xe73   :  { %1762 = vmatpush.bf16.msrb.mxu0 %v4288_v15 }
 0xe8b   :  { %v1532_v57 = vpop.f32.mrf.mxu3 }
 0xe8c   :  { %v1533_v20 = vadd.f32 %v4380_v27, %v1532_v57 }
 0xe8e   :  { %v3340_v41 = vmul.f32 -1.442695, %v1533_v20 }
 0xe90   :  { %3652 = vpow2.f32 %v3340_v41 }
 0xe93   :  { %v1534_v45 = vpop.f32.mrf.mxu3 }
 0xe96   :  { %v3653_v46 = vpop.eup %3652 }
 0xe97   :  { %v1559_v38 = vadd.f32 1.0, %v3653_v46 }
 0xe99   :  { %3654 = vrcp.f32 %v1559_v38  ;;  %v1571_v18 = vand.u32 2147483648, %v1559_v38  ;;  %vm1565_vm7 = vweird.f32 %v1559_v38  ;;  %v1569_v32 = vand.u32 2147483647, %v1559_v38 }
 0xe9b   :  { %v1572_v19 = vor.u32 1.1754944e-38, %v1571_v18  ;;  %vm1570_vm9 = vcmp.eq.f32.partialorder %v1569_v32, 8.507059e+37 }
 0xe9f   :  { %v3655_v29 = vpop.eup %3654 }
 0xea0   :  { %v1561_v54 = vmul.f32 %v3655_v29, %v1559_v38  ;;  %vm1566_vm6 = vweird.f32 %v3655_v29 }
 0xea1   :  { %vm1567_vm8 = vmor %vm1565_vm7, %vm1566_vm6 }
 0xea2   :  { %v1682_v56 = vpop.f32.mrf.mxu3  ;;  %v1562_v12 = vsub.f32 1.0, %v1561_v54 }
 0xea3   :  { %v1706_v53 = vadd.f32 %v1682_v56, %v3954_v28  ;;  %v1686_v2 = vadd.f32 %v1682_v56, %v233_v21 }
 0xea4   :  { %v1563_v42 = vmul.f32 %v3655_v29, %v1562_v12 }
 0xea5   :  { %1708 = vrot.lane.b32.xlu0 %v1706_v53, %s3882_s20  ;;  %v3345_v43 = vmul.f32 -1.442695, %v1686_v2 }
 0xea6   :  { %v1564_v17 = vadd.f32 %v3655_v29, %v1563_v42 }
 0xea7   :  { %3656 = vpow2.f32 %v3345_v43 }
 0xea8   :  { %v1568_v36 = vsel %vm1567_vm8, %v3655_v29, %v1564_v17 }
 0xea9   :  { %v4462_v13 = vsel %vm1570_vm9, %v1572_v19, %v1568_v36 }
 0xeaa   :  { %v1684_v47 = vpop.f32.mrf.mxu3  ;;  %v1588_v2 = vmul.f32 %v4462_v13, %v4412_v3 }
 0xead   :  { %v1396_v6 = vpop.f32.mrf.mxu2  ;;  %v3657_v16 = vpop.eup %3656 }
 0xeae   :  { %v1690_v7 = vadd.f32 1.0, %v3657_v16  ;;  %v1397_v46 = vadd.f32 %v4395_v48, %v1396_v6 }
 0xeb0   :  { %3658 = vrcp.f32 %v1690_v7  ;;  %v1702_v23 = vand.u32 2147483648, %v1690_v7  ;;  %vm1696_vm11 = vweird.f32 %v1690_v7  ;;  %v1700_v44 = vand.u32 2147483647, %v1690_v7 }
 0xeb1   :  { %v3335_v38 = vmul.f32 -1.442695, %v1397_v46 }
 0xeb2   :  { %v1703_v1 = vor.u32 1.1754944e-38, %v1702_v23  ;;  %vm1701_vm13 = vcmp.eq.f32.partialorder %v1700_v44, 8.507059e+37 }
 0xeb5   :  { %v1398_v26 = vpop.f32.mrf.mxu2 }
 0xeb6   :  { %v3659_v14 = vpop.eup %3658 }
 0xeb7   :  { %v1692_v33 = vmul.f32 %v3659_v14, %v1690_v7  ;;  %vm1697_vm10 = vweird.f32 %v3659_v14 }
 0xeb8   :  { %vm1698_vm12 = vmor %vm1696_vm11, %vm1697_vm10 }
 0xeb9   :  { %v1693_v55 = vsub.f32 1.0, %v1692_v33 }
 0xebb   :  { %v1694_v37 = vmul.f32 %v3659_v14, %v1693_v55 }
 0xebd   :  { %v1552_v58 = vpop.f32.mrf.mxu2  ;;  %v1695_v4 = vadd.f32 %v3659_v14, %v1694_v37 }
 0xebe   :  { %v1553_v5 = vadd.f32 %v4299_v34, %v1552_v58 }
 0xebf   :  { %v1699_v60 = vsel %vm1698_vm12, %v3659_v14, %v1695_v4 }
 0xec0   :  { %v1575_v22 = vmul.f32 %v4462_v13, %v1553_v5  ;;  %v1704_v0 = vsel %vm1701_vm13, %v1703_v1, %v1699_v60 }
 0xec1   :  { %v1724_v16 = vmul.f32 %v1704_v0, %v4419_v31 }
 0xec2   :  { %1577 = vrot.lane.b32.xlu2 %v1575_v22, %s3882_s20 }
 0xec5   :  { %v1554_v30 = vpop.f32.mrf.mxu2 }
 0xec6   :  { %v1582_v30 = vsub.f32 1.0, %v4462_v13 }
 0xeeb   :  { %v1416_v52 = vpop.f32.mrf.mxu0 }
 0xeec   :  { %v1417_v32 = vadd.f32 %v4404_v49, %v1416_v52  ;;  %v1718_v52 = vsub.f32 1.0, %v1704_v0 }
 0xef3   :  { %v1418_v51 = vpop.f32.mrf.mxu0 }
 0xf17   :  { %v1709_v10 = vpop.permute.xlu0 %1708 }
 0xf18   :  { %v1711_v50 = vmul.f32 %v1709_v10, %v1704_v0 }
 0xf1a   :  { %1713 = vrot.lane.b32.xlu1 %v1711_v50, %s3882_s20 }
 0xf1c   :  { %v1578_v57 = vpop.permute.xlu2 %1577 }
 0xf1d   :  { %v1580_v41 = vadd.f32 %v1578_v57, %v1533_v20 }
 0xf1f   :  { %3660 = vtanh.f32 %v1580_v41 }
 0xf20   :  { %3662 = vpow2.f32 %v3335_v38 }
 0xf25   :  { %v3661_v45 = vpop.eup %3660 }
 0xf26   :  { %1584 = vrot.lane.b32.xlu1 %v3661_v45, %s3889_s28  ;;  %v3663_v56 = vpop.eup %3662 }
 0xf27   :  { %v1423_v53 = vadd.f32 1.0, %v3663_v56 }
 0xf29   :  { %3664 = vrcp.f32 %v1423_v53  ;;  %v1435_v18 = vand.u32 2147483648, %v1423_v53  ;;  %vm1429_vm15 = vweird.f32 %v1423_v53  ;;  %v1433_v6 = vand.u32 2147483647, %v1423_v53 }
 0xf2b   :  { %v1436_v58 = vor.u32 1.1754944e-38, %v1435_v18  ;;  %vm1434_vm2 = vcmp.eq.f32.partialorder %v1433_v6, 8.507059e+37 }
 0xf2f   :  { %v3665_v29 = vpop.eup %3664 }
 0xf30   :  { %v1425_v47 = vmul.f32 %v3665_v29, %v1423_v53  ;;  %vm1430_vm14 = vweird.f32 %v3665_v29 }
 0xf31   :  { %vm1431_vm1 = vmor %vm1429_vm15, %vm1430_vm14 }
 0xf32   :  { %v1426_v12 = vsub.f32 1.0, %v1425_v47 }
 0xf34   :  { %v1427_v26 = vmul.f32 %v3665_v29, %v1426_v12 }
 0xf36   :  { %v1428_v17 = vadd.f32 %v3665_v29, %v1427_v26 }
 0xf38   :  { %v1432_v36 = vsel %vm1431_vm1, %v3665_v29, %v1428_v17 }
 0xf39   :  { %v1437_v19 = vsel %vm1434_vm2, %v1436_v58, %v1432_v36 }
 0xf3a   :  { %v1439_v5 = vmul.f32 %v1437_v19, %v1417_v32  ;;  %v1446_v44 = vsub.f32 1.0, %v1437_v19  ;;  %v1452_v1 = vmul.f32 %v1437_v19, %v4435_v63 }
 0xf8c   :  { %v1714_v54 = vpop.permute.xlu1 %1713 }
 0xf8d   :  { %v1716_v42 = vadd.f32 %v1714_v54, %v233_v21 }
 0xf8f   :  { %3666 = vtanh.f32 %v1716_v42 }
 0xf95   :  { %v3667_v20 = vpop.eup %3666 }
 0xf96   :  { %1720 = vrot.lane.b32.xlu0 %v3667_v20, %s3889_s28 }
 0xf98   :  { %v1585_v22 = vpop.permute.xlu1 %1584 }
 0xf99   :  { %v1587_v21 = vmul.f32 %v1585_v22, %v1582_v30 }
 0xf9b   :  { %v4477_v43 = vadd.f32 %v1588_v2, %v1587_v21 }
 0xf9d   :  { %v1748_v55 = vpack.c.bf16 %v4477_v43, %v4477_v43 }
 0xf9e   :  { %1441 = vrot.lane.b32.xlu0 %v1439_v5, %s3882_s20  ;;  %v235_v5 = vadd.f32 %v4306_v39, %v4291_v35 }
 0xfa6   :  { %1591 = vrot.lane.b32.xlu0 %v4477_v43, %s3889_s28 }
0x1008   :  { %v1721_v51 = vpop.permute.xlu0 %1720 }
0x1009   :  { %v1723_v7 = vmul.f32 %v1721_v51, %v1718_v52 }
0x100b   :  { %v4482_v14 = vadd.f32 %v1724_v16, %v1723_v7 }
0x100d   :  { %1727 = vrot.lane.b32.xlu2 %v4482_v14, %s3889_s28  ;;  %v1878_v33 = vpack.c.bf16 %v4482_v14, %v4482_v14 }
0x100f   :  { %1880 = vrot.lane.b32.xlu1 %v1878_v33, %s3889_s28 }
0x1010   :  { %v1442_v3 = vpop.permute.xlu0 %1441 }
0x1011   :  { %v1444_v13 = vadd.f32 %v1442_v3, %v1397_v46 }
0x1013   :  { %3668 = vtanh.f32 %v1444_v13 }
0x1017   :  { %1750 = vrot.lane.b32.xlu1 %v1748_v55, %s3889_s28 }
0x1018   :  { %v1592_v50 = vpop.permute.xlu0 %1591 }
0x1019   :  { %v3669_v31 = vpop.eup %3668 }
0x101a   :  { %1448 = vrot.lane.b32.xlu2 %v3669_v31, %s3889_s28 }
0x1067   :  { %v1728_v37 = vpop.permute.xlu2 %1727 }
0x1068   :  { %v1730_v4 = vsel %vm195_vm0, %v1728_v37, %v4477_v43 }
0x1069   :  { %v1731_v23 = vpack.c.bf16 %v1730_v4, %v1730_v4 }
0x106b   :  { %3346 = vmatmul.msk.bf16.vlgmr.msrb.gmra.mxu2 %vm425_vm5, %v1731_v23 }
0x106c   :  { %2049 = vmatpush.bf16.msrb.mxu2 %v4342_v8 }
0x1070   :  { %2050 = vmatpush.bf16.msrb.mxu2 %v4346_v59 }
0x1074   :  { %v1449_v60 = vpop.permute.xlu2 %1448 }
0x1075   :  { %v1451_v10 = vmul.f32 %v1449_v60, %v1446_v44 }
0x1077   :  { %v4499_v0 = vadd.f32 %v1452_v1, %v1451_v10 }
0x1079   :  { %v1594_v57 = vsel %vm195_vm0, %v1592_v50, %v4499_v0  ;;  %v1612_v41 = vpack.c.bf16 %v4499_v0, %v4499_v0 }
0x107a   :  { %v1595_v45 = vpack.c.bf16 %v1594_v57, %v1594_v57 }
0x107b   :  { %1614 = vrot.lane.b32.xlu2 %v1612_v41, %s3889_s28 }
0x107c   :  { %3341 = vmatmul.msk.bf16.vlgmr.msra.gmra.mxu0 %vm425_vm5, %v1595_v45 }
0x107d   :  { %1951 = vmatpush.bf16.msra.mxu0 %v4260_v11 }
0x1081   :  { %v1881_v8 = vpop.permute.xlu1 %1880  ;;  %1952 = vmatpush.bf16.msra.mxu0 %v4264_v25 }
0x1082   :  { %3352 = vmatmul.msk.bf16.vlgmr.msra.gmra.mxu2 %vm195_vm0, %v1881_v8 }
0x1085   :  { %1953 = vmatpush.bf16.msra.mxu0 %v4267_v9 }
0x1089   :  { %1954 = vmatpush.bf16.msra.mxu0 %v4270_v24  ;;  %v1751_v59 = vpop.permute.xlu1 %1750 }
0x108c   :  { %3347 = vmatmul.msk.bf16.vlgmr.msrb.gmra.mxu0 %vm195_vm0, %v1751_v59 }
0x10d5   :  { %v1615_v63 = vpop.permute.xlu2 %1614 }
0x10d6   :  { %3342 = vmatmul.msk.bf16.vlgmr.msrb.gmra.mxu1 %vm195_vm0, %v1615_v63 }
0x10d7   :  { %1973 = vmatpush.bf16.msrb.mxu1 %v4283_v62 }
0x10db   :  { %1974 = vmatpush.bf16.msrb.mxu1 %v4288_v15 }
0x10ee   :  { %v1744_v11 = vpop.f32.mrf.mxu2 }
0x10ef   :  { %v1745_v46 = vadd.f32 %v4380_v27, %v1744_v11 }
0x10f1   :  { %v3348_v25 = vmul.f32 -1.442695, %v1745_v46 }
0x10f3   :  { %3670 = vpow2.f32 %v3348_v25 }
0x10f6   :  { %v1746_v38 = vpop.f32.mrf.mxu2 }
0x10f9   :  { %v3671_v56 = vpop.eup %3670  ;;  %v1608_v9 = vpop.f32.mrf.mxu0 }
0x10fa   :  { %v1771_v53 = vadd.f32 1.0, %v3671_v56  ;;  %v1609_v21 = vadd.f32 %v4395_v48, %v1608_v9 }
0x10fc   :  { %3672 = vrcp.f32 %v1771_v53  ;;  %v1783_v62 = vand.u32 2147483648, %v1771_v53  ;;  %v1781_v15 = vand.u32 2147483647, %v1771_v53  ;;  %vm1777_vm4 = vweird.f32 %v1771_v53 }
0x10fd   :  { %v3343_v2 = vmul.f32 -1.442695, %v1609_v21 }
0x10fe   :  { %v1784_v6 = vor.u32 1.1754944e-38, %v1783_v62  ;;  %vm1782_vm7 = vcmp.eq.f32.partialorder %v1781_v15, 8.507059e+37 }
0x1101   :  { %v1610_v24 = vpop.f32.mrf.mxu0 }
0x1102   :  { %v3673_v29 = vpop.eup %3672 }
0x1103   :  { %v1773_v47 = vmul.f32 %v3673_v29, %v1771_v53  ;;  %vm1778_vm3 = vweird.f32 %v3673_v29 }
0x1104   :  { %vm1779_vm6 = vmor %vm1777_vm4, %vm1778_vm3 }
0x1105   :  { %v1894_v54 = vpop.f32.mrf.mxu2  ;;  %v1774_v12 = vsub.f32 1.0, %v1773_v47 }
0x1106   :  { %v1918_v42 = vadd.f32 %v1894_v54, %v3954_v28  ;;  %v1898_v22 = vadd.f32 %v1894_v54, %v235_v5 }
0x1107   :  { %v1775_v26 = vmul.f32 %v3673_v29, %v1774_v12 }
0x1108   :  { %1920 = vrot.lane.b32.xlu0 %v1918_v42, %s3882_s20  ;;  %v3353_v30 = vmul.f32 -1.442695, %v1898_v22 }
0x1109   :  { %v1764_v17 = vpop.f32.mrf.mxu0  ;;  %v1776_v20 = vadd.f32 %v3673_v29, %v1775_v26 }
0x110a   :  { %v1765_v18 = vadd.f32 %v4299_v34, %v1764_v17  ;;  %3674 = vpow2.f32 %v3353_v30 }
0x110b   :  { %v1780_v32 = vsel %vm1779_vm6, %v3673_v29, %v1776_v20  ;;  %3676 = vpow2.f32 %v3343_v2 }
0x110c   :  { %v4520_v36 = vsel %vm1782_vm7, %v1784_v6, %v1780_v32 }
0x110d   :  { %v1896_v58 = vpop.f32.mrf.mxu2  ;;  %v1787_v28 = vmul.f32 %v4520_v36, %v1765_v18  ;;  %v1794_v24 = vsub.f32 1.0, %v4520_v36  ;;  %v1800_v47 = vmul.f32 %v4520_v36, %v4477_v43 }
0x110f   :  { %1789 = vrot.lane.b32.xlu2 %v1787_v28, %s3882_s20 }
0x1110   :  { %v3675_v52 = vpop.eup %3674 }
0x1111   :  { %v1766_v19 = vpop.f32.mrf.mxu0  ;;  %v1902_v51 = vadd.f32 1.0, %v3675_v52  ;;  %v3677_v7 = vpop.eup %3676 }
0x1112   :  { %v1635_v33 = vadd.f32 1.0, %v3677_v7  ;;  %v4568_v7 = vld [vmem:[#allocation2 + $0x88] sm:$0xff] }
0x1113   :  { %3678 = vrcp.f32 %v1902_v51  ;;  %v1914_v1 = vand.u32 2147483648, %v1902_v51  ;;  %vm1908_vm9 = vweird.f32 %v1902_v51  ;;  %v1912_v10 = vand.u32 2147483647, %v1902_v51 }
0x1114   :  { %3680 = vrcp.f32 %v1635_v33  ;;  %v1647_v11 = vand.u32 2147483648, %v1635_v33  ;;  %vm1641_vm13 = vweird.f32 %v1635_v33 }
0x1115   :  { %v1915_v41 = vor.u32 1.1754944e-38, %v1914_v1  ;;  %vm1913_vm11 = vcmp.eq.f32.partialorder %v1912_v10, 8.507059e+37 }
0x1116   :  { %v1648_v56 = vor.u32 1.1754944e-38, %v1647_v11 }
0x1119   :  { %v3679_v3 = vpop.eup %3678 }
0x111a   :  { %v1904_v13 = vmul.f32 %v3679_v3, %v1902_v51  ;;  %v3681_v39 = vpop.eup %3680  ;;  %vm1909_vm8 = vweird.f32 %v3679_v3  ;;  %v4563_v51 = vld [vmem:[#allocation2 + $0x90] sm:$0xff] }
0x111b   :  { %v1637_v4 = vmul.f32 %v3681_v39, %v1635_v33  ;;  %vm1910_vm10 = vmor %vm1908_vm9, %vm1909_vm8  ;;  %vm1642_vm12 = vweird.f32 %v3681_v39 }
0x111c   :  { %v1905_v35 = vsub.f32 1.0, %v1904_v13  ;;  %vm1643_vm14 = vmor %vm1641_vm13, %vm1642_vm12  ;;  %v4576_v13 = vld [vmem:[#allocation2 + $0xa0] sm:$0xff] }
0x111d   :  { %v1638_v60 = vsub.f32 1.0, %v1637_v4 }
0x111e   :  { %v1906_v37 = vmul.f32 %v3679_v3, %v1905_v35 }
0x111f   :  { %v1639_v57 = vmul.f32 %v3681_v39, %v1638_v60 }
0x1120   :  { %v1907_v44 = vadd.f32 %v3679_v3, %v1906_v37 }
0x1121   :  { %v1640_v63 = vadd.f32 %v3681_v39, %v1639_v57 }
0x1122   :  { %v1911_v50 = vsel %vm1910_vm10, %v3679_v3, %v1907_v44 }
0x1123   :  { %v1916_v8 = vsel %vm1913_vm11, %v1915_v41, %v1911_v50  ;;  %v1644_v38 = vsel %vm1643_vm14, %v3681_v39, %v1640_v63 }
0x1124   :  { %v1930_v18 = vsub.f32 1.0, %v1916_v8  ;;  %v1936_v6 = vmul.f32 %v1916_v8, %v4482_v14 }
0x1153   :  { %v1628_v34 = vpop.f32.mrf.mxu1 }
0x1154   :  { %v1629_v25 = vadd.f32 %v4404_v49, %v1628_v34 }
0x115b   :  { %v1630_v16 = vpop.f32.mrf.mxu1 }
0x115c   :  { %v4565_v16 = vld [vmem:[#allocation2 + $0xa8] sm:$0xff] }
0x1169   :  { %v1790_v55 = vpop.permute.xlu2 %1789 }
0x116a   :  { %v1792_v31 = vadd.f32 %v1790_v55, %v1745_v46  ;;  %v1645_v46 = vand.u32 2147483647, %v1635_v33  ;;  %v4572_v33 = vld [vmem:[#allocation2 + $0x80] sm:$0xff] }
0x116c   :  { %3682 = vtanh.f32 %v1792_v31  ;;  %vm1646_vm15 = vcmp.eq.f32.partialorder %v1645_v46, 8.507059e+37 }
0x116d   :  { %v1649_v9 = vsel %vm1646_vm15, %v1648_v56, %v1644_v38 }
0x116e   :  { %v1651_v53 = vmul.f32 %v1649_v9, %v1629_v25  ;;  %v1658_v28 = vsub.f32 1.0, %v1649_v9 }
0x1172   :  { %v3683_v23 = vpop.eup %3682 }
0x1173   :  { %1796 = vrot.lane.b32.xlu2 %v3683_v23, %s3889_s28 }
0x117a   :  { %v1921_v45 = vpop.permute.xlu0 %1920 }
0x117b   :  { %v1923_v59 = vmul.f32 %v1921_v45, %v1916_v8 }
0x117d   :  { %1925 = vrot.lane.b32.xlu1 %v1923_v59, %s3882_s20 }
0x1185   :  { %1653 = vrot.lane.b32.xlu1 %v1651_v53, %s3882_s20 }
0x11cd   :  { %v1797_v29 = vpop.permute.xlu2 %1796 }
0x11ce   :  { %v1799_v54 = vmul.f32 %v1797_v29, %v1794_v24 }
0x11d0   :  { %v4534_v12 = vadd.f32 %v1800_v47, %v1799_v54 }
0x11d2   :  { %1803 = vrot.lane.b32.xlu2 %v4534_v12, %s3889_s28  ;;  %v1960_v14 = vpack.c.bf16 %v4534_v12, %v4534_v12 }
0x11ef   :  { %v1926_v42 = vpop.permute.xlu1 %1925 }
0x11f0   :  { %v1928_v62 = vadd.f32 %v1926_v42, %v235_v5  ;;  %v1664_v5 = vmul.f32 %v1649_v9, %v4499_v0  ;;  %v4560_v0 = vld [vmem:[#allocation2 + $0x98] sm:$0xff] }
0x11f1   :  { %2123 = vmatpush.bf16.msrb.mxu0 %v4560_v0 }
0x11f2   :  { %3684 = vtanh.f32 %v1928_v62 }
0x11f5   :  { %2124 = vmatpush.bf16.msrb.mxu0 %v4563_v51 }
0x11f7   :  { %v1654_v26 = vpop.permute.xlu1 %1653 }
0x11f8   :  { %v3685_v15 = vpop.eup %3684  ;;  %v1656_v17 = vadd.f32 %v1654_v26, %v1609_v21 }
0x11f9   :  { %1932 = vrot.lane.b32.xlu0 %v3685_v15, %s3889_s28  ;;  %2125 = vmatpush.bf16.msrb.mxu0 %v4568_v7  ;;  %v4599_v15 = vld [vmem:[#allocation5 + $0x40] ss:$0 sm:$0xff] }
0x11fa   :  { %3686 = vtanh.f32 %v1656_v17 }
0x11fd   :  { %2126 = vmatpush.bf16.msrb.mxu0 %v4572_v33 }
0x1200   :  { %v3687_v20 = vpop.eup %3686 }
0x1201   :  { %1660 = vrot.lane.b32.xlu1 %v3687_v20, %s3889_s28 }
0x122c   :  { %v1804_v21 = vpop.permute.xlu2 %1803 }
0x126b   :  { %v1933_v43 = vpop.permute.xlu0 %1932 }
0x126c   :  { %v1935_v32 = vmul.f32 %v1933_v43, %v1930_v18 }
0x126e   :  { %v4541_v36 = vadd.f32 %v1936_v6, %v1935_v32 }
0x1270   :  { %1939 = vrot.lane.b32.xlu0 %v4541_v36, %s3889_s28  ;;  %v2132_v58 = vpack.c.bf16 %v4541_v36, %v4541_v36  ;;  %v2090_v37 = vsel %vm195_vm0, %v172_v61, %v4541_v36 }
0x1271   :  { %v2091_v4 = vpack.c.bf16 %v2090_v37, %v2090_v37 }
0x1272   :  { %2134 = vrot.lane.b32.xlu1 %v2132_v58, %s3889_s28 }
0x1273   :  { %v1661_v19 = vpop.permute.xlu1 %1660 }
0x1274   :  { %v1663_v22 = vmul.f32 %v1661_v19, %v1658_v28 }
0x1276   :  { %v4549_v30 = vadd.f32 %v1664_v5, %v1663_v22 }
0x1278   :  { %v1806_v34 = vsel %vm195_vm0, %v1804_v21, %v4549_v30  ;;  %1962 = vrot.lane.b32.xlu0 %v1960_v14, %s3889_s28  ;;  %v1824_v2 = vpack.c.bf16 %v4549_v30, %v4549_v30 }
0x1279   :  { %v1807_v52 = vpack.c.bf16 %v1806_v34, %v1806_v34  ;;  %v3798_v34 = vld [vmem:[#allocation5 + $0x28] ss:$0 sm:$0xff] }
0x127a   :  { %1826 = vrot.lane.b32.xlu2 %v1824_v2, %s3889_s28 }
0x127b   :  { %3349 = vmatmul.msk.bf16.vlgmr.msra.gmra.mxu1 %vm425_vm5, %v1807_v52 }
0x127c   :  { %2157 = vmatpush.bf16.msra.mxu1 %v4565_v16 }
0x1280   :  { %2158 = vmatpush.bf16.msra.mxu1 %v4576_v13 }
0x12d4   :  { %v1827_v3 = vpop.permute.xlu2 %1826 }
0x12d5   :  { %3350 = vmatmul.msk.bf16.vlgmr.msra.gmra.mxu3 %vm195_vm0, %v1827_v3 }
0x12e2   :  { %v1940_v55 = vpop.permute.xlu0 %1939 }
0x12e3   :  { %v1942_v31 = vsel %vm195_vm0, %v1940_v55, %v4534_v12 }
0x12e4   :  { %v1943_v35 = vpack.c.bf16 %v1942_v31, %v1942_v31  ;;  %v2135_v44 = vpop.permute.xlu1 %2134 }
0x12e6   :  { %3354 = vmatmul.msk.bf16.vlgmr.msra.gmra.mxu0 %vm425_vm5, %v1943_v35 }
0x12ea   :  { %v1963_v39 = vpop.permute.xlu0 %1962 }
0x12eb   :  { %3355 = vmatmul.msk.bf16.vlgmr.msrb.gmra.mxu1 %vm195_vm0, %v1963_v39 }
0x12f6   :  { %3376 = vmatmul.msk.bf16.vlgmr.msrb.gmra.mxu0 %vm425_vm5, %v2091_v4 }
0x12f8   :  { %v1820_v23 = vpop.f32.mrf.mxu1 }
0x12f9   :  { %v4590_v1 = vadd.f32 %v4395_v48, %v1820_v23  ;;  %v4603_v23 = vld [vmem:[#allocation5 + $0x48] ss:$0 sm:$0xff] }
0x12fb   :  { %3385 = vmatmul.msk.bf16.vlgmr.msra.gmra.mxu1 %vm195_vm0, %v2135_v44  ;;  %v3351_v10 = vmul.f32 -1.442695, %v4590_v1 }
0x12fd   :  { %3688 = vpow2.f32 %v3351_v10 }
0x1300   :  { %v1822_v60 = vpop.f32.mrf.mxu1 }
0x1303   :  { %v3689_v50 = vpop.eup %3688 }
0x1304   :  { %v1847_v57 = vadd.f32 1.0, %v3689_v50 }
0x1306   :  { %3690 = vrcp.f32 %v1847_v57  ;;  %v1859_v59 = vand.u32 2147483648, %v1847_v57  ;;  %vm1853_vm2 = vweird.f32 %v1847_v57  ;;  %v1857_v63 = vand.u32 2147483647, %v1847_v57 }
0x1308   :  { %v1860_v48 = vor.u32 1.1754944e-38, %v1859_v59  ;;  %vm1858_vm4 = vcmp.eq.f32.partialorder %v1857_v63, 8.507059e+37 }
0x130c   :  { %v3691_v40 = vpop.eup %3690 }
0x130d   :  { %v1849_v41 = vmul.f32 %v3691_v40, %v1847_v57  ;;  %vm1854_vm1 = vweird.f32 %v3691_v40 }
0x130e   :  { %vm1855_vm3 = vmor %vm1853_vm2, %vm1854_vm1 }
0x130f   :  { %v1850_v61 = vsub.f32 1.0, %v1849_v41 }
0x1311   :  { %v1851_v45 = vmul.f32 %v3691_v40, %v1850_v61 }
0x1313   :  { %v1852_v8 = vadd.f32 %v3691_v40, %v1851_v45 }
0x1315   :  { %v1856_v11 = vsel %vm1855_vm3, %v3691_v40, %v1852_v8 }
0x1316   :  { %v4594_v38 = vsel %vm1858_vm4, %v1860_v48, %v1856_v11 }
0x1358   :  { %v1840_v46 = vpop.f32.mrf.mxu3 }
0x1359   :  { %v1841_v25 = vadd.f32 %v4404_v49, %v1840_v46 }
0x135b   :  { %v1863_v56 = vmul.f32 %v4594_v38, %v1841_v25 }
0x135d   :  { %1865 = vrot.lane.b32.xlu2 %v1863_v56, %s3882_s20 }
0x1360   :  { %v1842_v9 = vpop.f32.mrf.mxu3 }
0x1361   :  { %v1870_v9 = vsub.f32 1.0, %v4594_v38 }
0x1363   :  { %v1956_v53 = vpop.f32.mrf.mxu0 }
0x1364   :  { %v1957_v24 = vadd.f32 %v4380_v27, %v1956_v53 }
0x1366   :  { %v3356_v29 = vmul.f32 -1.442695, %v1957_v24 }
0x1368   :  { %3692 = vpow2.f32 %v3356_v29  ;;  %v1976_v47 = vpop.f32.mrf.mxu1 }
0x1369   :  { %v1977_v2 = vadd.f32 %v3798_v34, %v1976_v47 }
0x136b   :  { %v1958_v54 = vpop.f32.mrf.mxu0 }
0x136e   :  { %v3693_v42 = vpop.eup %3692 }
0x136f   :  { %v1983_v62 = vadd.f32 1.0, %v3693_v42 }
0x1370   :  { %v1978_v26 = vpop.f32.mrf.mxu1 }
0x1371   :  { %3694 = vrcp.f32 %v1983_v62  ;;  %v1995_v58 = vand.u32 2147483648, %v1983_v62  ;;  %v1993_v19 = vand.u32 2147483647, %v1983_v62  ;;  %vm1989_vm7 = vweird.f32 %v1983_v62 }
0x1373   :  { %v2128_v49 = vpop.f32.mrf.mxu0  ;;  %v1996_v21 = vor.u32 1.1754944e-38, %v1995_v58  ;;  %vm1994_vm9 = vcmp.eq.f32.partialorder %v1993_v19, 8.507059e+37  ;;  %v4641_v58 = vld [vmem:[#allocation2 + $0xc0] sm:$0xff]  ;;  %v4650_v19 = vld [vmem:[#allocation2 + $0xb0] sm:$0xff] }
0x1374   :  { %v2129_v17 = vadd.f32 %v4599_v15, %v2128_v49 }
0x1376   :  { %v3386_v20 = vmul.f32 -1.442695, %v2129_v17 }
0x1377   :  { %v3695_v18 = vpop.eup %3694 }
0x1378   :  { %3696 = vpow2.f32 %v3386_v20  ;;  %v2160_v43 = vpop.f32.mrf.mxu1  ;;  %v1985_v6 = vmul.f32 %v3695_v18, %v1983_v62  ;;  %vm1990_vm6 = vweird.f32 %v3695_v18 }
0x1379   :  { %vm1991_vm8 = vmor %vm1989_vm7, %vm1990_vm6  ;;  %v2161_v57 = vadd.f32 %v4603_v23, %v2160_v43 }
0x137a   :  { %v1986_v32 = vsub.f32 1.0, %v1985_v6  ;;  %v4633_v6 = vld [vmem:[#allocation2 + $0xd8] sm:$0xff] }
0x137b   :  { %v2130_v27 = vpop.f32.mrf.mxu0  ;;  %2269 = vmatpush.bf16.msra.mxu2 %v4633_v6 }
0x137c   :  { %v1987_v28 = vmul.f32 %v3695_v18, %v1986_v32  ;;  %v4636_v32 = vld [vmem:[#allocation2 + $0xc8] sm:$0xff]  ;;  %v4638_v27 = vld [vmem:[#allocation2 + $0xd0] sm:$0xff] }
0x137d   :  { %2235 = vmatpush.bf16.msra.mxu3 %v4636_v32 }
0x137e   :  { %v3697_v5 = vpop.eup %3696  ;;  %v1988_v22 = vadd.f32 %v3695_v18, %v1987_v28  ;;  %v4646_v28 = vld [vmem:[#allocation2 + $0xb8] sm:$0xff] }
0x137f   :  { %v2167_v14 = vadd.f32 1.0, %v3697_v5  ;;  %2270 = vmatpush.bf16.msra.mxu2 %v4638_v27 }
0x1380   :  { %v2162_v52 = vpop.f32.mrf.mxu1  ;;  %v1992_v3 = vsel %vm1991_vm8, %v3695_v18, %v1988_v22 }
0x1381   :  { %3698 = vrcp.f32 %v2167_v14  ;;  %v1997_v55 = vsel %vm1994_vm9, %v1996_v21, %v1992_v3  ;;  %v2179_v4 = vand.u32 2147483648, %v2167_v14  ;;  %v2177_v60 = vand.u32 2147483647, %v2167_v14  ;;  %2236 = vmatpush.bf16.msra.mxu3 %v4641_v58 }
0x1382   :  { %v1999_v31 = vmul.f32 %v1997_v55, %v1977_v2  ;;  %vm2173_vm11 = vweird.f32 %v2167_v14  ;;  %v2006_v54 = vsub.f32 1.0, %v1997_v55  ;;  %v2012_v62 = vmul.f32 %v1997_v55, %v4534_v12 }
0x1383   :  { %v2180_v50 = vor.u32 1.1754944e-38, %v2179_v4  ;;  %vm2178_vm13 = vcmp.eq.f32.partialorder %v2177_v60, 8.507059e+37 }
0x1384   :  { %2001 = vrot.lane.b32.xlu0 %v1999_v31, %s3882_s20 }
0x1385   :  { %2237 = vmatpush.bf16.msra.mxu3 %v4646_v28 }
0x1387   :  { %v3699_v35 = vpop.eup %3698 }
0x1388   :  { %v2169_v39 = vmul.f32 %v3699_v35, %v2167_v14  ;;  %vm2174_vm10 = vweird.f32 %v3699_v35 }
0x1389   :  { %vm2175_vm12 = vmor %vm2173_vm11, %vm2174_vm10  ;;  %2238 = vmatpush.bf16.msra.mxu3 %v4650_v19 }
0x138a   :  { %v2170_v37 = vsub.f32 1.0, %v2169_v39 }
0x138c   :  { %v2171_v44 = vmul.f32 %v3699_v35, %v2170_v37 }
0x138e   :  { %v2172_v10 = vadd.f32 %v3699_v35, %v2171_v44 }
0x1390   :  { %v2176_v40 = vsel %vm2175_vm12, %v3699_v35, %v2172_v10  ;;  %v3799_v35 = vld [vmem:[#allocation5 + $0x30] ss:$0 sm:$0xff] }
0x1391   :  { %v2181_v41 = vsel %vm2178_vm13, %v2180_v50, %v2176_v40 }
0x1392   :  { %v2183_v61 = vmul.f32 %v2181_v41, %v2161_v57  ;;  %v2196_v18 = vmul.f32 %v2181_v41, %v4541_v36  ;;  %v4664_v57 = vld [vmem:[#allocation5 + $0x50] ss:$0 sm:$0xff] }
0x1394   :  { %2185 = vrot.lane.b32.xlu1 %v2183_v61, %s3882_s20 }
0x13b7   :  { %v1866_v45 = vpop.permute.xlu2 %1865 }
0x13b8   :  { %v1868_v8 = vadd.f32 %v1866_v45, %v4590_v1  ;;  %v1876_v1 = vmul.f32 %v4594_v38, %v4549_v30  ;;  %v2190_v38 = vsub.f32 1.0, %v2181_v41 }
0x13ba   :  { %3700 = vtanh.f32 %v1868_v8 }
0x13c0   :  { %v3701_v59 = vpop.eup %3700 }
0x13c1   :  { %1872 = vrot.lane.b32.xlu2 %v3701_v59, %s3889_s28 }
0x13f6   :  { %v2002_v63 = vpop.permute.xlu0 %2001 }
0x13f7   :  { %v2004_v11 = vadd.f32 %v2002_v63, %v1957_v24 }
0x13f9   :  { %3702 = vtanh.f32 %v2004_v11 }
0x13ff   :  { %v3703_v46 = vpop.eup %3702 }
0x1400   :  { %2008 = vrot.lane.b32.xlu0 %v3703_v46, %s3889_s28 }
0x1406   :  { %v2186_v48 = vpop.permute.xlu1 %2185 }
0x1407   :  { %v2188_v25 = vadd.f32 %v2186_v48, %v2129_v17 }
0x1409   :  { %3704 = vtanh.f32 %v2188_v25 }
0x140f   :  { %v3705_v56 = vpop.eup %3704 }
0x1410   :  { %2192 = vrot.lane.b32.xlu1 %v3705_v56, %s3889_s28 }
0x141b   :  { %v1873_v53 = vpop.permute.xlu2 %1872 }
0x141c   :  { %v1875_v29 = vmul.f32 %v1873_v53, %v1870_v9 }
0x141e   :  { %v4614_v47 = vadd.f32 %v1876_v1, %v1875_v29  ;;  %v3800_v1 = vld [vmem:[#allocation5 + $0x38] ss:$0 sm:$0xff] }
0x1420   :  { %v2036_v24 = vpack.c.bf16 %v4614_v47, %v4614_v47 }
0x1422   :  { %2038 = vrot.lane.b32.xlu2 %v2036_v24, %s3889_s28 }
0x1472   :  { %v2009_v42 = vpop.permute.xlu0 %2008 }
0x1473   :  { %v2011_v26 = vmul.f32 %v2009_v42, %v2006_v54 }
0x1475   :  { %v4620_v49 = vadd.f32 %v2012_v62, %v2011_v26 }
0x1477   :  { %2015 = vrot.lane.b32.xlu0 %v4620_v49, %s3889_s28  ;;  %v2244_v30 = vpack.c.bf16 %v4620_v49, %v4620_v49 }
0x147c   :  { %v2039_v17 = vpop.permute.xlu2 %2038 }
0x147d   :  { %3358 = vmatmul.msk.bf16.vlgmr.msrb.gmra.mxu2 %vm195_vm0, %v2039_v17 }
0x147e   :  { %2458 = vmatpush.bf16.msrb.mxu2 %v4565_v16 }
0x147f   :  { %2246 = vrot.lane.b32.xlu0 %v2244_v30, %s3889_s28 }
0x1482   :  { %v2193_v20 = vpop.permute.xlu1 %2192  ;;  %2459 = vmatpush.bf16.msrb.mxu2 %v4576_v13 }
0x1483   :  { %v2195_v43 = vmul.f32 %v2193_v20, %v2190_v38  ;;  %v4668_v38 = vld [vmem:[#allocation5 + $0x58] ss:$0 sm:$0xff] }
0x1485   :  { %v4629_v12 = vadd.f32 %v2196_v18, %v2195_v43 }
0x1487   :  { %2199 = vrot.lane.b32.xlu1 %v4629_v12, %s3889_s28 }
0x14e9   :  { %v2016_v5 = vpop.permute.xlu0 %2015 }
0x14ea   :  { %v2018_v22 = vsel %vm195_vm0, %v2016_v5, %v4614_v47 }
0x14eb   :  { %v2019_v14 = vpack.c.bf16 %v2018_v22, %v2018_v22 }
0x14ed   :  { %3357 = vmatmul.msk.bf16.vlgmr.msrb.gmra.mxu3 %vm425_vm5, %v2019_v14 }
0x14ee   :  { %2436 = vmatpush.bf16.msrb.mxu3 %v4560_v0 }
0x14f1   :  { %v2247_v21 = vpop.permute.xlu0 %2246 }
0x14f2   :  { %3412 = vmatmul.msk.bf16.vlgmr.msra.gmra.mxu2 %vm195_vm0, %v2247_v21  ;;  %2437 = vmatpush.bf16.msrb.mxu3 %v4563_v51 }
0x14f6   :  { %2438 = vmatpush.bf16.msrb.mxu3 %v4568_v7 }
0x14f9   :  { %v2200_v34 = vpop.permute.xlu1 %2199 }
0x14fa   :  { %v2202_v2 = vsel %vm195_vm0, %v2200_v34, %v4620_v49  ;;  %2439 = vmatpush.bf16.msrb.mxu3 %v4572_v33 }
0x14fb   :  { %v2203_v52 = vpack.c.bf16 %v2202_v2, %v2202_v2 }
0x14fd   :  { %3403 = vmatmul.msk.bf16.vlgmr.msra.gmra.mxu3 %vm425_vm5, %v2203_v52 }
0x1500   :  { %v2052_v3 = vpop.f32.mrf.mxu2 }
0x1501   :  { %v2053_v29 = vadd.f32 %v3800_v1, %v2052_v3 }
0x1508   :  { %v2054_v55 = vpop.f32.mrf.mxu2 }
0x1570   :  { %v2032_v31 = vpop.f32.mrf.mxu3 }
0x1571   :  { %v2033_v39 = vadd.f32 %v3799_v35, %v2032_v31 }
0x1573   :  { %v3359_v37 = vmul.f32 -1.442695, %v2033_v39 }
0x1575   :  { %3706 = vpow2.f32 %v3359_v37  ;;  %v2272_v4 = vpop.f32.mrf.mxu2 }
0x1576   :  { %v2273_v22 = vadd.f32 %v4668_v38, %v2272_v4 }
0x1578   :  { %v2034_v44 = vpop.f32.mrf.mxu3 }
0x157b   :  { %v3707_v60 = vpop.eup %3706 }
0x157c   :  { %v2059_v10 = vadd.f32 1.0, %v3707_v60 }
0x157d   :  { %v2274_v50 = vpop.f32.mrf.mxu2 }
0x157e   :  { %3708 = vrcp.f32 %v2059_v10  ;;  %v2071_v11 = vand.u32 2147483648, %v2059_v10  ;;  %v2069_v48 = vand.u32 2147483647, %v2059_v10  ;;  %vm2065_vm15 = vweird.f32 %v2059_v10  ;;  %v4680_v50 = vld [vmem:[#allocation2 + $0x108] sm:$0xff] }
0x157f   :  { %2381 = vmatpush.bf16.msrb.mxu1 %v4680_v50  ;;  %2610 = vmatpush.bf16.msra.mxu2 %v4680_v50 }
0x1580   :  { %v2240_v40 = vpop.f32.mrf.mxu3  ;;  %v2072_v53 = vor.u32 1.1754944e-38, %v2071_v11  ;;  %vm2070_vm2 = vcmp.eq.f32.partialorder %v2069_v48, 8.507059e+37  ;;  %v4702_v11 = vld [vmem:[#allocation2 + $0xe8] sm:$0xff] }
0x1581   :  { %v2241_v41 = vadd.f32 %v4664_v57, %v2240_v40  ;;  %v4683_v40 = vld [vmem:[#allocation2 + $0x100] sm:$0xff] }
0x1583   :  { %v3413_v61 = vmul.f32 -1.442695, %v2241_v41  ;;  %2382 = vmatpush.bf16.msrb.mxu1 %v4683_v40  ;;  %2611 = vmatpush.bf16.msra.mxu2 %v4683_v40 }
0x1584   :  { %v3709_v45 = vpop.eup %3708 }
0x1585   :  { %3710 = vpow2.f32 %v3413_v61  ;;  %v2061_v8 = vmul.f32 %v3709_v45, %v2059_v10  ;;  %vm2066_vm14 = vweird.f32 %v3709_v45 }
0x1586   :  { %vm2067_vm1 = vmor %vm2065_vm15, %vm2066_vm14 }
0x1587   :  { %v2062_v59 = vsub.f32 1.0, %v2061_v8  ;;  %2534 = vmatpush.bf16.msra.mxu1 %v4633_v6 }
0x1588   :  { %v2242_v63 = vpop.f32.mrf.mxu3 }
0x1589   :  { %v2063_v46 = vmul.f32 %v3709_v45, %v2062_v59  ;;  %v4695_v59 = vld [vmem:[#allocation2 + $0xf8] sm:$0xff]  ;;  %v4698_v63 = vld [vmem:[#allocation2 + $0xf0] sm:$0xff] }
0x158a   :  { %2347 = vmatpush.bf16.msra.mxu0 %v4695_v59  ;;  %2588 = vmatpush.bf16.msra.mxu3 %v4695_v59 }
0x158b   :  { %v3711_v25 = vpop.eup %3710  ;;  %v2064_v56 = vadd.f32 %v3709_v45, %v2063_v46  ;;  %2535 = vmatpush.bf16.msra.mxu1 %v4638_v27  ;;  %v4706_v46 = vld [vmem:[#allocation2 + $0xe0] sm:$0xff] }
0x158c   :  { %v2279_v9 = vadd.f32 1.0, %v3711_v25 }
0x158d   :  { %v2068_v24 = vsel %vm2067_vm1, %v3709_v45, %v2064_v56 }
0x158e   :  { %3712 = vrcp.f32 %v2279_v9  ;;  %v2073_v54 = vsel %vm2070_vm2, %v2072_v53, %v2068_v24  ;;  %v2291_v30 = vand.u32 2147483648, %v2279_v9  ;;  %v2289_v18 = vand.u32 2147483647, %v2279_v9  ;;  %2348 = vmatpush.bf16.msra.mxu0 %v4698_v63  ;;  %2589 = vmatpush.bf16.msra.mxu3 %v4698_v63 }
0x158f   :  { %v2075_v42 = vmul.f32 %v2073_v54, %v2053_v29  ;;  %vm2285_vm4 = vweird.f32 %v2279_v9  ;;  %v2082_v37 = vsub.f32 1.0, %v2073_v54  ;;  %v2088_v44 = vmul.f32 %v2073_v54, %v4614_v47  ;;  %v4728_v29 = vld [vmem:[#allocation5 + $0x60] ss:$0 sm:$0xff] }
0x1590   :  { %v2292_v5 = vor.u32 1.1754944e-38, %v2291_v30  ;;  %vm2290_vm7 = vcmp.eq.f32.partialorder %v2289_v18, 8.507059e+37 }
0x1591   :  { %2077 = vrot.lane.b32.xlu2 %v2075_v42, %s3882_s20 }
0x1592   :  { %2349 = vmatpush.bf16.msra.mxu0 %v4702_v11  ;;  %2590 = vmatpush.bf16.msra.mxu3 %v4702_v11 }
0x1594   :  { %v3713_v62 = vpop.eup %3712 }
0x1595   :  { %v2281_v26 = vmul.f32 %v3713_v62, %v2279_v9  ;;  %vm2286_vm3 = vweird.f32 %v3713_v62 }
0x1596   :  { %vm2287_vm6 = vmor %vm2285_vm4, %vm2286_vm3  ;;  %2350 = vmatpush.bf16.msra.mxu0 %v4706_v46  ;;  %2591 = vmatpush.bf16.msra.mxu3 %v4706_v46 }
0x1597   :  { %v2282_v17 = vsub.f32 1.0, %v2281_v26 }
0x1599   :  { %v2283_v20 = vmul.f32 %v3713_v62, %v2282_v17 }
0x159a   :  { %2512 = vmatpush.bf16.msrb.mxu0 %v4636_v32 }
0x159b   :  { %v2284_v43 = vadd.f32 %v3713_v62, %v2283_v20 }
0x159d   :  { %v2288_v14 = vsel %vm2287_vm6, %v3713_v62, %v2284_v43 }
0x159e   :  { %v2293_v21 = vsel %vm2290_vm7, %v2292_v5, %v2288_v14  ;;  %2513 = vmatpush.bf16.msrb.mxu0 %v4641_v58  ;;  %v4731_v5 = vld [vmem:[#allocation5 + $0x68] ss:$0 sm:$0xff] }
0x159f   :  { %v2295_v34 = vmul.f32 %v2293_v21, %v2273_v22  ;;  %v2302_v47 = vsub.f32 1.0, %v2293_v21  ;;  %v2308_v61 = vmul.f32 %v2293_v21, %v4620_v49 }
0x15a1   :  { %2297 = vrot.lane.b32.xlu1 %v2295_v34, %s3882_s20 }
0x15a2   :  { %2514 = vmatpush.bf16.msrb.mxu0 %v4646_v28 }
0x15a6   :  { %2515 = vmatpush.bf16.msrb.mxu0 %v4650_v19 }
0x15eb   :  { %v2078_v2 = vpop.permute.xlu2 %2077 }
0x15ec   :  { %v2080_v52 = vadd.f32 %v2078_v2, %v2033_v39 }
0x15ee   :  { %3714 = vtanh.f32 %v2080_v52 }
0x15f4   :  { %v3715_v3 = vpop.eup %3714 }
0x15f5   :  { %2084 = vrot.lane.b32.xlu1 %v3715_v3, %s3889_s28 }
0x1613   :  { %v2298_v55 = vpop.permute.xlu1 %2297 }
0x1614   :  { %v2300_v31 = vadd.f32 %v2298_v55, %v2241_v41 }
0x1616   :  { %3716 = vtanh.f32 %v2300_v31  ;;  %v2445_v31 = vpack.c.bf16 %v4629_v12, %v4629_v12 }
0x161c   :  { %v3717_v35 = vpop.eup %3716 }
0x161d   :  { %2304 = vrot.lane.b32.xlu0 %v3717_v35, %s3889_s28 }
0x1667   :  { %v2085_v4 = vpop.permute.xlu1 %2084 }
0x1668   :  { %v2087_v60 = vmul.f32 %v2085_v4, %v2082_v37 }
0x166a   :  { %v4675_v10 = vadd.f32 %v2088_v44, %v2087_v60 }
0x166c   :  { %v2356_v39 = vpack.c.bf16 %v4675_v10, %v4675_v10 }
0x166e   :  { %2358 = vrot.lane.b32.xlu0 %v2356_v39, %s3889_s28 }
0x168f   :  { %v2305_v41 = vpop.permute.xlu0 %2304 }
0x1690   :  { %v2307_v45 = vmul.f32 %v2305_v41, %v2302_v47 }
0x1692   :  { %v4691_v8 = vadd.f32 %v2308_v61, %v2307_v45 }
0x1694   :  { %2311 = vrot.lane.b32.xlu2 %v4691_v8, %s3889_s28 }
0x16e0   :  { %v4715_v48 = vpop.permute.xlu0 %2358 }
0x16e1   :  { %3439 = vmatmul.msk.bf16.vlgmr.msrb.gmra.mxu1 %vm195_vm0, %v4715_v48 }
0x16e2   :  { %2687 = vmatpush.bf16.msrb.mxu1 %v4565_v16 }
0x16e6   :  { %2688 = vmatpush.bf16.msrb.mxu1 %v4576_v13 }
0x16ee   :  { %v2312_v25 = vpop.permute.xlu2 %2311 }
0x16ef   :  { %v2314_v56 = vsel %vm195_vm0, %v2312_v25, %v4675_v10 }
0x16f0   :  { %v2315_v9 = vpack.c.bf16 %v2314_v56, %v2314_v56 }
0x16f2   :  { %3430 = vmatmul.msk.bf16.vlgmr.msra.gmra.mxu0 %vm425_vm5, %v2315_v9 }
0x16f3   :  { %2665 = vmatpush.bf16.msra.mxu0 %v4560_v0 }
0x16f7   :  { %2666 = vmatpush.bf16.msra.mxu0 %v4563_v51 }
0x16fb   :  { %2667 = vmatpush.bf16.msra.mxu0 %v4568_v7 }
0x16ff   :  { %2668 = vmatpush.bf16.msra.mxu0 %v4572_v33 }
0x175e   :  { %v2384_v53 = vpop.f32.mrf.mxu1 }
0x175f   :  { %v2385_v2 = vadd.f32 %v4731_v5, %v2384_v53 }
0x1766   :  { %v2386_v1 = vpop.f32.mrf.mxu1 }
0x176f   :  { %v2352_v24 = vpop.f32.mrf.mxu0 }
0x1770   :  { %v2353_v54 = vadd.f32 %v4728_v29, %v2352_v24 }
0x1772   :  { %v3440_v42 = vmul.f32 -1.442695, %v2353_v54 }
0x1774   :  { %3718 = vpow2.f32 %v3440_v42 }
0x1777   :  { %v2354_v62 = vpop.f32.mrf.mxu0 }
0x177a   :  { %v3719_v26 = vpop.eup %3718 }
0x177b   :  { %v2391_v17 = vadd.f32 1.0, %v3719_v26 }
0x177d   :  { %3720 = vrcp.f32 %v2391_v17  ;;  %v2403_v43 = vand.u32 2147483648, %v2391_v17  ;;  %v2401_v14 = vand.u32 2147483647, %v2391_v17  ;;  %vm2397_vm9 = vweird.f32 %v2391_v17 }
0x177f   :  { %v2404_v34 = vor.u32 1.1754944e-38, %v2403_v43  ;;  %vm2402_vm11 = vcmp.eq.f32.partialorder %v2401_v14, 8.507059e+37 }
0x1783   :  { %v3721_v30 = vpop.eup %3720 }
0x1784   :  { %v2393_v20 = vmul.f32 %v3721_v30, %v2391_v17  ;;  %vm2398_vm8 = vweird.f32 %v3721_v30 }
0x1785   :  { %vm2399_vm10 = vmor %vm2397_vm9, %vm2398_vm8 }
0x1786   :  { %v2394_v18 = vsub.f32 1.0, %v2393_v20 }
0x1788   :  { %v2395_v22 = vmul.f32 %v3721_v30, %v2394_v18 }
0x178a   :  { %v2396_v21 = vadd.f32 %v3721_v30, %v2395_v22 }
0x178c   :  { %v2400_v52 = vsel %vm2399_vm10, %v3721_v30, %v2396_v21 }
0x178d   :  { %v2405_v3 = vsel %vm2402_vm11, %v2404_v34, %v2400_v52 }
0x178e   :  { %v2407_v55 = vmul.f32 %v2405_v3, %v2385_v2  ;;  %v2414_v60 = vsub.f32 1.0, %v2405_v3  ;;  %v2420_v47 = vmul.f32 %v2405_v3, %v4675_v10 }
0x1790   :  { %2409 = vrot.lane.b32.xlu1 %v2407_v55, %s3882_s20  ;;  %v2521_v55 = vpack.c.bf16 %v4691_v8, %v4691_v8 }
0x1798   :  { %2447 = vrot.lane.b32.xlu1 %v2445_v31, %s3889_s28 }
0x1802   :  { %v2410_v35 = vpop.permute.xlu1 %2409 }
0x1803   :  { %v2412_v37 = vadd.f32 %v2410_v35, %v2353_v54 }
0x1805   :  { %3722 = vtanh.f32 %v2412_v37 }
0x180a   :  { %v2448_v4 = vpop.permute.xlu1 %2447 }
0x180b   :  { %v3723_v44 = vpop.eup %3722  ;;  %3442 = vmatmul.msk.bf16.vlgmr.msrb.gmra.mxu2 %vm195_vm0, %v2448_v4 }
0x180c   :  { %2416 = vrot.lane.b32.xlu2 %v3723_v44, %s3889_s28  ;;  %2763 = vmatpush.bf16.msrb.mxu2 %v4633_v6 }
0x1810   :  { %2764 = vmatpush.bf16.msrb.mxu2 %v4638_v27 }
0x1866   :  { %v2417_v39 = vpop.permute.xlu2 %2416 }
0x1867   :  { %v2419_v41 = vmul.f32 %v2417_v39, %v2414_v60 }
0x1869   :  { %v4743_v61 = vadd.f32 %v2420_v47, %v2419_v41 }
0x186b   :  { %v2422_v45 = vmax.f32 %v4743_v61, 0.0 }
0x186d   :  { %2424 = vrot.lane.b32.xlu0 %v2422_v45, %s3889_s28 }
0x188e   :  { %v2461_v25 = vpop.f32.mrf.mxu2 }
0x188f   :  { %v2462_v34 = vadd.f32 %v4603_v23, %v2461_v25 }
0x1896   :  { %v2463_v56 = vpop.f32.mrf.mxu2 }
0x18df   :  { %v2425_v9 = vpop.permute.xlu0 %2424 }
0x18e0   :  { %v2427_v53 = vsel %vm195_vm0, %v2425_v9, %v4629_v12 }
0x18e1   :  { %v2428_v1 = vpack.c.bf16 %v2427_v53, %v2427_v53 }
0x18e3   :  { %3441 = vmatmul.msk.bf16.vlgmr.msrb.gmra.mxu3 %vm425_vm5, %v2428_v1 }
0x18e4   :  { %2741 = vmatpush.bf16.msrb.mxu3 %v4636_v32 }
0x18e8   :  { %2742 = vmatpush.bf16.msrb.mxu3 %v4641_v58 }
0x18ec   :  { %2743 = vmatpush.bf16.msrb.mxu3 %v4646_v28 }
0x18f0   :  { %2744 = vmatpush.bf16.msrb.mxu3 %v4650_v19 }
0x1966   :  { %v2441_v10 = vpop.f32.mrf.mxu3 }
0x1967   :  { %v2442_v24 = vadd.f32 %v4599_v15, %v2441_v10 }
0x1969   :  { %v3443_v54 = vmul.f32 -1.442695, %v2442_v24 }
0x196b   :  { %3724 = vpow2.f32 %v3443_v54 }
0x196e   :  { %v2443_v42 = vpop.f32.mrf.mxu3 }
0x1971   :  { %v3725_v62 = vpop.eup %3724 }
0x1972   :  { %v2468_v26 = vadd.f32 1.0, %v3725_v62 }
0x1974   :  { %3726 = vrcp.f32 %v2468_v26  ;;  %v2480_v18 = vand.u32 2147483648, %v2468_v26  ;;  %v2478_v22 = vand.u32 2147483647, %v2468_v26  ;;  %vm2474_vm13 = vweird.f32 %v2468_v26 }
0x1976   :  { %v2481_v21 = vor.u32 1.1754944e-38, %v2480_v18  ;;  %vm2479_vm15 = vcmp.eq.f32.partialorder %v2478_v22, 8.507059e+37 }
0x197a   :  { %v3727_v17 = vpop.eup %3726 }
0x197b   :  { %v2470_v30 = vmul.f32 %v3727_v17, %v2468_v26  ;;  %vm2475_vm12 = vweird.f32 %v3727_v17 }
0x197c   :  { %vm2476_vm14 = vmor %vm2474_vm13, %vm2475_vm12 }
0x197d   :  { %v2471_v20 = vsub.f32 1.0, %v2470_v30 }
0x197f   :  { %v2472_v43 = vmul.f32 %v3727_v17, %v2471_v20 }
0x1981   :  { %v2473_v14 = vadd.f32 %v3727_v17, %v2472_v43 }
0x1983   :  { %v2477_v2 = vsel %vm2476_vm14, %v3727_v17, %v2473_v14 }
0x1984   :  { %v2482_v52 = vsel %vm2479_vm15, %v2481_v21, %v2477_v2 }
0x1985   :  { %v2484_v3 = vmul.f32 %v2482_v52, %v2462_v34  ;;  %v2491_v44 = vsub.f32 1.0, %v2482_v52  ;;  %v2497_v39 = vmul.f32 %v2482_v52, %v4629_v12 }
0x1987   :  { %2486 = vrot.lane.b32.xlu2 %v2484_v3, %s3882_s20  ;;  %v2597_v3 = vpack.c.bf16 %v4743_v61, %v4743_v61 }
0x198f   :  { %2523 = vrot.lane.b32.xlu2 %v2521_v55, %s3889_s28 }
0x19e1   :  { %v2487_v31 = vpop.permute.xlu2 %2486 }
0x19e2   :  { %v2489_v35 = vadd.f32 %v2487_v31, %v2442_v24 }
0x19e4   :  { %3728 = vtanh.f32 %v2489_v35 }
0x19e9   :  { %v2524_v37 = vpop.permute.xlu2 %2523 }
0x19ea   :  { %v3729_v4 = vpop.eup %3728  ;;  %3445 = vmatmul.msk.bf16.vlgmr.msra.gmra.mxu1 %vm195_vm0, %v2524_v37 }
0x19eb   :  { %2493 = vrot.lane.b32.xlu0 %v3729_v4, %s3889_s28  ;;  %2839 = vmatpush.bf16.msra.mxu1 %v4680_v50 }
0x19ef   :  { %2840 = vmatpush.bf16.msra.mxu1 %v4683_v40 }
0x1a5d   :  { %v2494_v60 = vpop.permute.xlu0 %2493 }
0x1a5e   :  { %v2496_v47 = vmul.f32 %v2494_v60, %v2491_v44 }
0x1a60   :  { %v4767_v41 = vadd.f32 %v2497_v39, %v2496_v47 }
0x1a62   :  { %2500 = vrot.lane.b32.xlu1 %v4767_v41, %s3889_s28 }
0x1a67   :  { %v2537_v25 = vpop.f32.mrf.mxu1 }
0x1a68   :  { %v2538_v21 = vadd.f32 %v4668_v38, %v2537_v25 }
0x1a6f   :  { %v2539_v56 = vpop.f32.mrf.mxu1 }
0x1ad4   :  { %v2501_v9 = vpop.permute.xlu1 %2500 }
0x1ad5   :  { %v2503_v53 = vsel %vm195_vm0, %v2501_v9, %v4691_v8 }
0x1ad6   :  { %v2504_v1 = vpack.c.bf16 %v2503_v53, %v2503_v53 }
0x1ad8   :  { %3444 = vmatmul.msk.bf16.vlgmr.msrb.gmra.mxu0 %vm425_vm5, %v2504_v1 }
0x1ad9   :  { %2817 = vmatpush.bf16.msrb.mxu0 %v4695_v59 }
0x1add   :  { %2818 = vmatpush.bf16.msrb.mxu0 %v4698_v63 }
0x1ae1   :  { %2819 = vmatpush.bf16.msrb.mxu0 %v4702_v11 }
0x1ae5   :  { %2820 = vmatpush.bf16.msrb.mxu0 %v4706_v46 }
0x1b55   :  { %v2517_v12 = vpop.f32.mrf.mxu0 }
0x1b56   :  { %v2518_v10 = vadd.f32 %v4664_v57, %v2517_v12 }
0x1b58   :  { %v3446_v24 = vmul.f32 -1.442695, %v2518_v10 }
0x1b5a   :  { %3730 = vpow2.f32 %v3446_v24 }
0x1b5d   :  { %v2519_v54 = vpop.f32.mrf.mxu0 }
0x1b60   :  { %v3731_v42 = vpop.eup %3730 }
0x1b61   :  { %v2544_v62 = vadd.f32 1.0, %v3731_v42 }
0x1b63   :  { %3732 = vrcp.f32 %v2544_v62  ;;  %v2556_v20 = vand.u32 2147483648, %v2544_v62  ;;  %v2554_v43 = vand.u32 2147483647, %v2544_v62  ;;  %vm2550_vm2 = vweird.f32 %v2544_v62 }
0x1b65   :  { %v2557_v14 = vor.u32 1.1754944e-38, %v2556_v20  ;;  %vm2555_vm4 = vcmp.eq.f32.partialorder %v2554_v43, 8.507059e+37  ;;  %v2674_v43 = vpack.c.bf16 %v4767_v41, %v4767_v41 }
0x1b69   :  { %v3733_v26 = vpop.eup %3732 }
0x1b6a   :  { %v2546_v17 = vmul.f32 %v3733_v26, %v2544_v62  ;;  %vm2551_vm1 = vweird.f32 %v3733_v26 }
0x1b6b   :  { %vm2552_vm3 = vmor %vm2550_vm2, %vm2551_vm1 }
0x1b6c   :  { %v2547_v30 = vsub.f32 1.0, %v2546_v17 }
0x1b6e   :  { %v2548_v18 = vmul.f32 %v3733_v26, %v2547_v30 }
0x1b70   :  { %v2549_v22 = vadd.f32 %v3733_v26, %v2548_v18 }
0x1b72   :  { %v2553_v34 = vsel %vm2552_vm3, %v3733_v26, %v2549_v22 }
0x1b73   :  { %v2558_v2 = vsel %vm2555_vm4, %v2557_v14, %v2553_v34 }
0x1b74   :  { %v2560_v52 = vmul.f32 %v2558_v2, %v2538_v21  ;;  %v2567_v4 = vsub.f32 1.0, %v2558_v2  ;;  %v2573_v60 = vmul.f32 %v2558_v2, %v4691_v8 }
0x1b76   :  { %2562 = vrot.lane.b32.xlu0 %v2560_v52, %s3882_s20 }
0x1b7e   :  { %2599 = vrot.lane.b32.xlu0 %v2597_v3, %s3889_s28 }
0x1be8   :  { %v2563_v55 = vpop.permute.xlu0 %2562 }
0x1be9   :  { %v2565_v31 = vadd.f32 %v2563_v55, %v2518_v10 }
0x1beb   :  { %3734 = vtanh.f32 %v2565_v31 }
0x1bf0   :  { %v2600_v35 = vpop.permute.xlu0 %2599 }
0x1bf1   :  { %v3735_v37 = vpop.eup %3734  ;;  %3448 = vmatmul.msk.bf16.vlgmr.msra.gmra.mxu2 %vm195_vm0, %v2600_v35 }
0x1bf2   :  { %2569 = vrot.lane.b32.xlu1 %v3735_v37, %s3889_s28  ;;  %2916 = vmatpush.bf16.msra.mxu2 %v4565_v16 }
0x1bf6   :  { %2917 = vmatpush.bf16.msra.mxu2 %v4576_v13 }
0x1c64   :  { %v2570_v44 = vpop.permute.xlu1 %2569 }
0x1c65   :  { %v2572_v39 = vmul.f32 %v2570_v44, %v2567_v4 }
0x1c67   :  { %v4789_v47 = vadd.f32 %v2573_v60, %v2572_v39 }
0x1c69   :  { %2576 = vrot.lane.b32.xlu2 %v4789_v47, %s3889_s28 }
0x1c74   :  { %v2613_v25 = vpop.f32.mrf.mxu2 }
0x1c7c   :  { %v2615_v56 = vpop.f32.mrf.mxu2 }
0x1cc3   :  { %v2577_v9 = vpop.permute.xlu2 %2576 }
0x1cc4   :  { %v2579_v53 = vsel %vm195_vm0, %v2577_v9, %v4743_v61 }
0x1cc5   :  { %v2580_v1 = vpack.c.bf16 %v2579_v53, %v2579_v53 }
0x1cc7   :  { %3447 = vmatmul.msk.bf16.vlgmr.msra.gmra.mxu3 %vm425_vm5, %v2580_v1 }
0x1cc8   :  { %2894 = vmatpush.bf16.msra.mxu3 %v4560_v0 }
0x1ccc   :  { %2895 = vmatpush.bf16.msra.mxu3 %v4563_v51 }
0x1cd0   :  { %2896 = vmatpush.bf16.msra.mxu3 %v4568_v7 }
0x1cd4   :  { %2897 = vmatpush.bf16.msra.mxu3 %v4572_v33  ;;  %v2614_v33 = vadd.f32 %v4731_v5, %v2613_v25 }
0x1d4a   :  { %v2593_v16 = vpop.f32.mrf.mxu3 }
0x1d4b   :  { %v2594_v13 = vadd.f32 %v4728_v29, %v2593_v16 }
0x1d4d   :  { %v3449_v8 = vmul.f32 -1.442695, %v2594_v13 }
0x1d4f   :  { %3736 = vpow2.f32 %v3449_v8 }
0x1d52   :  { %v2595_v12 = vpop.f32.mrf.mxu3 }
0x1d55   :  { %v3737_v10 = vpop.eup %3736 }
0x1d56   :  { %v2620_v24 = vadd.f32 1.0, %v3737_v10 }
0x1d58   :  { %3738 = vrcp.f32 %v2620_v24  ;;  %v2632_v26 = vand.u32 2147483648, %v2620_v24  ;;  %v2630_v51 = vand.u32 2147483647, %v2620_v24  ;;  %vm2626_vm7 = vweird.f32 %v2620_v24 }
0x1d5a   :  { %v2633_v7 = vor.u32 1.1754944e-38, %v2632_v26  ;;  %vm2631_vm9 = vcmp.eq.f32.partialorder %v2630_v51, 8.507059e+37 }
0x1d5e   :  { %v3739_v54 = vpop.eup %3738 }
0x1d5f   :  { %v2622_v42 = vmul.f32 %v3739_v54, %v2620_v24  ;;  %vm2627_vm6 = vweird.f32 %v3739_v54 }
0x1d60   :  { %vm2628_vm8 = vmor %vm2626_vm7, %vm2627_vm6 }
0x1d61   :  { %v2623_v62 = vsub.f32 1.0, %v2622_v42 }
0x1d63   :  { %v2624_v0 = vmul.f32 %v3739_v54, %v2623_v62 }
0x1d65   :  { %v2625_v17 = vadd.f32 %v3739_v54, %v2624_v0 }
0x1d67   :  { %v2629_v30 = vsel %vm2628_vm8, %v3739_v54, %v2625_v17  ;;  %v2750_v54 = vpack.c.bf16 %v4789_v47, %v4789_v47 }
0x1d68   :  { %v2634_v20 = vsel %vm2631_vm9, %v2633_v7, %v2629_v30 }
0x1d69   :  { %v2636_v18 = vmul.f32 %v2634_v20, %v2614_v33  ;;  %v2643_v2 = vsub.f32 1.0, %v2634_v20  ;;  %v2649_v3 = vmul.f32 %v2634_v20, %v4743_v61 }
0x1d6b   :  { %2638 = vrot.lane.b32.xlu1 %v2636_v18, %s3882_s20 }
0x1d73   :  { %2676 = vrot.lane.b32.xlu1 %v2674_v43, %s3889_s28 }
0x1ddd   :  { %v2639_v22 = vpop.permute.xlu1 %2638 }
0x1dde   :  { %v2641_v14 = vadd.f32 %v2639_v22, %v2594_v13 }
0x1de0   :  { %3740 = vtanh.f32 %v2641_v14 }
0x1de5   :  { %v2677_v21 = vpop.permute.xlu1 %2676 }
0x1de6   :  { %v3741_v34 = vpop.eup %3740  ;;  %3451 = vmatmul.msk.bf16.vlgmr.msrb.gmra.mxu1 %vm195_vm0, %v2677_v21 }
0x1de7   :  { %2645 = vrot.lane.b32.xlu2 %v3741_v34, %s3889_s28  ;;  %2992 = vmatpush.bf16.msrb.mxu1 %v4633_v6 }
0x1deb   :  { %2993 = vmatpush.bf16.msrb.mxu1 %v4638_v27 }
0x1e41   :  { %v2646_v52 = vpop.permute.xlu2 %2645 }
0x1e42   :  { %v2648_v55 = vmul.f32 %v2646_v52, %v2643_v2 }
0x1e44   :  { %v4811_v31 = vadd.f32 %v2649_v3, %v2648_v55 }
0x1e46   :  { %v2651_v35 = vmax.f32 %v4811_v31, 0.0 }
0x1e48   :  { %2653 = vrot.lane.b32.xlu0 %v2651_v35, %s3889_s28 }
0x1e63   :  { %v2690_v37 = vpop.f32.mrf.mxu1 }
0x1e6b   :  { %v2692_v4 = vpop.f32.mrf.mxu1 }
0x1eba   :  { %v2654_v44 = vpop.permute.xlu0 %2653 }
0x1ebb   :  { %v2656_v6 = vsel %vm195_vm0, %v2654_v44, %v4767_v41 }
0x1ebc   :  { %v2657_v27 = vpack.c.bf16 %v2656_v6, %v2656_v6 }
0x1ebe   :  { %3450 = vmatmul.msk.bf16.vlgmr.msra.gmra.mxu0 %vm425_vm5, %v2657_v27  ;;  %v2826_v27 = vpack.c.bf16 %v4811_v31, %v4811_v31 }
0x1ebf   :  { %2970 = vmatpush.bf16.msra.mxu0 %v4636_v32 }
0x1ec3   :  { %2971 = vmatpush.bf16.msra.mxu0 %v4641_v58 }
0x1ec7   :  { %2972 = vmatpush.bf16.msra.mxu0 %v4646_v28 }
0x1ecb   :  { %2973 = vmatpush.bf16.msra.mxu0 %v4650_v19  ;;  %v2691_v19 = vadd.f32 %v4603_v23, %v2690_v37 }
0x1f3b   :  { %v2670_v60 = vpop.f32.mrf.mxu0 }
0x1f3c   :  { %v2671_v39 = vadd.f32 %v4599_v15, %v2670_v60 }
0x1f3e   :  { %v3452_v25 = vmul.f32 -1.442695, %v2671_v39 }
0x1f40   :  { %3742 = vpow2.f32 %v3452_v25 }
0x1f43   :  { %v2672_v56 = vpop.f32.mrf.mxu0 }
0x1f46   :  { %v3743_v9 = vpop.eup %3742 }
0x1f47   :  { %v2697_v53 = vadd.f32 1.0, %v3743_v9 }
0x1f49   :  { %3744 = vrcp.f32 %v2697_v53  ;;  %v2709_v8 = vand.u32 2147483648, %v2697_v53  ;;  %v2707_v58 = vand.u32 2147483647, %v2697_v53  ;;  %vm2703_vm11 = vweird.f32 %v2697_v53 }
0x1f4b   :  { %v2710_v28 = vor.u32 1.1754944e-38, %v2709_v8  ;;  %vm2708_vm13 = vcmp.eq.f32.partialorder %v2707_v58, 8.507059e+37 }
0x1f4f   :  { %v3745_v1 = vpop.eup %3744 }
0x1f50   :  { %v2699_v16 = vmul.f32 %v3745_v1, %v2697_v53  ;;  %vm2704_vm10 = vweird.f32 %v3745_v1 }
0x1f51   :  { %vm2705_vm12 = vmor %vm2703_vm11, %vm2704_vm10 }
0x1f52   :  { %v2700_v13 = vsub.f32 1.0, %v2699_v16 }
0x1f54   :  { %v2701_v32 = vmul.f32 %v3745_v1, %v2700_v13 }
0x1f56   :  { %v2702_v12 = vadd.f32 %v3745_v1, %v2701_v32 }
0x1f58   :  { %v2706_v15 = vsel %vm2705_vm12, %v3745_v1, %v2702_v12 }
0x1f59   :  { %v2711_v10 = vsel %vm2708_vm13, %v2710_v28, %v2706_v15 }
0x1f5a   :  { %v2713_v24 = vmul.f32 %v2711_v10, %v2691_v19  ;;  %v2720_v23 = vsub.f32 1.0, %v2711_v10  ;;  %v2726_v17 = vmul.f32 %v2711_v10, %v4767_v41 }
0x1f5c   :  { %2715 = vrot.lane.b32.xlu2 %v2713_v24, %s3882_s20 }
0x1f64   :  { %2752 = vrot.lane.b32.xlu2 %v2750_v54, %s3889_s28 }
0x1fb6   :  { %v2716_v42 = vpop.permute.xlu2 %2715 }
0x1fb7   :  { %v2718_v62 = vadd.f32 %v2716_v42, %v2671_v39 }
0x1fb9   :  { %3746 = vtanh.f32 %v2718_v62 }
0x1fbe   :  { %v2753_v26 = vpop.permute.xlu2 %2752 }
0x1fbf   :  { %v3747_v0 = vpop.eup %3746  ;;  %3454 = vmatmul.msk.bf16.vlgmr.msrb.gmra.mxu2 %vm195_vm0, %v2753_v26 }
0x1fc0   :  { %2722 = vrot.lane.b32.xlu0 %v3747_v0, %s3889_s28  ;;  %3068 = vmatpush.bf16.msrb.mxu2 %v4680_v50 }
0x1fc4   :  { %3069 = vmatpush.bf16.msrb.mxu2 %v4683_v40 }
0x2032   :  { %v2723_v51 = vpop.permute.xlu0 %2722 }
0x2033   :  { %v2725_v7 = vmul.f32 %v2723_v51, %v2720_v23 }
0x2035   :  { %v4835_v33 = vadd.f32 %v2726_v17, %v2725_v7 }
0x2037   :  { %2729 = vrot.lane.b32.xlu1 %v4835_v33, %s3889_s28 }
0x2042   :  { %v2766_v30 = vpop.f32.mrf.mxu2 }
0x204a   :  { %v2768_v20 = vpop.f32.mrf.mxu2 }
0x20a9   :  { %v2730_v18 = vpop.permute.xlu1 %2729 }
0x20aa   :  { %v2732_v43 = vsel %vm195_vm0, %v2730_v18, %v4789_v47 }
0x20ab   :  { %v2733_v22 = vpack.c.bf16 %v2732_v43, %v2732_v43 }
0x20ad   :  { %3453 = vmatmul.msk.bf16.vlgmr.msrb.gmra.mxu3 %vm425_vm5, %v2733_v22  ;;  %v2903_v22 = vpack.c.bf16 %v4835_v33, %v4835_v33 }
0x20ae   :  { %3046 = vmatpush.bf16.msrb.mxu3 %v4695_v59 }
0x20b2   :  { %3047 = vmatpush.bf16.msrb.mxu3 %v4698_v63 }
0x20b6   :  { %3048 = vmatpush.bf16.msrb.mxu3 %v4702_v11 }
0x20ba   :  { %3049 = vmatpush.bf16.msrb.mxu3 %v4706_v46  ;;  %v2767_v46 = vadd.f32 %v4668_v38, %v2766_v30 }
0x2130   :  { %v2746_v50 = vpop.f32.mrf.mxu3 }
0x2131   :  { %v2747_v40 = vadd.f32 %v4664_v57, %v2746_v50 }
0x2133   :  { %v3455_v41 = vmul.f32 -1.442695, %v2747_v40 }
0x2135   :  { %3748 = vpow2.f32 %v3455_v41 }
0x2138   :  { %v2748_v14 = vpop.f32.mrf.mxu3 }
0x213b   :  { %v3749_v21 = vpop.eup %3748 }
0x213c   :  { %v2773_v34 = vadd.f32 1.0, %v3749_v21 }
0x213e   :  { %3750 = vrcp.f32 %v2773_v34  ;;  %v2785_v55 = vand.u32 2147483648, %v2773_v34  ;;  %v2783_v63 = vand.u32 2147483647, %v2773_v34  ;;  %vm2779_vm15 = vweird.f32 %v2773_v34 }
0x2140   :  { %v2786_v11 = vor.u32 1.1754944e-38, %v2785_v55  ;;  %vm2784_vm2 = vcmp.eq.f32.partialorder %v2783_v63, 8.507059e+37 }
0x2144   :  { %v3751_v2 = vpop.eup %3750 }
0x2145   :  { %v2775_v52 = vmul.f32 %v3751_v2, %v2773_v34  ;;  %vm2780_vm14 = vweird.f32 %v3751_v2 }
0x2146   :  { %vm2781_vm1 = vmor %vm2779_vm15, %vm2780_vm14 }
0x2147   :  { %v2776_v3 = vsub.f32 1.0, %v2775_v52 }
0x2149   :  { %v2777_v59 = vmul.f32 %v3751_v2, %v2776_v3 }
0x214b   :  { %v2778_v37 = vadd.f32 %v3751_v2, %v2777_v59 }
0x214d   :  { %v2782_v4 = vsel %vm2781_vm1, %v3751_v2, %v2778_v37 }
0x214e   :  { %v2787_v44 = vsel %vm2784_vm2, %v2786_v11, %v2782_v4 }
0x214f   :  { %v2789_v6 = vmul.f32 %v2787_v44, %v2767_v46  ;;  %v2796_v9 = vsub.f32 1.0, %v2787_v44  ;;  %v2802_v1 = vmul.f32 %v2787_v44, %v4789_v47  ;;  %v3801_v44 = vld [vmem:[#allocation5 + $0x40] ss:$0 sm:$0xff] }
0x2151   :  { %2791 = vrot.lane.b32.xlu0 %v2789_v6, %s3882_s20 }
0x2159   :  { %2828 = vrot.lane.b32.xlu0 %v2826_v27, %s3889_s28 }
0x21c3   :  { %v2792_v60 = vpop.permute.xlu0 %2791 }
0x21c4   :  { %v2794_v39 = vadd.f32 %v2792_v60, %v2747_v40 }
0x21c6   :  { %3752 = vtanh.f32 %v2794_v39 }
0x21cb   :  { %v2829_v25 = vpop.permute.xlu0 %2828 }
0x21cc   :  { %v3753_v56 = vpop.eup %3752  ;;  %3457 = vmatmul.msk.bf16.vlgmr.msra.gmra.mxu1 %vm195_vm0, %v2829_v25 }
0x21cd   :  { %2798 = vrot.lane.b32.xlu1 %v3753_v56, %s3889_s28 }
0x223f   :  { %v2799_v53 = vpop.permute.xlu1 %2798 }
0x2240   :  { %v2801_v16 = vmul.f32 %v2799_v53, %v2796_v9 }
0x2242   :  { %v4855_v13 = vadd.f32 %v2802_v1, %v2801_v16 }
0x2244   :  { %2805 = vrot.lane.b32.xlu2 %v4855_v13, %s3889_s28 }
0x2249   :  { %v2842_v8 = vpop.f32.mrf.mxu1 }
0x224a   :  { %v2843_v30 = vadd.f32 %v4731_v5, %v2842_v8 }
0x2251   :  { %v2844_v32 = vpop.f32.mrf.mxu1 }
0x229e   :  { %v2806_v58 = vpop.permute.xlu2 %2805 }
0x229f   :  { %v2808_v12 = vsel %vm195_vm0, %v2806_v58, %v4811_v31 }
0x22a0   :  { %v2809_v28 = vpack.c.bf16 %v2808_v12, %v2808_v12  ;;  %v3802_v12 = vld [vmem:[#allocation5 + $0x48] ss:$0 sm:$0xff] }
0x22a2   :  { %3456 = vmatmul.msk.bf16.vlgmr.msrb.gmra.mxu0 %vm425_vm5, %v2809_v28 }
0x231f   :  { %v2822_v19 = vpop.f32.mrf.mxu0 }
0x2320   :  { %v2823_v15 = vadd.f32 %v4728_v29, %v2822_v19 }
0x2322   :  { %v3458_v10 = vmul.f32 -1.442695, %v2823_v15 }
0x2324   :  { %3754 = vpow2.f32 %v3458_v10 }
0x2327   :  { %v2824_v47 = vpop.f32.mrf.mxu0 }
0x2328   :  { %v2979_v47 = vpack.c.bf16 %v4855_v13, %v4855_v13 }
0x232a   :  { %v3755_v24 = vpop.eup %3754 }
0x232b   :  { %v2849_v54 = vadd.f32 1.0, %v3755_v24 }
0x232d   :  { %3756 = vrcp.f32 %v2849_v54  ;;  %v2861_v0 = vand.u32 2147483648, %v2849_v54  ;;  %v2859_v51 = vand.u32 2147483647, %v2849_v54  ;;  %vm2855_vm4 = vweird.f32 %v2849_v54 }
0x232f   :  { %v2862_v7 = vor.u32 1.1754944e-38, %v2861_v0  ;;  %vm2860_vm7 = vcmp.eq.f32.partialorder %v2859_v51, 8.507059e+37 }
0x2333   :  { %v3757_v42 = vpop.eup %3756 }
0x2334   :  { %v2851_v62 = vmul.f32 %v3757_v42, %v2849_v54  ;;  %vm2856_vm3 = vweird.f32 %v3757_v42 }
0x2335   :  { %vm2857_vm6 = vmor %vm2855_vm4, %vm2856_vm3 }
0x2336   :  { %v2852_v26 = vsub.f32 1.0, %v2851_v62 }
0x2338   :  { %v2853_v23 = vmul.f32 %v3757_v42, %v2852_v26 }
0x233a   :  { %v2854_v17 = vadd.f32 %v3757_v42, %v2853_v23 }
0x233c   :  { %v2858_v20 = vsel %vm2857_vm6, %v3757_v42, %v2854_v17 }
0x233d   :  { %v2863_v18 = vsel %vm2860_vm7, %v2862_v7, %v2858_v20 }
0x233e   :  { %v2865_v43 = vmul.f32 %v2863_v18, %v2843_v30  ;;  %v2872_v21 = vsub.f32 1.0, %v2863_v18  ;;  %v2878_v2 = vmul.f32 %v2863_v18, %v4811_v31 }
0x2340   :  { %2867 = vrot.lane.b32.xlu1 %v2865_v43, %s3882_s20 }
0x2348   :  { %2905 = vrot.lane.b32.xlu1 %v2903_v22, %s3889_s28 }
0x23b2   :  { %v2868_v50 = vpop.permute.xlu1 %2867 }
0x23b3   :  { %v2870_v40 = vadd.f32 %v2868_v50, %v2823_v15 }
0x23b5   :  { %3758 = vtanh.f32 %v2870_v40 }
0x23ba   :  { %v2906_v41 = vpop.permute.xlu1 %2905 }
0x23bb   :  { %v3759_v14 = vpop.eup %3758  ;;  %3460 = vmatmul.msk.bf16.vlgmr.msra.gmra.mxu2 %vm195_vm0, %v2906_v41 }
0x23bc   :  { %2874 = vrot.lane.b32.xlu2 %v3759_v14, %s3889_s28 }
0x2416   :  { %v2875_v34 = vpop.permute.xlu2 %2874 }
0x2417   :  { %v2877_v52 = vmul.f32 %v2875_v34, %v2872_v21 }
0x2419   :  { %v4871_v3 = vadd.f32 %v2878_v2, %v2877_v52 }
0x241b   :  { %v2880_v55 = vmax.f32 %v4871_v3, 0.0 }
0x241d   :  { %2882 = vrot.lane.b32.xlu0 %v2880_v55, %s3889_s28 }
0x243e   :  { %v2919_v59 = vpop.f32.mrf.mxu2 }
0x243f   :  { %v2920_v28 = vadd.f32 %v3802_v12, %v2919_v59 }
0x2446   :  { %v2921_v63 = vpop.f32.mrf.mxu2 }
0x248f   :  { %v2883_v37 = vpop.permute.xlu0 %2882 }
0x2490   :  { %v2885_v11 = vsel %vm195_vm0, %v2883_v37, %v4835_v33 }
0x2491   :  { %v2886_v46 = vpack.c.bf16 %v2885_v11, %v2885_v11 }
0x2493   :  { %3459 = vmatmul.msk.bf16.vlgmr.msra.gmra.mxu3 %vm425_vm5, %v2886_v46 }
0x2516   :  { %v2899_v4 = vpop.f32.mrf.mxu3 }
0x2517   :  { %v2900_v6 = vadd.f32 %v3801_v44, %v2899_v4 }
0x2519   :  { %v3461_v27 = vmul.f32 -1.442695, %v2900_v6 }
0x251b   :  { %3760 = vpow2.f32 %v3461_v27  ;;  %v3153_v27 = vpack.c.bf16 %v2651_v35, %v2422_v45 }
0x251e   :  { %v2901_v60 = vpop.f32.mrf.mxu3 }
0x251f   :  { %v3525_v60 = vld [vmem:[#allocation2 + $0x128] sm:$0xff] }
0x2520   :  { %3191 = vmatpush.bf16.msra.mxu1 %v3525_v60 }
0x2521   :  { %v3761_v39 = vpop.eup %3760 }
0x2522   :  { %v2926_v25 = vadd.f32 1.0, %v3761_v39 }
0x2524   :  { %3762 = vrcp.f32 %v2926_v25  ;;  %v2938_v1 = vand.u32 2147483648, %v2926_v25  ;;  %v2936_v8 = vand.u32 2147483647, %v2926_v25  ;;  %vm2932_vm9 = vweird.f32 %v2926_v25 }
0x2526   :  { %v2939_v58 = vor.u32 1.1754944e-38, %v2938_v1  ;;  %vm2937_vm11 = vcmp.eq.f32.partialorder %v2936_v8, 8.507059e+37 }
0x252a   :  { %v3763_v56 = vpop.eup %3762 }
0x252b   :  { %v2928_v9 = vmul.f32 %v3763_v56, %v2926_v25  ;;  %vm2933_vm8 = vweird.f32 %v3763_v56 }
0x252c   :  { %vm2934_vm10 = vmor %vm2932_vm9, %vm2933_vm8 }
0x252d   :  { %v2929_v53 = vsub.f32 1.0, %v2928_v9 }
0x252f   :  { %v2930_v16 = vmul.f32 %v3763_v56, %v2929_v53 }
0x2531   :  { %v2931_v32 = vadd.f32 %v3763_v56, %v2930_v16  ;;  %v4907_v16 = vld [vmem:[#allocation5 + $0x78] ss:$0 sm:$0xff] }
0x2533   :  { %v2935_v19 = vsel %vm2934_vm10, %v3763_v56, %v2931_v32 }
0x2534   :  { %v2940_v15 = vsel %vm2937_vm11, %v2939_v58, %v2935_v19 }
0x2535   :  { %v2942_v10 = vmul.f32 %v2940_v15, %v2920_v28  ;;  %v2949_v26 = vsub.f32 1.0, %v2940_v15  ;;  %v2955_v23 = vmul.f32 %v2940_v15, %v4835_v33 }
0x2537   :  { %2944 = vrot.lane.b32.xlu2 %v2942_v10, %s3882_s20 }
0x253f   :  { %2981 = vrot.lane.b32.xlu2 %v2979_v47, %s3889_s28 }
0x2591   :  { %v2945_v24 = vpop.permute.xlu2 %2944 }
0x2592   :  { %v2947_v54 = vadd.f32 %v2945_v24, %v2900_v6  ;;  %v3055_v6 = vpack.c.bf16 %v4871_v3, %v4871_v3 }
0x2594   :  { %3764 = vtanh.f32 %v2947_v54 }
0x2599   :  { %v2982_v42 = vpop.permute.xlu2 %2981 }
0x259a   :  { %v3765_v62 = vpop.eup %3764  ;;  %3463 = vmatmul.msk.bf16.vlgmr.msrb.gmra.mxu1 %vm195_vm0, %v2982_v42 }
0x259b   :  { %2951 = vrot.lane.b32.xlu0 %v3765_v62, %s3889_s28 }
0x260d   :  { %v2952_v0 = vpop.permute.xlu0 %2951 }
0x260e   :  { %v2954_v51 = vmul.f32 %v2952_v0, %v2949_v26 }
0x2610   :  { %v2956_v17 = vadd.f32 %v2955_v23, %v2954_v51 }
0x2612   :  { %2958 = vrot.lane.b32.xlu1 %v2956_v17, %s3889_s28 }
0x2617   :  { %v2995_v7 = vpop.f32.mrf.mxu1 }
0x2618   :  { %v2996_v46 = vadd.f32 %v4668_v38, %v2995_v7  ;;  %v3524_v38 = vld [vmem:[#allocation2 + $0x120] sm:$0xff] }
0x2619   :  { %3192 = vmatpush.bf16.msra.mxu1 %v3524_v38 }
0x261f   :  { %v2997_v30 = vpop.f32.mrf.mxu1 }
0x2684   :  { %v2959_v20 = vpop.permute.xlu1 %2958 }
0x2685   :  { %v2961_v18 = vsel %vm195_vm0, %v2959_v20, %v4855_v13 }
0x2686   :  { %v2962_v43 = vpack.c.bf16 %v2961_v18, %v2961_v18 }
0x2688   :  { %3462 = vmatmul.msk.bf16.vlgmr.msra.gmra.mxu0 %vm425_vm5, %v2962_v43 }
0x2705   :  { %v2975_v22 = vpop.f32.mrf.mxu0 }
0x2706   :  { %v2976_v50 = vadd.f32 %v4664_v57, %v2975_v22 }
0x2708   :  { %v3464_v40 = vmul.f32 -1.442695, %v2976_v50 }
0x270a   :  { %3766 = vpow2.f32 %v3464_v40  ;;  %v3110_v40 = vpack.c.bf16 %v4620_v49, %v4541_v36 }
0x270d   :  { %v2977_v41 = vpop.f32.mrf.mxu0 }
0x270e   :  { %v3523_v41 = vld [vmem:[#allocation2 + $0x118] sm:$0xff] }
0x270f   :  { %3141 = vmatpush.bf16.msrb.mxu0 %v3523_v41 }
0x2710   :  { %v3767_v33 = vpop.eup %3766 }
0x2711   :  { %v3002_v14 = vadd.f32 1.0, %v3767_v33  ;;  %v3522_v33 = vld [vmem:[#allocation2 + $0x110] sm:$0xff] }
0x2713   :  { %3768 = vrcp.f32 %v3002_v14  ;;  %v3014_v52 = vand.u32 2147483648, %v3002_v14  ;;  %v3012_v63 = vand.u32 2147483647, %v3002_v14  ;;  %vm3008_vm13 = vweird.f32 %v3002_v14  ;;  %3142 = vmatpush.bf16.msrb.mxu0 %v3522_v33 }
0x2715   :  { %v3015_v11 = vor.u32 1.1754944e-38, %v3014_v52  ;;  %vm3013_vm15 = vcmp.eq.f32.partialorder %v3012_v63, 8.507059e+37 }
0x2719   :  { %v3769_v21 = vpop.eup %3768 }
0x271a   :  { %v3004_v34 = vmul.f32 %v3769_v21, %v3002_v14  ;;  %vm3009_vm12 = vweird.f32 %v3769_v21 }
0x271b   :  { %vm3010_vm14 = vmor %vm3008_vm13, %vm3009_vm12 }
0x271c   :  { %v3005_v2 = vsub.f32 1.0, %v3004_v34 }
0x271e   :  { %v3006_v59 = vmul.f32 %v3769_v21, %v3005_v2 }
0x2720   :  { %v3007_v37 = vadd.f32 %v3769_v21, %v3006_v59 }
0x2722   :  { %v3011_v57 = vsel %vm3010_vm14, %v3769_v21, %v3007_v37 }
0x2723   :  { %v3016_v4 = vsel %vm3013_vm15, %v3015_v11, %v3011_v57  ;;  %v3561_v11 = vld [vmem:[#allocation5 + $0x70] ss:$0 sm:$0xff] }
0x2724   :  { %v3018_v44 = vmul.f32 %v3016_v4, %v2996_v46  ;;  %v3025_v61 = vsub.f32 1.0, %v3016_v4  ;;  %v3031_v31 = vmul.f32 %v3016_v4, %v4855_v13 }
0x2726   :  { %3020 = vrot.lane.b32.xlu0 %v3018_v44, %s3882_s20 }
0x272e   :  { %3057 = vrot.lane.b32.xlu0 %v3055_v6, %s3889_s28 }
0x2736   :  { %3163 = vrot.lane.b32.xlu0 %v3153_v27, %s3889_s28 }
0x2798   :  { %v3021_v39 = vpop.permute.xlu0 %3020 }
0x2799   :  { %v3023_v25 = vadd.f32 %v3021_v39, %v2976_v50 }
0x279b   :  { %3770 = vtanh.f32 %v3023_v25 }
0x27a0   :  { %v3058_v56 = vpop.permute.xlu0 %3057 }
0x27a1   :  { %v3771_v9 = vpop.eup %3770  ;;  %3466 = vmatmul.msk.bf16.vlgmr.msrb.gmra.mxu2 %vm195_vm0, %v3058_v56 }
0x27a2   :  { %3027 = vrot.lane.b32.xlu1 %v3771_v9, %s3889_s28 }
0x27a8   :  { %v3164_v53 = vpop.permute.xlu0 %3163 }
0x27a9   :  { %3486 = vmatmul.msk.bf16.vlgmr.msra.gmra.mxu1 %vm195_vm0, %v3164_v53 }
0x2814   :  { %v3028_v45 = vpop.permute.xlu1 %3027 }
0x2815   :  { %v3030_v35 = vmul.f32 %v3028_v45, %v3025_v61 }
0x2817   :  { %v3032_v1 = vadd.f32 %v3031_v31, %v3030_v35 }
0x2819   :  { %3034 = vrot.lane.b32.xlu2 %v3032_v1, %s3889_s28 }
0x2824   :  { %v3071_v8 = vpop.f32.mrf.mxu2 }
0x2825   :  { %v3072_v43 = vadd.f32 %v4731_v5, %v3071_v8 }
0x2826   :  { %v3194_v32 = vpop.f32.mrf.mxu1 }
0x2827   :  { %v3195_v58 = vadd.f32 %v4907_v16, %v3194_v32 }
0x2829   :  { %3207 = vst [vmem:[#allocation7 + $0x18] sm:$0xff] %v3195_v58 }
0x282c   :  { %v3073_v12 = vpop.f32.mrf.mxu2 }
0x282e   :  { %v3196_v28 = vpop.f32.mrf.mxu1 }
0x282f   :  { %v3197_v19 = vadd.f32 %v4907_v16, %v3196_v28 }
0x2831   :  { %3208 = vst [vmem:[#allocation7 + $0x20] sm:$0xff] %v3197_v19 }
0x2873   :  { %v3035_v15 = vpop.permute.xlu2 %3034 }
0x2874   :  { %v3037_v13 = vsel %vm195_vm0, %v3035_v15, %v4871_v3 }
0x2875   :  { %v3038_v10 = vpack.c.bf16 %v3037_v13, %v3037_v13 }
0x2877   :  { %3465 = vmatmul.msk.bf16.vlgmr.msrb.gmra.mxu3 %vm425_vm5, %v3038_v10 }
0x28fa   :  { %v3051_v47 = vpop.f32.mrf.mxu3 }
0x28fb   :  { %v3052_v24 = vadd.f32 %v4728_v29, %v3051_v47 }
0x28fd   :  { %v3467_v54 = vmul.f32 -1.442695, %v3052_v24 }
0x28ff   :  { %3772 = vpow2.f32 %v3467_v54 }
0x2902   :  { %v3053_v42 = vpop.f32.mrf.mxu3 }
0x2905   :  { %v3773_v62 = vpop.eup %3772 }
0x2906   :  { %v3078_v26 = vadd.f32 1.0, %v3773_v62 }
0x2908   :  { %3774 = vrcp.f32 %v3078_v26  ;;  %v3090_v17 = vand.u32 2147483648, %v3078_v26  ;;  %v3088_v30 = vand.u32 2147483647, %v3078_v26  ;;  %vm3084_vm2 = vweird.f32 %v3078_v26 }
0x290a   :  { %v3091_v18 = vor.u32 1.1754944e-38, %v3090_v17  ;;  %vm3089_vm5 = vcmp.eq.f32.partialorder %v3088_v30, 8.507059e+37 }
0x290e   :  { %v3775_v0 = vpop.eup %3774 }
0x290f   :  { %v3080_v23 = vmul.f32 %v3775_v0, %v3078_v26  ;;  %vm3085_vm1 = vweird.f32 %v3775_v0 }
0x2910   :  { %vm3086_vm3 = vmor %vm3084_vm2, %vm3085_vm1 }
0x2911   :  { %v3081_v51 = vsub.f32 1.0, %v3080_v23 }
0x2913   :  { %v3082_v7 = vmul.f32 %v3775_v0, %v3081_v51 }
0x2915   :  { %v3083_v20 = vadd.f32 %v3775_v0, %v3082_v7 }
0x2917   :  { %v3087_v29 = vsel %vm3086_vm3, %v3775_v0, %v3083_v20 }
0x2918   :  { %v3092_v22 = vsel %vm3089_vm5, %v3091_v18, %v3087_v29 }
0x2919   :  { %v3094_v50 = vmul.f32 %v3092_v22, %v3072_v43  ;;  %v3101_v2 = vsub.f32 1.0, %v3092_v22  ;;  %v3107_v49 = vmul.f32 %v3092_v22, %v4871_v3 }
0x291b   :  { %3096 = vrot.lane.b32.xlu1 %v3094_v50, %s3882_s20 }
0x2923   :  { %3118 = vrot.lane.b32.xlu1 %v3110_v40, %s3889_s28 }
0x298d   :  { %v3097_v14 = vpop.permute.xlu1 %3096 }
0x298e   :  { %v3099_v21 = vadd.f32 %v3097_v14, %v3052_v24 }
0x2990   :  { %3776 = vtanh.f32 %v3099_v21 }
0x2995   :  { %v3119_v34 = vpop.permute.xlu1 %3118 }
0x2996   :  { %v3777_v5 = vpop.eup %3776  ;;  %3476 = vmatmul.msk.bf16.vlgmr.msrb.gmra.mxu0 %vm195_vm0, %v3119_v34 }
0x2997   :  { %3103 = vrot.lane.b32.xlu2 %v3777_v5, %s3889_s28 }
0x29a6   :  { %3477 = vmatmul.msk.bf16.gmra.mxu0 %vm195_vm0, %v4715_v48 }
0x29f1   :  { %v3104_v36 = vpop.permute.xlu2 %3103 }
0x29f2   :  { %v3106_v52 = vmul.f32 %v3104_v36, %v3101_v2 }
0x29f4   :  { %v3108_v59 = vadd.f32 %v3107_v49, %v3106_v52 }
0x29f6   :  { %v3109_v63 = vmax.f32 %v3108_v59, 0.0 }
0x29f8   :  { %v3154_v37 = vpack.c.bf16 %v3109_v63, %v2880_v55 }
0x29fa   :  { %3165 = vrot.lane.b32.xlu2 %v3154_v37, %s3889_s28 }
0x2a13   :  { %v3144_v46 = vpop.f32.mrf.mxu0 }
0x2a14   :  { %v3145_v57 = vadd.f32 %v3561_v11, %v3144_v46 }
0x2a16   :  { %3204 = vst [vmem:[#allocation7] sm:$0xff] %v3145_v57 }
0x2a1b   :  { %v3146_v4 = vpop.f32.mrf.mxu0 }
0x2a1c   :  { %v3147_v44 = vadd.f32 %v3561_v11, %v3146_v4 }
0x2a1e   :  { %3205 = vst [vmem:[#allocation7 + $0x8] sm:$0xff] %v3147_v44 }
0x2a23   :  { %v3149_v48 = vpop.f32.mrf.mxu0 }
0x2a24   :  { %v3150_v6 = vadd.f32 %v3561_v11, %v3149_v48 }
0x2a26   :  { %3206 = vst [vmem:[#allocation7 + $0x10] sm:$0xff] %v3150_v6 }
0x2a2b   :  { %v3151_v27 = vpop.f32.mrf.mxu0 }
0x2a54   :  { %v3166_v60 = vpop.permute.xlu2 %3165 }
0x2a55   :  { %3487 = vmatmul.msk.bf16.gmra.mxu1 %vm195_vm0, %v3166_v60 }
0x2ad2   :  { %v3199_v38 = vpop.f32.mrf.mxu1 }
0x2ad3   :  { %v3200_v3 = vadd.f32 %v4907_v16, %v3199_v38 }
0x2ad5   :  { %3209 = vst [vmem:[#allocation7 + $0x28] sm:$0xff] %v3200_v3 }
0x2ada   :  { %v3201_v55 = vpop.f32.mrf.mxu1 }
0x2adb   :  { %v3202_v39 = vadd.f32 %v4907_v16, %v3201_v55 }
0x2add   :  { %3210 = vst [vmem:[#allocation7 + $0x30] sm:$0xff] %v3202_v39 }
0x2ade   :  { %3223 = dma.vmem_to_hbm [thread:$0]  %s3216_s14, 896, %s3218_s17, [#allocation4], %s3885_s24, %s3885_s24, %s3886_s25  }
0x2adf   :  { %3879 = dma.done.wait [#allocation4], 896  }
0x2ae0   :  { %3880 = vsyncadd [#allocation4], 4294966400 }
0x2ae1   :  { %3228 = vsyncpa [#allocation3], 1 }
0x2ae2   :  { %3229 = vsyncpa [#allocation6], 1 }
0x2ae3   :  { %3230 = vsyncpa [#allocation4], 1 }

</bundles_post_ra>
